<compile_context>
chip_gen: v7x
topology: tpu7x:2x2x1
jax: 0.10.0
libtpu: 0.0.40
codegen_flags: <defaults>
</compile_context>

<pallas_src>
import functools

import jax
import jax.numpy as jnp
from jax.experimental import pallas as pl
from jax.experimental.pallas import tpu as pltpu

NEG_SLOPE = 0.01   # torch.nn.LeakyReLU default negative_slope
LANES = 128        # lane-dense padding for conv output channels


# ----------------------------------------------------------------------------
# Pallas kernel: Y = X @ W + b (f32 accumulate), optional LeakyReLU, bf16 store.
# ----------------------------------------------------------------------------
def _matmul_bias_act_kernel(x_ref, w_ref, b_ref, o_ref, *, act):
    y = jnp.dot(x_ref[...], w_ref[...], preferred_element_type=jnp.float32)
    y = y + b_ref[...]
    if act:
        y = jnp.maximum(y, NEG_SLOPE * y)      # LeakyReLU: single VALU op
    o_ref[...] = y.astype(o_ref.dtype)


def matmul_bias_act(x, w, b, act, out_dtype=jnp.bfloat16):
    """x: (M, K) bf16, w: (K, N) bf16, b: (1, N) f32 -> (M, N)."""
    M, K = x.shape
    Kw, N = w.shape
    assert K == Kw, (K, Kw)
    # 2-way split along M so both v7x TensorCores get work; no activation padding.
    nb = 2 if (M % 16 == 0 and M >= 16) else 1
    TM = M // nb
    return pl.pallas_call(
        functools.partial(_matmul_bias_act_kernel, act=act),
        out_shape=jax.ShapeDtypeStruct((M, N), out_dtype),
        grid=(nb,),
        in_specs=[
            pl.BlockSpec((TM, K), lambda i: (i, 0)),
            pl.BlockSpec((K, N), lambda i: (0, 0)),
            pl.BlockSpec((1, N), lambda i: (0, 0)),
        ],
        out_specs=pl.BlockSpec((TM, N), lambda i: (i, 0)),
        compiler_params=pltpu.CompilerParams(dimension_semantics=("parallel",)),
    )(x, w, b)


# ----------------------------------------------------------------------------
# Fused FC tail: fc_x, disc_z (3x Linear+LeakyReLU), concat, fc  ->  (B, 1)
# Everything stays resident in VMEM inside one pallas_call.
# ----------------------------------------------------------------------------
def _fc_tail_kernel(hx_ref, z_ref, wfx_ref, bfx_ref,
                    wz1_ref, bz1_ref, wz2_ref, bz2_ref, wz3_ref, bz3_ref,
                    wfa_ref, wfb_ref, bfc_ref, o_ref):
    f32 = jnp.float32
    bf16 = jnp.bfloat16

    def lrelu(v):
        return jnp.maximum(v, NEG_SLOPE * v)

    # fc_x (no activation, matching the module)
    hx = jnp.dot(hx_ref[...], wfx_ref[...], preferred_element_type=f32) + bfx_ref[...]
    # disc_z: 3x Linear + LeakyReLU
    hz = lrelu(jnp.dot(z_ref[...], wz1_ref[...], preferred_element_type=f32) + bz1_ref[...])
    hz = lrelu(jnp.dot(hz.astype(bf16), wz2_ref[...], preferred_element_type=f32) + bz2_ref[...])
    hz = lrelu(jnp.dot(hz.astype(bf16), wz3_ref[...], preferred_element_type=f32) + bz3_ref[...])
    # fc on concat([h_x, h_z], dim=1): lane reduction with the fc weight split
    # into its h_x / h_z halves (avoids concat + a degenerate 512x1 matmul).
    logit = (jnp.sum(hx * wfa_ref[...], axis=-1, keepdims=True)
             + jnp.sum(hz * wfb_ref[...], axis=-1, keepdims=True)
             + bfc_ref[...])
    o_ref[...] = logit.astype(o_ref.dtype)


def _fc_tail(hx, z, params):
    B = hx.shape[0]
    wfx, bfx = params["fc_x"]
    (wz1, bz1), (wz2, bz2), (wz3, bz3) = params["disc_z"]
    wfa, wfb, bfc = params["fc"]
    args = (hx, z, wfx, bfx, wz1, bz1, wz2, bz2, wz3, bz3, wfa, wfb, bfc)
    return pl.pallas_call(
        _fc_tail_kernel,
        out_shape=jax.ShapeDtypeStruct((B, 1), jnp.float32),
        grid=(1,),
        in_specs=[pl.BlockSpec(a.shape, lambda i: (0, 0)) for a in args],
        out_specs=pl.BlockSpec((B, 1), lambda i: (0, 0)),
        compiler_params=pltpu.CompilerParams(dimension_semantics=("arbitrary",)),
    )(*args)


# ----------------------------------------------------------------------------
# NHWC patch gather for Conv2d(k=4, stride=2, pad=1): static strided slices,
# no transposes.  Column order is (kh, kw, cin) to match packed conv weights.
# ----------------------------------------------------------------------------
def _conv_patches_nhwc(x, cin, k=4, s=2, p=1):
    B, H, W, _ = x.shape
    xp = jnp.pad(x[..., :cin], ((0, 0), (p, p), (p, p), (0, 0)))
    Ho = (H + 2 * p - k) // s + 1
    Wo = (W + 2 * p - k) // s + 1
    taps = [xp[:, ki:ki + s * (Ho - 1) + 1:s, kj:kj + s * (Wo - 1) + 1:s, :]
            for ki in range(k) for kj in range(k)]
    cols = jnp.stack(taps, axis=3)                     # (B, Ho, Wo, k*k, cin)
    return cols.reshape(B * Ho * Wo, k * k * cin), (B, Ho, Wo)


# ----------------------------------------------------------------------------
# Parameter init (PyTorch layouts) + one-time packing into kernel layouts.
# ----------------------------------------------------------------------------
def _uniform(key, shape, fan_in):
    bound = 1.0 / jnp.sqrt(jnp.float32(fan_in))
    return jax.random.uniform(key, shape, jnp.float32, -bound, bound)


def _pack_conv(w_pt, b_pt, n_pad=LANES):
    """(Cout, Cin, 4, 4) -> (16*Cin, n_pad) bf16 with row order (kh, kw, cin);
    bias -> (1, n_pad) f32, zero in padded lanes."""
    cout, cin, kh, kw = w_pt.shape
    w = jnp.transpose(w_pt, (2, 3, 1, 0)).reshape(kh * kw * cin, cout)
    w = jnp.pad(w, ((0, 0), (0, n_pad - cout))).astype(jnp.bfloat16)
    b = jnp.pad(b_pt, (0, n_pad - cout)).reshape(1, n_pad).astype(jnp.float32)
    return w, b


def _pack_fc_x(w_pt, b_pt, c_real=64, hw=4, c_pad=LANES):
    """fc_x weight (256, 1024) acting on torch NCHW flatten order (c, h, w),
    re-indexed to the kernel's (h, w, c_pad) flatten order -> (16*c_pad, 256)."""
    dout = w_pt.shape[0]
    w = w_pt.reshape(dout, c_real, hw, hw)            # (out, c, h, w)
    w = jnp.transpose(w, (2, 3, 1, 0))                # (h, w, c, out)
    w = jnp.pad(w, ((0, 0), (0, 0), (0, c_pad - c_real), (0, 0)))
    w = w.reshape(hw * hw * c_pad, dout).astype(jnp.bfloat16)
    return w, b_pt.reshape(1, dout).astype(jnp.float32)


def _pack_linear(w_pt, b_pt, k_pad=None):
    """(out, in) PyTorch Linear weight -> (in[, zero-padded], out) bf16; bias (1, out) f32."""
    dout, din = w_pt.shape
    w = w_pt.T
    if k_pad is not None and k_pad > din:
        w = jnp.pad(w, ((0, k_pad - din), (0, 0)))
    return w.astype(jnp.bfloat16), b_pt.reshape(1, dout).astype(jnp.float32)


def _pack_fc(w_pt, b_pt):
    """fc weight (1, 512) over cat([h_x, h_z]) -> two (1, 256) f32 halves + (1,1) bias."""
    wfa = w_pt[:, :256].astype(jnp.float32)
    wfb = w_pt[:, 256:].astype(jnp.float32)
    return wfa, wfb, b_pt.reshape(1, 1).astype(jnp.float32)


def init_params(key, in_channels, z_dim):
    keys = jax.random.split(key, 20)
    it = iter(keys)

    def conv_pt(cin, cout):
        fan = cin * 16
        return (_uniform(next(it), (cout, cin, 4, 4), fan),
                _uniform(next(it), (cout,), fan))

    def lin_pt(din, dout):
        return (_uniform(next(it), (dout, din), din),
                _uniform(next(it), (dout,), din))

    convs = [conv_pt(in_channels, 32), conv_pt(32, 32), conv_pt(32, 64), conv_pt(64, 64)]
    fc_x = lin_pt(1024, 256)
    disc_z = [lin_pt(z_dim, 512), lin_pt(512, 512), lin_pt(512, 256)]
    fc = lin_pt(512, 1)

    z_kpad = ((z_dim + LANES - 1) // LANES) * LANES   # pad disc_z[0] K dim to lanes
    return {
        "conv": [_pack_conv(w, b) for (w, b) in convs],
        "fc_x": _pack_fc_x(*fc_x),
        "disc_z": [_pack_linear(*disc_z[0], k_pad=z_kpad),
                   _pack_linear(*disc_z[1]),
                   _pack_linear(*disc_z[2])],
        "fc": _pack_fc(*fc),
    }


# ----------------------------------------------------------------------------
# Discriminator forward: T(x, z) -> logits (b, 1)
# ----------------------------------------------------------------------------
def discriminator_forward(params, x, z):
    B, cin0, H, W = x.shape
    assert H == 64 and W == 64, "fc_x = Linear(1024, 256) requires 64x64 inputs"

    # disc_x: 4x [Conv2d(4, s=2, p=1) + LeakyReLU]; NHWC bf16 activations.
    h = jnp.transpose(x, (0, 2, 3, 1)).astype(jnp.bfloat16)   # one-time NCHW->NHWC
    cins = [cin0, 32, 32, 64]
    for (w, b), cin in zip(params["conv"], cins):
        cols, (B_, Ho, Wo) = _conv_patches_nhwc(h, cin)
        y = matmul_bias_act(cols, w, b, act=True)             # (B*Ho*Wo, 128) bf16
        h = y.reshape(B_, Ho, Wo, LANES)                      # free (contiguous) reshape

    # Flatten in (h, w, c_pad) order; fc_x weights were permuted/padded at init
    # to this order, so this matches torch's .view(-1, 1024) on an NCHW tensor.
    hx_flat = h.reshape(B, -1)                                # (B, 2048), free reshape

    # Pad z's feature dim to the packed wz1 K dim (extra weight rows are zero).
    wz1 = params["disc_z"][0][0]
    kpad = wz1.shape[0]
    zp = z.astype(jnp.bfloat16)
    if z.shape[1] < kpad:
        zp = jnp.pad(zp, ((0, 0), (0, kpad - z.shape[1])))

    # Fused FC tail: fc_x, disc_z, concat, fc -> logits.
    return _fc_tail(hx_flat, zp, params)


if __name__ == "__main__":
    B, C, HW, Z = 2, 4, 64, 8   # HW=64 is required by fc_x = Linear(1024, 256)
    key = jax.random.PRNGKey(0)
    kx, kz, kp = jax.random.split(key, 3)

    x = jax.random.normal(kx, (B, C, HW, HW), jnp.float32)
    z = jax.random.normal(kz, (B, Z), jnp.float32)
    params = init_params(kp, C, Z)

    forward = jax.jit(discriminator_forward)
    logits = jax.block_until_ready(forward(params, x, z))
    assert logits.shape == (B, 1), logits.shape
    print("KERNEL_OK")
</pallas_src>

<mosaic_0001>
module attributes {stable_mosaic.version = 11 : i64} {
  func.func @_matmul_bias_act_kernel(%arg0: i32, %arg1: memref<1024x64xbf16, #tpu.memory_space<vmem>>, %arg2: memref<64x128xbf16, #tpu.memory_space<vmem>>, %arg3: memref<1x128xf32, #tpu.memory_space<vmem>>, %arg4: memref<1024x128xbf16, #tpu.memory_space<vmem>>) attributes {dimension_semantics = [#tpu.dimension_semantics<parallel>], iteration_bounds = array<i64: 2>, scalar_prefetch = 0 : i64, scratch_operands = 0 : i64, tpu.core_type = #tpu.core_type<tc>, window_params = [{transform_indices = @transform_0, window_bounds = array<i64: 1024, 64>}, {pipeline_mode = #tpu.pipeline_mode<synchronous>, transform_indices = @transform_1, window_bounds = array<i64: 64, 128>}, {pipeline_mode = #tpu.pipeline_mode<synchronous>, transform_indices = @transform_2, window_bounds = array<i64: 1, 128>}, {transform_indices = @transform_3, window_bounds = array<i64: 1024, 128>}]} {
    %c0 = arith.constant 0 : index
    %c0_0 = arith.constant 0 : index
    %0 = vector.load %arg1[%c0, %c0_0] : memref<1024x64xbf16, #tpu.memory_space<vmem>>, vector<1024x64xbf16>
    %c0_1 = arith.constant 0 : index
    %c0_2 = arith.constant 0 : index
    %1 = vector.load %arg2[%c0_1, %c0_2] : memref<64x128xbf16, #tpu.memory_space<vmem>>, vector<64x128xbf16>
    %cst = arith.constant dense<0.000000e+00> : vector<1024x128xf32>
    %2 = tpu.matmul %0, %1, %cst {dimension_numbers = #tpu.dot_dimension_numbers<[1], [0], [0], [1], [0, 0, 1, 1], [], []>} : vector<1024x64xbf16>, vector<64x128xbf16>, vector<1024x128xf32> -> vector<1024x128xf32>
    %c0_3 = arith.constant 0 : index
    %c0_4 = arith.constant 0 : index
    %3 = vector.load %arg3[%c0_3, %c0_4] : memref<1x128xf32, #tpu.memory_space<vmem>>, vector<1x128xf32>
    %4 = vector.broadcast %3 : vector<1x128xf32> to vector<1024x128xf32>
    %5 = arith.addf %2, %4 : vector<1024x128xf32>
    %cst_5 = arith.constant 0.00999999977 : f32
    %6 = vector.broadcast %cst_5 : f32 to vector<1024x128xf32>
    %7 = arith.mulf %6, %5 : vector<1024x128xf32>
    %8 = arith.maximumf %5, %7 : vector<1024x128xf32>
    %9 = arith.truncf %8 : vector<1024x128xf32> to vector<1024x128xbf16>
    %c0_6 = arith.constant 0 : index
    %c0_7 = arith.constant 0 : index
    %10 = vector.load %arg4[%c0_6, %c0_7] : memref<1024x128xbf16, #tpu.memory_space<vmem>>, vector<1024x128xbf16>
    tpu.vector_store %arg4[%c0_6, %c0_7], %9 {strides = array<i32>} : memref<1024x128xbf16, #tpu.memory_space<vmem>>, vector<1024x128xbf16>,
    return
  }
  func.func @transform_0(%arg0: i32) -> (i32, i32) {
    %c0_i32 = arith.constant 0 : i32
    %c0_i32_0 = arith.constant 0 : i32
    return %arg0, %c0_i32 : i32, i32
  }
  func.func @transform_1(%arg0: i32) -> (i32, i32) {
    %c0_i32 = arith.constant 0 : i32
    %c0_i32_0 = arith.constant 0 : i32
    %c0_i32_1 = arith.constant 0 : i32
    return %c0_i32, %c0_i32_0 : i32, i32
  }
  func.func @transform_2(%arg0: i32) -> (i32, i32) {
    %c0_i32 = arith.constant 0 : i32
    %c0_i32_0 = arith.constant 0 : i32
    %c0_i32_1 = arith.constant 0 : i32
    return %c0_i32, %c0_i32_0 : i32, i32
  }
  func.func @transform_3(%arg0: i32) -> (i32, i32) {
    %c0_i32 = arith.constant 0 : i32
    %c0_i32_0 = arith.constant 0 : i32
    return %arg0, %c0_i32 : i32, i32
  }
}

module attributes {stable_mosaic.version = 11 : i64} {
  func.func @_matmul_bias_act_kernel(%arg0: i32, %arg1: memref<256x512xbf16, #tpu.memory_space<vmem>>, %arg2: memref<512x128xbf16, #tpu.memory_space<vmem>>, %arg3: memref<1x128xf32, #tpu.memory_space<vmem>>, %arg4: memref<256x128xbf16, #tpu.memory_space<vmem>>) attributes {dimension_semantics = [#tpu.dimension_semantics<parallel>], iteration_bounds = array<i64: 2>, scalar_prefetch = 0 : i64, scratch_operands = 0 : i64, tpu.core_type = #tpu.core_type<tc>, window_params = [{transform_indices = @transform_0, window_bounds = array<i64: 256, 512>}, {pipeline_mode = #tpu.pipeline_mode<synchronous>, transform_indices = @transform_1, window_bounds = array<i64: 512, 128>}, {pipeline_mode = #tpu.pipeline_mode<synchronous>, transform_indices = @transform_2, window_bounds = array<i64: 1, 128>}, {transform_indices = @transform_3, window_bounds = array<i64: 256, 128>}]} {
    %c0 = arith.constant 0 : index
    %c0_0 = arith.constant 0 : index
    %0 = vector.load %arg1[%c0, %c0_0] : memref<256x512xbf16, #tpu.memory_space<vmem>>, vector<256x512xbf16>
    %c0_1 = arith.constant 0 : index
    %c0_2 = arith.constant 0 : index
    %1 = vector.load %arg2[%c0_1, %c0_2] : memref<512x128xbf16, #tpu.memory_space<vmem>>, vector<512x128xbf16>
    %cst = arith.constant dense<0.000000e+00> : vector<256x128xf32>
    %2 = tpu.matmul %0, %1, %cst {dimension_numbers = #tpu.dot_dimension_numbers<[1], [0], [0], [1], [0, 0, 1, 1], [], []>} : vector<256x512xbf16>, vector<512x128xbf16>, vector<256x128xf32> -> vector<256x128xf32>
    %c0_3 = arith.constant 0 : index
    %c0_4 = arith.constant 0 : index
    %3 = vector.load %arg3[%c0_3, %c0_4] : memref<1x128xf32, #tpu.memory_space<vmem>>, vector<1x128xf32>
    %4 = vector.broadcast %3 : vector<1x128xf32> to vector<256x128xf32>
    %5 = arith.addf %2, %4 : vector<256x128xf32>
    %cst_5 = arith.constant 0.00999999977 : f32
    %6 = vector.broadcast %cst_5 : f32 to vector<256x128xf32>
    %7 = arith.mulf %6, %5 : vector<256x128xf32>
    %8 = arith.maximumf %5, %7 : vector<256x128xf32>
    %9 = arith.truncf %8 : vector<256x128xf32> to vector<256x128xbf16>
    %c0_6 = arith.constant 0 : index
    %c0_7 = arith.constant 0 : index
    %10 = vector.load %arg4[%c0_6, %c0_7] : memref<256x128xbf16, #tpu.memory_space<vmem>>, vector<256x128xbf16>
    tpu.vector_store %arg4[%c0_6, %c0_7], %9 {strides = array<i32>} : memref<256x128xbf16, #tpu.memory_space<vmem>>, vector<256x128xbf16>,
    return
  }
  func.func @transform_0(%arg0: i32) -> (i32, i32) {
    %c0_i32 = arith.constant 0 : i32
    %c0_i32_0 = arith.constant 0 : i32
    return %arg0, %c0_i32 : i32, i32
  }
  func.func @transform_1(%arg0: i32) -> (i32, i32) {
    %c0_i32 = arith.constant 0 : i32
    %c0_i32_0 = arith.constant 0 : i32
    %c0_i32_1 = arith.constant 0 : i32
    return %c0_i32, %c0_i32_0 : i32, i32
  }
  func.func @transform_2(%arg0: i32) -> (i32, i32) {
    %c0_i32 = arith.constant 0 : i32
    %c0_i32_0 = arith.constant 0 : i32
    %c0_i32_1 = arith.constant 0 : i32
    return %c0_i32, %c0_i32_0 : i32, i32
  }
  func.func @transform_3(%arg0: i32) -> (i32, i32) {
    %c0_i32 = arith.constant 0 : i32
    %c0_i32_0 = arith.constant 0 : i32
    return %arg0, %c0_i32 : i32, i32
  }
}

module attributes {stable_mosaic.version = 11 : i64} {
  func.func @_matmul_bias_act_kernel(%arg0: i32, %arg1: memref<64x512xbf16, #tpu.memory_space<vmem>>, %arg2: memref<512x128xbf16, #tpu.memory_space<vmem>>, %arg3: memref<1x128xf32, #tpu.memory_space<vmem>>, %arg4: memref<64x128xbf16, #tpu.memory_space<vmem>>) attributes {dimension_semantics = [#tpu.dimension_semantics<parallel>], iteration_bounds = array<i64: 2>, scalar_prefetch = 0 : i64, scratch_operands = 0 : i64, tpu.core_type = #tpu.core_type<tc>, window_params = [{transform_indices = @transform_0, window_bounds = array<i64: 64, 512>}, {pipeline_mode = #tpu.pipeline_mode<synchronous>, transform_indices = @transform_1, window_bounds = array<i64: 512, 128>}, {pipeline_mode = #tpu.pipeline_mode<synchronous>, transform_indices = @transform_2, window_bounds = array<i64: 1, 128>}, {transform_indices = @transform_3, window_bounds = array<i64: 64, 128>}]} {
    %c0 = arith.constant 0 : index
    %c0_0 = arith.constant 0 : index
    %0 = vector.load %arg1[%c0, %c0_0] : memref<64x512xbf16, #tpu.memory_space<vmem>>, vector<64x512xbf16>
    %c0_1 = arith.constant 0 : index
    %c0_2 = arith.constant 0 : index
    %1 = vector.load %arg2[%c0_1, %c0_2] : memref<512x128xbf16, #tpu.memory_space<vmem>>, vector<512x128xbf16>
    %cst = arith.constant dense<0.000000e+00> : vector<64x128xf32>
    %2 = tpu.matmul %0, %1, %cst {dimension_numbers = #tpu.dot_dimension_numbers<[1], [0], [0], [1], [0, 0, 1, 1], [], []>} : vector<64x512xbf16>, vector<512x128xbf16>, vector<64x128xf32> -> vector<64x128xf32>
    %c0_3 = arith.constant 0 : index
    %c0_4 = arith.constant 0 : index
    %3 = vector.load %arg3[%c0_3, %c0_4] : memref<1x128xf32, #tpu.memory_space<vmem>>, vector<1x128xf32>
    %4 = vector.broadcast %3 : vector<1x128xf32> to vector<64x128xf32>
    %5 = arith.addf %2, %4 : vector<64x128xf32>
    %cst_5 = arith.constant 0.00999999977 : f32
    %6 = vector.broadcast %cst_5 : f32 to vector<64x128xf32>
    %7 = arith.mulf %6, %5 : vector<64x128xf32>
    %8 = arith.maximumf %5, %7 : vector<64x128xf32>
    %9 = arith.truncf %8 : vector<64x128xf32> to vector<64x128xbf16>
    %c0_6 = arith.constant 0 : index
    %c0_7 = arith.constant 0 : index
    %10 = vector.load %arg4[%c0_6, %c0_7] : memref<64x128xbf16, #tpu.memory_space<vmem>>, vector<64x128xbf16>
    tpu.vector_store %arg4[%c0_6, %c0_7], %9 {strides = array<i32>} : memref<64x128xbf16, #tpu.memory_space<vmem>>, vector<64x128xbf16>,
    return
  }
  func.func @transform_0(%arg0: i32) -> (i32, i32) {
    %c0_i32 = arith.constant 0 : i32
    %c0_i32_0 = arith.constant 0 : i32
    return %arg0, %c0_i32 : i32, i32
  }
  func.func @transform_1(%arg0: i32) -> (i32, i32) {
    %c0_i32 = arith.constant 0 : i32
    %c0_i32_0 = arith.constant 0 : i32
    %c0_i32_1 = arith.constant 0 : i32
    return %c0_i32, %c0_i32_0 : i32, i32
  }
  func.func @transform_2(%arg0: i32) -> (i32, i32) {
    %c0_i32 = arith.constant 0 : i32
    %c0_i32_0 = arith.constant 0 : i32
    %c0_i32_1 = arith.constant 0 : i32
    return %c0_i32, %c0_i32_0 : i32, i32
  }
  func.func @transform_3(%arg0: i32) -> (i32, i32) {
    %c0_i32 = arith.constant 0 : i32
    %c0_i32_0 = arith.constant 0 : i32
    return %arg0, %c0_i32 : i32, i32
  }
}

module attributes {stable_mosaic.version = 11 : i64} {
  func.func @_matmul_bias_act_kernel(%arg0: i32, %arg1: memref<16x1024xbf16, #tpu.memory_space<vmem>>, %arg2: memref<1024x128xbf16, #tpu.memory_space<vmem>>, %arg3: memref<1x128xf32, #tpu.memory_space<vmem>>, %arg4: memref<16x128xbf16, #tpu.memory_space<vmem>>) attributes {dimension_semantics = [#tpu.dimension_semantics<parallel>], iteration_bounds = array<i64: 2>, scalar_prefetch = 0 : i64, scratch_operands = 0 : i64, tpu.core_type = #tpu.core_type<tc>, window_params = [{transform_indices = @transform_0, window_bounds = array<i64: 16, 1024>}, {pipeline_mode = #tpu.pipeline_mode<synchronous>, transform_indices = @transform_1, window_bounds = array<i64: 1024, 128>}, {pipeline_mode = #tpu.pipeline_mode<synchronous>, transform_indices = @transform_2, window_bounds = array<i64: 1, 128>}, {transform_indices = @transform_3, window_bounds = array<i64: 16, 128>}]} {
    %c0 = arith.constant 0 : index
    %c0_0 = arith.constant 0 : index
    %0 = vector.load %arg1[%c0, %c0_0] : memref<16x1024xbf16, #tpu.memory_space<vmem>>, vector<16x1024xbf16>
    %c0_1 = arith.constant 0 : index
    %c0_2 = arith.constant 0 : index
    %1 = vector.load %arg2[%c0_1, %c0_2] : memref<1024x128xbf16, #tpu.memory_space<vmem>>, vector<1024x128xbf16>
    %cst = arith.constant dense<0.000000e+00> : vector<16x128xf32>
    %2 = tpu.matmul %0, %1, %cst {dimension_numbers = #tpu.dot_dimension_numbers<[1], [0], [0], [1], [0, 0, 1, 1], [], []>} : vector<16x1024xbf16>, vector<1024x128xbf16>, vector<16x128xf32> -> vector<16x128xf32>
    %c0_3 = arith.constant 0 : index
    %c0_4 = arith.constant 0 : index
    %3 = vector.load %arg3[%c0_3, %c0_4] : memref<1x128xf32, #tpu.memory_space<vmem>>, vector<1x128xf32>
    %4 = vector.broadcast %3 : vector<1x128xf32> to vector<16x128xf32>
    %5 = arith.addf %2, %4 : vector<16x128xf32>
    %cst_5 = arith.constant 0.00999999977 : f32
    %6 = vector.broadcast %cst_5 : f32 to vector<16x128xf32>
    %7 = arith.mulf %6, %5 : vector<16x128xf32>
    %8 = arith.maximumf %5, %7 : vector<16x128xf32>
    %9 = arith.truncf %8 : vector<16x128xf32> to vector<16x128xbf16>
    %c0_6 = arith.constant 0 : index
    %c0_7 = arith.constant 0 : index
    %10 = vector.load %arg4[%c0_6, %c0_7] : memref<16x128xbf16, #tpu.memory_space<vmem>>, vector<16x128xbf16>
    tpu.vector_store %arg4[%c0_6, %c0_7], %9 {strides = array<i32>} : memref<16x128xbf16, #tpu.memory_space<vmem>>, vector<16x128xbf16>,
    return
  }
  func.func @transform_0(%arg0: i32) -> (i32, i32) {
    %c0_i32 = arith.constant 0 : i32
    %c0_i32_0 = arith.constant 0 : i32
    return %arg0, %c0_i32 : i32, i32
  }
  func.func @transform_1(%arg0: i32) -> (i32, i32) {
    %c0_i32 = arith.constant 0 : i32
    %c0_i32_0 = arith.constant 0 : i32
    %c0_i32_1 = arith.constant 0 : i32
    return %c0_i32, %c0_i32_0 : i32, i32
  }
  func.func @transform_2(%arg0: i32) -> (i32, i32) {
    %c0_i32 = arith.constant 0 : i32
    %c0_i32_0 = arith.constant 0 : i32
    %c0_i32_1 = arith.constant 0 : i32
    return %c0_i32, %c0_i32_0 : i32, i32
  }
  func.func @transform_3(%arg0: i32) -> (i32, i32) {
    %c0_i32 = arith.constant 0 : i32
    %c0_i32_0 = arith.constant 0 : i32
    return %arg0, %c0_i32 : i32, i32
  }
}

module attributes {stable_mosaic.version = 11 : i64} {
  func.func @_fc_tail_kernel(%arg0: i32, %arg1: memref<2x2048xbf16, #tpu.memory_space<vmem>>, %arg2: memref<2x128xbf16, #tpu.memory_space<vmem>>, %arg3: memref<2048x256xbf16, #tpu.memory_space<vmem>>, %arg4: memref<1x256xf32, #tpu.memory_space<vmem>>, %arg5: memref<128x512xbf16, #tpu.memory_space<vmem>>, %arg6: memref<1x512xf32, #tpu.memory_space<vmem>>, %arg7: memref<512x512xbf16, #tpu.memory_space<vmem>>, %arg8: memref<1x512xf32, #tpu.memory_space<vmem>>, %arg9: memref<512x256xbf16, #tpu.memory_space<vmem>>, %arg10: memref<1x256xf32, #tpu.memory_space<vmem>>, %arg11: memref<1x256xf32, #tpu.memory_space<vmem>>, %arg12: memref<1x256xf32, #tpu.memory_space<vmem>>, %arg13: memref<1x1xf32, #tpu.memory_space<vmem>>, %arg14: memref<2x1xf32, #tpu.memory_space<vmem>>) attributes {dimension_semantics = [#tpu.dimension_semantics<arbitrary>], iteration_bounds = array<i64: 1>, scalar_prefetch = 0 : i64, scratch_operands = 0 : i64, tpu.core_type = #tpu.core_type<tc>, window_params = [{pipeline_mode = #tpu.pipeline_mode<synchronous>, transform_indices = @transform_0, window_bounds = array<i64: 2, 2048>}, {pipeline_mode = #tpu.pipeline_mode<synchronous>, transform_indices = @transform_1, window_bounds = array<i64: 2, 128>}, {pipeline_mode = #tpu.pipeline_mode<synchronous>, transform_indices = @transform_2, window_bounds = array<i64: 2048, 256>}, {pipeline_mode = #tpu.pipeline_mode<synchronous>, transform_indices = @transform_3, window_bounds = array<i64: 1, 256>}, {pipeline_mode = #tpu.pipeline_mode<synchronous>, transform_indices = @transform_4, window_bounds = array<i64: 128, 512>}, {pipeline_mode = #tpu.pipeline_mode<synchronous>, transform_indices = @transform_5, window_bounds = array<i64: 1, 512>}, {pipeline_mode = #tpu.pipeline_mode<synchronous>, transform_indices = @transform_6, window_bounds = array<i64: 512, 512>}, {pipeline_mode = #tpu.pipeline_mode<synchronous>, transform_indices = @transform_7, window_bounds = array<i64: 1, 512>}, {pipeline_mode = #tpu.pipeline_mode<synchronous>, transform_indices = @transform_8, window_bounds = array<i64: 512, 256>}, {pipeline_mode = #tpu.pipeline_mode<synchronous>, transform_indices = @transform_9, window_bounds = array<i64: 1, 256>}, {pipeline_mode = #tpu.pipeline_mode<synchronous>, transform_indices = @transform_10, window_bounds = array<i64: 1, 256>}, {pipeline_mode = #tpu.pipeline_mode<synchronous>, transform_indices = @transform_11, window_bounds = array<i64: 1, 256>}, {pipeline_mode = #tpu.pipeline_mode<synchronous>, transform_indices = @transform_12, window_bounds = array<i64: 1, 1>}, {pipeline_mode = #tpu.pipeline_mode<synchronous>, transform_indices = @transform_13, window_bounds = array<i64: 2, 1>}]} {
    %c0 = arith.constant 0 : index
    %c0_0 = arith.constant 0 : index
    %0 = vector.load %arg1[%c0, %c0_0] : memref<2x2048xbf16, #tpu.memory_space<vmem>>, vector<2x2048xbf16>
    %c0_1 = arith.constant 0 : index
    %c0_2 = arith.constant 0 : index
    %1 = vector.load %arg3[%c0_1, %c0_2] : memref<2048x256xbf16, #tpu.memory_space<vmem>>, vector<2048x256xbf16>
    %cst = arith.constant dense<0.000000e+00> : vector<2x256xf32>
    %2 = tpu.matmul %0, %1, %cst {dimension_numbers = #tpu.dot_dimension_numbers<[1], [0], [0], [1], [0, 0, 1, 1], [], []>} : vector<2x2048xbf16>, vector<2048x256xbf16>, vector<2x256xf32> -> vector<2x256xf32>
    %c0_3 = arith.constant 0 : index
    %c0_4 = arith.constant 0 : index
    %3 = vector.load %arg4[%c0_3, %c0_4] : memref<1x256xf32, #tpu.memory_space<vmem>>, vector<1x256xf32>
    %4 = vector.broadcast %3 : vector<1x256xf32> to vector<2x256xf32>
    %5 = arith.addf %2, %4 : vector<2x256xf32>
    %c0_5 = arith.constant 0 : index
    %c0_6 = arith.constant 0 : index
    %6 = vector.load %arg2[%c0_5, %c0_6] : memref<2x128xbf16, #tpu.memory_space<vmem>>, vector<2x128xbf16>
    %c0_7 = arith.constant 0 : index
    %c0_8 = arith.constant 0 : index
    %7 = vector.load %arg5[%c0_7, %c0_8] : memref<128x512xbf16, #tpu.memory_space<vmem>>, vector<128x512xbf16>
    %cst_9 = arith.constant dense<0.000000e+00> : vector<2x512xf32>
    %8 = tpu.matmul %6, %7, %cst_9 {dimension_numbers = #tpu.dot_dimension_numbers<[1], [0], [0], [1], [0, 0, 1, 1], [], []>} : vector<2x128xbf16>, vector<128x512xbf16>, vector<2x512xf32> -> vector<2x512xf32>
    %c0_10 = arith.constant 0 : index
    %c0_11 = arith.constant 0 : index
    %9 = vector.load %arg6[%c0_10, %c0_11] : memref<1x512xf32, #tpu.memory_space<vmem>>, vector<1x512xf32>
    %10 = vector.broadcast %9 : vector<1x512xf32> to vector<2x512xf32>
    %11 = arith.addf %8, %10 : vector<2x512xf32>
    %cst_12 = arith.constant 0.00999999977 : f32
    %12 = vector.broadcast %cst_12 : f32 to vector<2x512xf32>
    %13 = arith.mulf %12, %11 : vector<2x512xf32>
    %14 = arith.maximumf %11, %13 : vector<2x512xf32>
    %15 = arith.truncf %14 : vector<2x512xf32> to vector<2x512xbf16>
    %c0_13 = arith.constant 0 : index
    %c0_14 = arith.constant 0 : index
    %16 = vector.load %arg7[%c0_13, %c0_14] : memref<512x512xbf16, #tpu.memory_space<vmem>>, vector<512x512xbf16>
    %cst_15 = arith.constant dense<0.000000e+00> : vector<2x512xf32>
    %17 = tpu.matmul %15, %16, %cst_15 {dimension_numbers = #tpu.dot_dimension_numbers<[1], [0], [0], [1], [0, 0, 1, 1], [], []>} : vector<2x512xbf16>, vector<512x512xbf16>, vector<2x512xf32> -> vector<2x512xf32>
    %c0_16 = arith.constant 0 : index
    %c0_17 = arith.constant 0 : index
    %18 = vector.load %arg8[%c0_16, %c0_17] : memref<1x512xf32, #tpu.memory_space<vmem>>, vector<1x512xf32>
    %19 = vector.broadcast %18 : vector<1x512xf32> to vector<2x512xf32>
    %20 = arith.addf %17, %19 : vector<2x512xf32>
    %cst_18 = arith.constant 0.00999999977 : f32
    %21 = vector.broadcast %cst_18 : f32 to vector<2x512xf32>
    %22 = arith.mulf %21, %20 : vector<2x512xf32>
    %23 = arith.maximumf %20, %22 : vector<2x512xf32>
    %24 = arith.truncf %23 : vector<2x512xf32> to vector<2x512xbf16>
    %c0_19 = arith.constant 0 : index
    %c0_20 = arith.constant 0 : index
    %25 = vector.load %arg9[%c0_19, %c0_20] : memref<512x256xbf16, #tpu.memory_space<vmem>>, vector<512x256xbf16>
    %cst_21 = arith.constant dense<0.000000e+00> : vector<2x256xf32>
    %26 = tpu.matmul %24, %25, %cst_21 {dimension_numbers = #tpu.dot_dimension_numbers<[1], [0], [0], [1], [0, 0, 1, 1], [], []>} : vector<2x512xbf16>, vector<512x256xbf16>, vector<2x256xf32> -> vector<2x256xf32>
    %c0_22 = arith.constant 0 : index
    %c0_23 = arith.constant 0 : index
    %27 = vector.load %arg10[%c0_22, %c0_23] : memref<1x256xf32, #tpu.memory_space<vmem>>, vector<1x256xf32>
    %28 = vector.broadcast %27 : vector<1x256xf32> to vector<2x256xf32>
    %29 = arith.addf %26, %28 : vector<2x256xf32>
    %cst_24 = arith.constant 0.00999999977 : f32
    %30 = vector.broadcast %cst_24 : f32 to vector<2x256xf32>
    %31 = arith.mulf %30, %29 : vector<2x256xf32>
    %32 = arith.maximumf %29, %31 : vector<2x256xf32>
    %c0_25 = arith.constant 0 : index
    %c0_26 = arith.constant 0 : index
    %33 = vector.load %arg11[%c0_25, %c0_26] : memref<1x256xf32, #tpu.memory_space<vmem>>, vector<1x256xf32>
    %34 = vector.broadcast %33 : vector<1x256xf32> to vector<2x256xf32>
    %35 = arith.mulf %5, %34 : vector<2x256xf32>
    %cst_27 = arith.constant dense<0.000000e+00> : vector<2xf32>
    %36 = vector.multi_reduction <add>, %35, %cst_27 [1] : vector<2x256xf32> to vector<2xf32>
    %37 = vector.shape_cast %36 : vector<2xf32> to vector<2x1xf32>
    %c0_28 = arith.constant 0 : index
    %c0_29 = arith.constant 0 : index
    %38 = vector.load %arg12[%c0_28, %c0_29] : memref<1x256xf32, #tpu.memory_space<vmem>>, vector<1x256xf32>
    %39 = vector.broadcast %38 : vector<1x256xf32> to vector<2x256xf32>
    %40 = arith.mulf %32, %39 : vector<2x256xf32>
    %cst_30 = arith.constant dense<0.000000e+00> : vector<2xf32>
    %41 = vector.multi_reduction <add>, %40, %cst_30 [1] : vector<2x256xf32> to vector<2xf32>
    %42 = vector.shape_cast %41 : vector<2xf32> to vector<2x1xf32>
    %43 = arith.addf %37, %42 : vector<2x1xf32>
    %c0_31 = arith.constant 0 : index
    %c0_32 = arith.constant 0 : index
    %44 = vector.load %arg13[%c0_31, %c0_32] : memref<1x1xf32, #tpu.memory_space<vmem>>, vector<1x1xf32>
    %45 = vector.broadcast %44 : vector<1x1xf32> to vector<2x1xf32>
    %46 = arith.addf %43, %45 : vector<2x1xf32>
    %c0_33 = arith.constant 0 : index
    %c0_34 = arith.constant 0 : index
    %47 = vector.load %arg14[%c0_33, %c0_34] : memref<2x1xf32, #tpu.memory_space<vmem>>, vector<2x1xf32>
    tpu.vector_store %arg14[%c0_33, %c0_34], %46 {strides = array<i32>} : memref<2x1xf32, #tpu.memory_space<vmem>>, vector<2x1xf32>,
    return
  }
  func.func @transform_0(%arg0: i32) -> (i32, i32) {
    %c0_i32 = arith.constant 0 : i32
    %c0_i32_0 = arith.constant 0 : i32
    %c0_i32_1 = arith.constant 0 : i32
    return %c0_i32, %c0_i32_0 : i32, i32
  }
  func.func @transform_1(%arg0: i32) -> (i32, i32) {
    %c0_i32 = arith.constant 0 : i32
    %c0_i32_0 = arith.constant 0 : i32
    %c0_i32_1 = arith.constant 0 : i32
    return %c0_i32, %c0_i32_0 : i32, i32
  }
  func.func @transform_2(%arg0: i32) -> (i32, i32) {
    %c0_i32 = arith.constant 0 : i32
    %c0_i32_0 = arith.constant 0 : i32
    %c0_i32_1 = arith.constant 0 : i32
    return %c0_i32, %c0_i32_0 : i32, i32
  }
  func.func @transform_3(%arg0: i32) -> (i32, i32) {
    %c0_i32 = arith.constant 0 : i32
    %c0_i32_0 = arith.constant 0 : i32
    %c0_i32_1 = arith.constant 0 : i32
    return %c0_i32, %c0_i32_0 : i32, i32
  }
  func.func @transform_4(%arg0: i32) -> (i32, i32) {
    %c0_i32 = arith.constant 0 : i32
    %c0_i32_0 = arith.constant 0 : i32
    %c0_i32_1 = arith.constant 0 : i32
    return %c0_i32, %c0_i32_0 : i32, i32
  }
  func.func @transform_5(%arg0: i32) -> (i32, i32) {
    %c0_i32 = arith.constant 0 : i32
    %c0_i32_0 = arith.constant 0 : i32
    %c0_i32_1 = arith.constant 0 : i32
    return %c0_i32, %c0_i32_0 : i32, i32
  }
  func.func @transform_6(%arg0: i32) -> (i32, i32) {
    %c0_i32 = arith.constant 0 : i32
    %c0_i32_0 = arith.constant 0 : i32
    %c0_i32_1 = arith.constant 0 : i32
    return %c0_i32, %c0_i32_0 : i32, i32
  }
  func.func @transform_7(%arg0: i32) -> (i32, i32) {
    %c0_i32 = arith.constant 0 : i32
    %c0_i32_0 = arith.constant 0 : i32
    %c0_i32_1 = arith.constant 0 : i32
    return %c0_i32, %c0_i32_0 : i32, i32
  }
  func.func @transform_8(%arg0: i32) -> (i32, i32) {
    %c0_i32 = arith.constant 0 : i32
    %c0_i32_0 = arith.constant 0 : i32
    %c0_i32_1 = arith.constant 0 : i32
    return %c0_i32, %c0_i32_0 : i32, i32
  }
  func.func @transform_9(%arg0: i32) -> (i32, i32) {
    %c0_i32 = arith.constant 0 : i32
    %c0_i32_0 = arith.constant 0 : i32
    %c0_i32_1 = arith.constant 0 : i32
    return %c0_i32, %c0_i32_0 : i32, i32
  }
  func.func @transform_10(%arg0: i32) -> (i32, i32) {
    %c0_i32 = arith.constant 0 : i32
    %c0_i32_0 = arith.constant 0 : i32
    %c0_i32_1 = arith.constant 0 : i32
    return %c0_i32, %c0_i32_0 : i32, i32
  }
  func.func @transform_11(%arg0: i32) -> (i32, i32) {
    %c0_i32 = arith.constant 0 : i32
    %c0_i32_0 = arith.constant 0 : i32
    %c0_i32_1 = arith.constant 0 : i32
    return %c0_i32, %c0_i32_0 : i32, i32
  }
  func.func @transform_12(%arg0: i32) -> (i32, i32) {
    %c0_i32 = arith.constant 0 : i32
    %c0_i32_0 = arith.constant 0 : i32
    %c0_i32_1 = arith.constant 0 : i32
    return %c0_i32, %c0_i32_0 : i32, i32
  }
  func.func @transform_13(%arg0: i32) -> (i32, i32) {
    %c0_i32 = arith.constant 0 : i32
    %c0_i32_0 = arith.constant 0 : i32
    %c0_i32_1 = arith.constant 0 : i32
    return %c0_i32, %c0_i32_0 : i32, i32
  }
}

</mosaic_0001>

<bundles_post_ra>
// kernel: discriminator_forward.5
= control target key start
LH: loop header
LB: loop body
LE: loop exit
PB: predicated region body
PF: predicated region fallthrough
CT: control target
= control target key end

     0   :  { %s3452_s12 = smov 0   ;;  %s3822_s0 = inlined_call_operand.vmem [shape: bf16[2048,64], index: 0, kind: input, shape index: {}]   ;;  %s3823_s1 = inlined_call_operand.vmem [shape: bf16[64,128], index: 1, kind: input, shape index: {}]   ;;  %s3824_s2 = inlined_call_operand.vmem [shape: f32[1,128], index: 2, kind: input, shape index: {}]   ;;  %s3825_s3 = inlined_call_operand.vmem [shape: bf16[2048,128], index: 3, kind: output, shape index: {}]  }
   0x1 LB: > { %s2352_s13 = sadd.s32 4294967295, %s3430_s12   ;;  %p2356_p0 = scmp.ge.s32.totalorder %s3430_s12, 1  ;;  %s3430_s12 = sphi %s3452_s12, %s13_s12  }
   0x2   : > { %p138_p1 = scmp.lt.s32.totalorder %s3430_s12, 3 }
   0x4   : > { %p139_p2 = pnand %p2356_p0, %p138_p1 }
   0x5   : > { %v3355_v0 = vld [vmem:[%s3823_s1] sm:$0xff] (!%p139_p2)   ;;  %s2357_s16 = sshll.u32 (!%p139_p2), %s2352_s13, 7  ;;  %v3356_v1 = vld [vmem:[%s3823_s1 + $0x8] sm:$0xff] (!%p139_p2)   ;;  %v3357_v2 = vld [vmem:[%s3823_s1 + $0x10] sm:$0xff] (!%p139_p2)   ;;  %vm662_vm0 = vcmask (!%p139_p2), 523264  }
   0x6   : > { %142 = sbr.rel (%p139_p2) target bundleno = 367 (0x16f), region = 32  ;;  %p163_p3 = scmp.lt.s32.totalorder (!%p139_p2), %s2357_s16, 255  ;;  %3203 = vmatprep.subr.bf16.mxu0 (!%p139_p2), %v3355_v0  ;;  %3339 = vmatprep.subr.bf16.mxu1 (!%p139_p2), %v3355_v0  ;;  %v3358_v3 = vld [vmem:[%s3823_s1 + $0x18] sm:$0xff] (!%p139_p2)  }
   0x7   : > { %3204 = vmatpush3.bf16.msra.mxu0 (!%p139_p2), %v3355_v0  ;;  %3343 = vmatpush3.bf16.msra.mxu1 (!%p139_p2), %v3355_v0 }
   0x8   : > { %3205 = vmatprep.subr.bf16.mxu0 (!%p139_p2), %v3356_v1  ;;  %3340 = vmatprep.subr.bf16.mxu1 (!%p139_p2), %v3356_v1 }
   0xb   : > { %3206 = vmatpush3.bf16.msra.mxu0 (!%p139_p2), %v3356_v1  ;;  %3344 = vmatpush3.bf16.msra.mxu1 (!%p139_p2), %v3356_v1 }
   0xc   : > { %3207 = vmatprep.subr.bf16.mxu0 (!%p139_p2), %v3357_v2  ;;  %3341 = vmatprep.subr.bf16.mxu1 (!%p139_p2), %v3357_v2 }
   0xd   : > { %s3827_s16 = smov (!%p163_p3, %s2357_s16), 255 }
   0xe   : > { %s2358_s21 = sshll.u32 %s3827_s16, 2 }
   0xf   : > { %s3480_s26 = scalar_lea.vmem %s3822_s0, %s2358_s21  ;;  %3208 = vmatpush3.bf16.msra.mxu0 %v3357_v2  ;;  %3345 = vmatpush3.bf16.msra.mxu1 %v3357_v2  ;;  %s3628_s4 = scalar_lea.vmem %s3825_s3, %s2358_s21 }
  0x10   : > { %v3359_v4 = vld [vmem:[%s3480_s26] sm:$0xff]   ;;  %3209 = vmatprep.subr.bf16.mxu0 %v3358_v3  ;;  %3342 = vmatprep.subr.bf16.mxu1 %v3358_v3  ;;  %v3361_v6 = vld [vmem:[%s3480_s26 + $0x8] sm:$0xff]   ;;  %v3363_v8 = vld [vmem:[%s3480_s26 + $0x10] sm:$0xff]  }
  0x11   : > { %v3360_v5 = vld [vmem:[%s3480_s26 + $0x100] sm:$0xff]   ;;  %3211 = vmatprep.mubr.msk.bf16.mxu0 %vm662_vm0, %v3359_v4  ;;  %v3362_v7 = vld [vmem:[%s3480_s26 + $0x108] sm:$0xff]   ;;  %v3364_v9 = vld [vmem:[%s3480_s26 + $0x110] sm:$0xff]  }
  0x12   : > { %3275 = vmatprep.mubr.msk.bf16.mxu1 %vm662_vm0, %v3360_v5  ;;  %v3365_v10 = vld [vmem:[%s3480_s26 + $0x18] sm:$0xff]   ;;  %v3367_v12 = vld [vmem:[%s3480_s26 + $0x20] sm:$0xff]   ;;  %v3369_v14 = vld [vmem:[%s3480_s26 + $0x28] sm:$0xff]  }
  0x13   : > { %3210 = vmatpush3.bf16.msra.mxu0 %v3358_v3  ;;  %3346 = vmatpush3.bf16.msra.mxu1 %v3358_v3  ;;  %v3366_v11 = vld [vmem:[%s3480_s26 + $0x118] sm:$0xff]   ;;  %v3368_v13 = vld [vmem:[%s3480_s26 + $0x120] sm:$0xff]   ;;  %v3370_v15 = vld [vmem:[%s3480_s26 + $0x128] sm:$0xff]  }
  0x14   : > { %v3371_v16 = vld [vmem:[%s3480_s26 + $0x30] sm:$0xff]   ;;  %v3373_v18 = vld [vmem:[%s3480_s26 + $0x38] sm:$0xff]   ;;  %v3375_v20 = vld [vmem:[%s3480_s26 + $0x40] sm:$0xff]  }
  0x15   : > { %v3372_v17 = vld [vmem:[%s3480_s26 + $0x130] sm:$0xff]   ;;  %v3374_v19 = vld [vmem:[%s3480_s26 + $0x138] sm:$0xff]   ;;  %v3376_v21 = vld [vmem:[%s3480_s26 + $0x140] sm:$0xff]  }
  0x16   : > { %3212 = vmatmul.mubr.msk.bf16.vlgmr.msra.gmra.mrb[0].mxu0 %vm662_vm0, %v3361_v6  ;;  %3276 = vmatmul.mubr.msk.bf16.vlgmr.msra.gmra.mrb[0].mxu1 %vm662_vm0, %v3362_v7  ;;  %v3377_v22 = vld [vmem:[%s3480_s26 + $0x48] sm:$0xff]   ;;  %v3379_v24 = vld [vmem:[%s3480_s26 + $0x50] sm:$0xff]   ;;  %v3381_v26 = vld [vmem:[%s3480_s26 + $0x58] sm:$0xff]  }
  0x17   : > { %3215 = vmatprep.mubr.msk.bf16.mxu0 %vm662_vm0, %v3363_v8  ;;  %3279 = vmatprep.mubr.msk.bf16.mxu1 %vm662_vm0, %v3364_v9  ;;  %v3378_v23 = vld [vmem:[%s3480_s26 + $0x148] sm:$0xff]   ;;  %v3380_v25 = vld [vmem:[%s3480_s26 + $0x150] sm:$0xff]   ;;  %v3382_v27 = vld [vmem:[%s3480_s26 + $0x158] sm:$0xff]  }
  0x18   : > { %v3383_v28 = vld [vmem:[%s3480_s26 + $0x60] sm:$0xff]   ;;  %v3385_v30 = vld [vmem:[%s3480_s26 + $0x68] sm:$0xff]   ;;  %v3387_v32 = vld [vmem:[%s3480_s26 + $0x70] sm:$0xff]  }
  0x19   : > { %v3384_v29 = vld [vmem:[%s3480_s26 + $0x160] sm:$0xff]   ;;  %v3386_v31 = vld [vmem:[%s3480_s26 + $0x168] sm:$0xff]   ;;  %v3388_v33 = vld [vmem:[%s3480_s26 + $0x170] sm:$0xff]  }
  0x1a   : > { %v3389_v34 = vld [vmem:[%s3480_s26 + $0x78] sm:$0xff]   ;;  %v3391_v36 = vld [vmem:[%s3480_s26 + $0x80] sm:$0xff]   ;;  %v3393_v38 = vld [vmem:[%s3480_s26 + $0x88] sm:$0xff]  }
  0x1b   : > { %v3390_v35 = vld [vmem:[%s3480_s26 + $0x178] sm:$0xff]   ;;  %v3392_v37 = vld [vmem:[%s3480_s26 + $0x180] sm:$0xff]   ;;  %v3394_v39 = vld [vmem:[%s3480_s26 + $0x188] sm:$0xff]  }
  0x1c   : > { %v3395_v40 = vld [vmem:[%s3480_s26 + $0x90] sm:$0xff]   ;;  %v3397_v42 = vld [vmem:[%s3480_s26 + $0x98] sm:$0xff]   ;;  %v3399_v44 = vld [vmem:[%s3480_s26 + $0xa0] sm:$0xff]  }
  0x1d   : > { %v3396_v41 = vld [vmem:[%s3480_s26 + $0x190] sm:$0xff]   ;;  %v3398_v43 = vld [vmem:[%s3480_s26 + $0x198] sm:$0xff]   ;;  %v3400_v45 = vld [vmem:[%s3480_s26 + $0x1a0] sm:$0xff]  }
  0x1e   : > { %3216 = vmatmul.mubr.msk.bf16.gmra.mrb[4].mxu0 %vm662_vm0, %v3365_v10  ;;  %3280 = vmatmul.mubr.msk.bf16.gmra.mrb[4].mxu1 %vm662_vm0, %v3366_v11  ;;  %v3401_v46 = vld [vmem:[%s3480_s26 + $0xa8] sm:$0xff]   ;;  %v3403_v48 = vld [vmem:[%s3480_s26 + $0xb0] sm:$0xff]   ;;  %v3405_v50 = vld [vmem:[%s3480_s26 + $0xb8] sm:$0xff]  }
  0x1f   : > { %3219 = vmatprep.mubr.msk.bf16.mxu0 %vm662_vm0, %v3367_v12  ;;  %3283 = vmatprep.mubr.msk.bf16.mxu1 %vm662_vm0, %v3368_v13  ;;  %v3402_v47 = vld [vmem:[%s3480_s26 + $0x1a8] sm:$0xff]   ;;  %v3404_v49 = vld [vmem:[%s3480_s26 + $0x1b0] sm:$0xff]   ;;  %v3406_v51 = vld [vmem:[%s3480_s26 + $0x1b8] sm:$0xff]  }
  0x20   : > { %v3407_v52 = vld [vmem:[%s3480_s26 + $0xc0] sm:$0xff]   ;;  %v3409_v54 = vld [vmem:[%s3480_s26 + $0xc8] sm:$0xff]   ;;  %v3411_v56 = vld [vmem:[%s3480_s26 + $0xd0] sm:$0xff]  }
  0x21   : > { %v3408_v53 = vld [vmem:[%s3480_s26 + $0x1c0] sm:$0xff]   ;;  %v3410_v55 = vld [vmem:[%s3480_s26 + $0x1c8] sm:$0xff]   ;;  %v3412_v57 = vld [vmem:[%s3480_s26 + $0x1d0] sm:$0xff]  }
  0x22   : > { %v3413_v58 = vld [vmem:[%s3480_s26 + $0xd8] sm:$0xff]   ;;  %v3415_v60 = vld [vmem:[%s3480_s26 + $0xe0] sm:$0xff]   ;;  %v3417_v62 = vld [vmem:[%s3480_s26 + $0xe8] sm:$0xff]  }
  0x23   : > { %v3414_v59 = vld [vmem:[%s3480_s26 + $0x1d8] sm:$0xff]   ;;  %v3416_v61 = vld [vmem:[%s3480_s26 + $0x1e0] sm:$0xff]   ;;  %v3418_v63 = vld [vmem:[%s3480_s26 + $0x1e8] sm:$0xff]  }
  0x24   : > { %v3419_v0 = vld [vmem:[%s3480_s26 + $0xf0] sm:$0xff]   ;;  %v3421_v2 = vld [vmem:[%s3480_s26 + $0xf8] sm:$0xff]   ;;  %v3613_v4 = vld [vmem:[%s3824_s2] ss:$0 sm:$0xff] }
  0x25   : > { %v3420_v1 = vld [vmem:[%s3480_s26 + $0x1f0] sm:$0xff]   ;;  %v3422_v3 = vld [vmem:[%s3480_s26 + $0x1f8] sm:$0xff]  }
  0x26   : > { %3220 = vmatmul.mubr.msk.bf16.gmra.mrb[8].mxu0 %vm662_vm0, %v3369_v14  ;;  %3284 = vmatmul.mubr.msk.bf16.gmra.mrb[8].mxu1 %vm662_vm0, %v3370_v15 }
  0x27   : > { %3223 = vmatprep.mubr.msk.bf16.mxu0 %vm662_vm0, %v3371_v16  ;;  %3287 = vmatprep.mubr.msk.bf16.mxu1 %vm662_vm0, %v3372_v17 }
  0x2e   : > { %3224 = vmatmul.mubr.msk.bf16.gmra.mrb[12].mxu0 %vm662_vm0, %v3373_v18  ;;  %3288 = vmatmul.mubr.msk.bf16.gmra.mrb[12].mxu1 %vm662_vm0, %v3374_v19 }
  0x2f   : > { %3227 = vmatprep.mubr.msk.bf16.mxu0 %vm662_vm0, %v3375_v20  ;;  %3291 = vmatprep.mubr.msk.bf16.mxu1 %vm662_vm0, %v3376_v21 }
  0x36   : > { %3228 = vmatmul.mubr.msk.bf16.gmra.mrb[16].mxu0 %vm662_vm0, %v3377_v22  ;;  %3292 = vmatmul.mubr.msk.bf16.gmra.mrb[16].mxu1 %vm662_vm0, %v3378_v23 }
  0x37   : > { %3231 = vmatprep.mubr.msk.bf16.mxu0 %vm662_vm0, %v3379_v24  ;;  %3295 = vmatprep.mubr.msk.bf16.mxu1 %vm662_vm0, %v3380_v25 }
  0x3e   : > { %3232 = vmatmul.mubr.msk.bf16.gmra.mrb[20].mxu0 %vm662_vm0, %v3381_v26  ;;  %3296 = vmatmul.mubr.msk.bf16.gmra.mrb[20].mxu1 %vm662_vm0, %v3382_v27 }
  0x3f   : > { %3235 = vmatprep.mubr.msk.bf16.mxu0 %vm662_vm0, %v3383_v28  ;;  %3299 = vmatprep.mubr.msk.bf16.mxu1 %vm662_vm0, %v3384_v29 }
  0x46   : > { %3236 = vmatmul.mubr.msk.bf16.gmra.mrb[24].mxu0 %vm662_vm0, %v3385_v30  ;;  %3300 = vmatmul.mubr.msk.bf16.gmra.mrb[24].mxu1 %vm662_vm0, %v3386_v31 }
  0x47   : > { %3239 = vmatprep.mubr.msk.bf16.mxu0 %vm662_vm0, %v3387_v32  ;;  %3303 = vmatprep.mubr.msk.bf16.mxu1 %vm662_vm0, %v3388_v33 }
  0x4e   : > { %3240 = vmatmul.mubr.msk.bf16.gmra.mrb[28].mxu0 %vm662_vm0, %v3389_v34  ;;  %3304 = vmatmul.mubr.msk.bf16.gmra.mrb[28].mxu1 %vm662_vm0, %v3390_v35 }
  0x4f   : > { %3243 = vmatprep.mubr.msk.bf16.mxu0 %vm662_vm0, %v3391_v36  ;;  %3307 = vmatprep.mubr.msk.bf16.mxu1 %vm662_vm0, %v3392_v37 }
  0x56   : > { %3244 = vmatmul.mubr.msk.bf16.gmra.mrb[32].mxu0 %vm662_vm0, %v3393_v38  ;;  %3308 = vmatmul.mubr.msk.bf16.gmra.mrb[32].mxu1 %vm662_vm0, %v3394_v39 }
  0x57   : > { %3247 = vmatprep.mubr.msk.bf16.mxu0 %vm662_vm0, %v3395_v40  ;;  %3311 = vmatprep.mubr.msk.bf16.mxu1 %vm662_vm0, %v3396_v41 }
  0x5e   : > { %3248 = vmatmul.mubr.msk.bf16.gmra.mrb[36].mxu0 %vm662_vm0, %v3397_v42  ;;  %3312 = vmatmul.mubr.msk.bf16.gmra.mrb[36].mxu1 %vm662_vm0, %v3398_v43 }
  0x5f   : > { %3251 = vmatprep.mubr.msk.bf16.mxu0 %vm662_vm0, %v3399_v44  ;;  %3315 = vmatprep.mubr.msk.bf16.mxu1 %vm662_vm0, %v3400_v45 }
  0x66   : > { %3252 = vmatmul.mubr.msk.bf16.gmra.mrb[40].mxu0 %vm662_vm0, %v3401_v46  ;;  %3316 = vmatmul.mubr.msk.bf16.gmra.mrb[40].mxu1 %vm662_vm0, %v3402_v47 }
  0x67   : > { %3255 = vmatprep.mubr.msk.bf16.mxu0 %vm662_vm0, %v3403_v48  ;;  %3319 = vmatprep.mubr.msk.bf16.mxu1 %vm662_vm0, %v3404_v49 }
  0x6e   : > { %3256 = vmatmul.mubr.msk.bf16.gmra.mrb[44].mxu0 %vm662_vm0, %v3405_v50  ;;  %3320 = vmatmul.mubr.msk.bf16.gmra.mrb[44].mxu1 %vm662_vm0, %v3406_v51 }
  0x6f   : > { %3259 = vmatprep.mubr.msk.bf16.mxu0 %vm662_vm0, %v3407_v52  ;;  %3323 = vmatprep.mubr.msk.bf16.mxu1 %vm662_vm0, %v3408_v53 }
  0x76   : > { %3260 = vmatmul.mubr.msk.bf16.gmra.mrb[48].mxu0 %vm662_vm0, %v3409_v54  ;;  %3324 = vmatmul.mubr.msk.bf16.gmra.mrb[48].mxu1 %vm662_vm0, %v3410_v55 }
  0x77   : > { %3263 = vmatprep.mubr.msk.bf16.mxu0 %vm662_vm0, %v3411_v56  ;;  %3327 = vmatprep.mubr.msk.bf16.mxu1 %vm662_vm0, %v3412_v57 }
  0x7e   : > { %3264 = vmatmul.mubr.msk.bf16.gmra.mrb[52].mxu0 %vm662_vm0, %v3413_v58  ;;  %3328 = vmatmul.mubr.msk.bf16.gmra.mrb[52].mxu1 %vm662_vm0, %v3414_v59 }
  0x7f   : > { %3267 = vmatprep.mubr.msk.bf16.mxu0 %vm662_vm0, %v3415_v60  ;;  %3331 = vmatprep.mubr.msk.bf16.mxu1 %vm662_vm0, %v3416_v61 }
  0x86   : > { %3268 = vmatmul.mubr.msk.bf16.gmra.mrb[56].mxu0 %vm662_vm0, %v3417_v62  ;;  %3332 = vmatmul.mubr.msk.bf16.gmra.mrb[56].mxu1 %vm662_vm0, %v3418_v63 }
  0x87   : > { %3271 = vmatprep.mubr.msk.bf16.mxu0 %vm662_vm0, %v3419_v0  ;;  %3335 = vmatprep.mubr.msk.bf16.mxu1 %vm662_vm0, %v3420_v1 }
  0x8e   : > { %3272 = vmatmul.mubr.msk.bf16.gmra.mrb[60].mxu0 %vm662_vm0, %v3421_v2  ;;  %3336 = vmatmul.mubr.msk.bf16.gmra.mrb[60].mxu1 %vm662_vm0, %v3422_v3 }
  0xe9   : > { %v3213_v5 = vpop.f32.mrb[0].mxu0  ;;  %v3277_v6 = vpop.f32.mrb[0].mxu1 }
  0xea   : > { %v898_v7 = vadd.f32 %v3213_v5, %v3613_v4  ;;  %v1154_v8 = vadd.f32 %v3277_v6, %v3613_v4  ;;  %v889_v9 = vpop.f32.mrb[1].mxu0  ;;  %v1145_v10 = vpop.f32.mrb[1].mxu1 }
  0xeb   : > { %v890_v11 = vadd.f32 %v3613_v4, %v889_v9  ;;  %v1146_v12 = vadd.f32 %v3613_v4, %v1145_v10  ;;  %v3214_v13 = vpop.f32.mrb[2].mxu0  ;;  %v3278_v14 = vpop.f32.mrb[2].mxu1 }
  0xec   : > { %v1402_v15 = vmul.f32 0.01, %v898_v7  ;;  %v1466_v16 = vmul.f32 0.01, %v1154_v8  ;;  %v901_v17 = vadd.f32 %v3214_v13, %v3613_v4  ;;  %v1157_v18 = vadd.f32 %v3278_v14, %v3613_v4  ;;  %v892_v19 = vpop.f32.mrb[3].mxu0  ;;  %v1148_v20 = vpop.f32.mrb[3].mxu1 }
  0xed   : > { %v1400_v21 = vmul.f32 0.01, %v890_v11  ;;  %v1464_v22 = vmul.f32 0.01, %v1146_v12  ;;  %v893_v23 = vadd.f32 %v3613_v4, %v892_v19  ;;  %v1149_v24 = vadd.f32 %v3613_v4, %v1148_v20 }
  0xee   : > { %v1403_v25 = vmul.f32 0.01, %v901_v17  ;;  %v1467_v26 = vmul.f32 0.01, %v1157_v18  ;;  %v1530_v29 = vmax.f32 %v898_v7, %v1402_v15  ;;  %v1594_v30 = vmax.f32 %v1154_v8, %v1466_v16 }
  0xef   : > { %v1401_v27 = vmul.f32 0.01, %v893_v23  ;;  %v1465_v28 = vmul.f32 0.01, %v1149_v24  ;;  %v1528_v33 = vmax.f32 %v890_v11, %v1400_v21  ;;  %v1592_v34 = vmax.f32 %v1146_v12, %v1464_v22 }
  0xf0   : > { %v1531_v31 = vmax.f32 %v901_v17, %v1403_v25  ;;  %v1595_v32 = vmax.f32 %v1157_v18, %v1467_v26 }
  0xf1   : > { %v1529_v35 = vmax.f32 %v893_v23, %v1401_v27  ;;  %v1593_v36 = vmax.f32 %v1149_v24, %v1465_v28  ;;  %v3217_v37 = vpop.f32.mrb[4].mxu0  ;;  %v3281_v38 = vpop.f32.mrb[4].mxu1 }
  0xf2   : > { %v2760_v39 = vpack.c.bf16 %v1531_v31, %v1530_v29  ;;  %v2920_v40 = vpack.c.bf16 %v1595_v32, %v1594_v30  ;;  %v914_v41 = vadd.f32 %v3217_v37, %v3613_v4  ;;  %v1170_v42 = vadd.f32 %v3281_v38, %v3613_v4  ;;  %v905_v43 = vpop.f32.mrb[5].mxu0  ;;  %v1161_v44 = vpop.f32.mrb[5].mxu1 }
  0xf3   : > { %v2755_v45 = vpack.c.bf16 %v1529_v35, %v1528_v33  ;;  %v2915_v46 = vpack.c.bf16 %v1593_v36, %v1592_v34  ;;  %v906_v47 = vadd.f32 %v3613_v4, %v905_v43  ;;  %v1162_v48 = vadd.f32 %v3613_v4, %v1161_v44  ;;  %v3218_v49 = vpop.f32.mrb[6].mxu0  ;;  %v3282_v50 = vpop.f32.mrb[6].mxu1 }
  0xf4   : > { %3072 = vst [vmem:[%s3628_s4 + $0x8] sm:$0xff] %v2760_v39   ;;  %3104 = vst [vmem:[%s3628_s4 + $0x108] sm:$0xff] %v2920_v40   ;;  %v1406_v51 = vmul.f32 0.01, %v914_v41  ;;  %v1470_v52 = vmul.f32 0.01, %v1170_v42  ;;  %v917_v53 = vadd.f32 %v3218_v49, %v3613_v4  ;;  %v1173_v54 = vadd.f32 %v3282_v50, %v3613_v4 }
  0xf5   : > { %v908_v55 = vpop.f32.mrb[7].mxu0  ;;  %v1164_v56 = vpop.f32.mrb[7].mxu1  ;;  %2756 = vst [vmem:[%s3628_s4] sm:$0xff] %v2755_v45   ;;  %3103 = vst [vmem:[%s3628_s4 + $0x100] sm:$0xff] %v2915_v46   ;;  %v1404_v57 = vmul.f32 0.01, %v906_v47 }
  0xf6   : > { %v1468_v58 = vmul.f32 0.01, %v1162_v48  ;;  %v909_v59 = vadd.f32 %v3613_v4, %v908_v55  ;;  %v1165_v60 = vadd.f32 %v3613_v4, %v1164_v56  ;;  %v1407_v61 = vmul.f32 0.01, %v917_v53 }
  0xf7   : > { %v1471_v62 = vmul.f32 0.01, %v1173_v54  ;;  %v1534_v1 = vmax.f32 %v914_v41, %v1406_v51  ;;  %v1598_v2 = vmax.f32 %v1170_v42, %v1470_v52  ;;  %v1532_v6 = vmax.f32 %v906_v47, %v1404_v57 }
  0xf8   : > { %v1405_v63 = vmul.f32 0.01, %v909_v59  ;;  %v1469_v0 = vmul.f32 0.01, %v1165_v60  ;;  %v1535_v3 = vmax.f32 %v917_v53, %v1407_v61  ;;  %v1596_v7 = vmax.f32 %v1162_v48, %v1468_v58 }
  0xf9   : > { %v1599_v5 = vmax.f32 %v1173_v54, %v1471_v62  ;;  %v3221_v10 = vpop.f32.mrb[8].mxu0  ;;  %v3285_v11 = vpop.f32.mrb[8].mxu1 }
  0xfa   : > { %v1533_v8 = vmax.f32 %v909_v59, %v1405_v63  ;;  %v1597_v9 = vmax.f32 %v1165_v60, %v1469_v0  ;;  %v2770_v12 = vpack.c.bf16 %v1535_v3, %v1534_v1  ;;  %v930_v14 = vadd.f32 %v3221_v10, %v3613_v4  ;;  %v921_v16 = vpop.f32.mrb[9].mxu0  ;;  %v1177_v17 = vpop.f32.mrb[9].mxu1 }
  0xfb   : > { %v2930_v13 = vpack.c.bf16 %v1599_v5, %v1598_v2  ;;  %v1186_v15 = vadd.f32 %v3285_v11, %v3613_v4  ;;  %v922_v20 = vadd.f32 %v3613_v4, %v921_v16  ;;  %v1178_v21 = vadd.f32 %v3613_v4, %v1177_v17  ;;  %v3222_v22 = vpop.f32.mrb[10].mxu0  ;;  %v3286_v23 = vpop.f32.mrb[10].mxu1 }
  0xfc   : > { %v2765_v18 = vpack.c.bf16 %v1533_v8, %v1532_v6  ;;  %v2925_v19 = vpack.c.bf16 %v1597_v9, %v1596_v7  ;;  %3074 = vst [vmem:[%s3628_s4 + $0x18] sm:$0xff] %v2770_v12   ;;  %v1410_v24 = vmul.f32 0.01, %v930_v14  ;;  %v933_v26 = vadd.f32 %v3222_v22, %v3613_v4  ;;  %v924_v28 = vpop.f32.mrb[11].mxu0  ;;  %v1180_v29 = vpop.f32.mrb[11].mxu1 }
  0xfd   : > { %3106 = vst [vmem:[%s3628_s4 + $0x118] sm:$0xff] %v2930_v13   ;;  %v1474_v25 = vmul.f32 0.01, %v1186_v15  ;;  %v1189_v27 = vadd.f32 %v3286_v23, %v3613_v4  ;;  %v1408_v30 = vmul.f32 0.01, %v922_v20  ;;  %v925_v32 = vadd.f32 %v3613_v4, %v924_v28 }
  0xfe   : > { %3073 = vst [vmem:[%s3628_s4 + $0x10] sm:$0xff] %v2765_v18   ;;  %3105 = vst [vmem:[%s3628_s4 + $0x110] sm:$0xff] %v2925_v19   ;;  %v1472_v31 = vmul.f32 0.01, %v1178_v21  ;;  %v1181_v33 = vadd.f32 %v3613_v4, %v1180_v29  ;;  %v1411_v34 = vmul.f32 0.01, %v933_v26  ;;  %v1538_v38 = vmax.f32 %v930_v14, %v1410_v24 }
  0xff   : > { %v1475_v35 = vmul.f32 0.01, %v1189_v27  ;;  %v1409_v36 = vmul.f32 0.01, %v925_v32  ;;  %v1602_v39 = vmax.f32 %v1186_v15, %v1474_v25  ;;  %v1536_v42 = vmax.f32 %v922_v20, %v1408_v30 }
 0x100   : > { %v1473_v37 = vmul.f32 0.01, %v1181_v33  ;;  %v1539_v40 = vmax.f32 %v933_v26, %v1411_v34  ;;  %v1600_v43 = vmax.f32 %v1178_v21, %v1472_v31 }
 0x101   : > { %v1603_v41 = vmax.f32 %v1189_v27, %v1475_v35  ;;  %v1537_v44 = vmax.f32 %v925_v32, %v1409_v36  ;;  %v3225_v46 = vpop.f32.mrb[12].mxu0  ;;  %v3289_v47 = vpop.f32.mrb[12].mxu1 }
 0x102   : > { %v1601_v45 = vmax.f32 %v1181_v33, %v1473_v37  ;;  %v2780_v48 = vpack.c.bf16 %v1539_v40, %v1538_v38  ;;  %v946_v50 = vadd.f32 %v3225_v46, %v3613_v4  ;;  %v1202_v51 = vadd.f32 %v3289_v47, %v3613_v4  ;;  %v937_v52 = vpop.f32.mrb[13].mxu0  ;;  %v1193_v53 = vpop.f32.mrb[13].mxu1 }
 0x103   : > { %v2940_v49 = vpack.c.bf16 %v1603_v41, %v1602_v39  ;;  %v2775_v54 = vpack.c.bf16 %v1537_v44, %v1536_v42  ;;  %v938_v56 = vadd.f32 %v3613_v4, %v937_v52  ;;  %v1194_v57 = vadd.f32 %v3613_v4, %v1193_v53  ;;  %v3226_v58 = vpop.f32.mrb[14].mxu0  ;;  %v3290_v59 = vpop.f32.mrb[14].mxu1 }
 0x104   : > { %v2935_v55 = vpack.c.bf16 %v1601_v45, %v1600_v43  ;;  %3076 = vst [vmem:[%s3628_s4 + $0x28] sm:$0xff] %v2780_v48   ;;  %v1414_v60 = vmul.f32 0.01, %v946_v50  ;;  %v1478_v61 = vmul.f32 0.01, %v1202_v51  ;;  %v949_v62 = vadd.f32 %v3226_v58, %v3613_v4  ;;  %v940_v0 = vpop.f32.mrb[15].mxu0 }
 0x105   : > { %3108 = vst [vmem:[%s3628_s4 + $0x128] sm:$0xff] %v2940_v49   ;;  %v1205_v63 = vadd.f32 %v3290_v59, %v3613_v4  ;;  %v1196_v1 = vpop.f32.mrb[15].mxu1  ;;  %3075 = vst [vmem:[%s3628_s4 + $0x20] sm:$0xff] %v2775_v54   ;;  %v1412_v2 = vmul.f32 0.01, %v938_v56  ;;  %v941_v5 = vadd.f32 %v3613_v4, %v940_v0 }
 0x106   : > { %3107 = vst [vmem:[%s3628_s4 + $0x120] sm:$0xff] %v2935_v55   ;;  %v1476_v3 = vmul.f32 0.01, %v1194_v57  ;;  %v1197_v6 = vadd.f32 %v3613_v4, %v1196_v1  ;;  %v1415_v7 = vmul.f32 0.01, %v949_v62  ;;  %v1542_v11 = vmax.f32 %v946_v50, %v1414_v60 }
 0x107   : > { %v1479_v8 = vmul.f32 0.01, %v1205_v63  ;;  %v1413_v9 = vmul.f32 0.01, %v941_v5  ;;  %v1606_v12 = vmax.f32 %v1202_v51, %v1478_v61  ;;  %v1540_v15 = vmax.f32 %v938_v56, %v1412_v2 }
 0x108   : > { %v1477_v10 = vmul.f32 0.01, %v1197_v6  ;;  %v1543_v13 = vmax.f32 %v949_v62, %v1415_v7  ;;  %v1604_v16 = vmax.f32 %v1194_v57, %v1476_v3 }
 0x109   : > { %v1607_v14 = vmax.f32 %v1205_v63, %v1479_v8  ;;  %v1541_v17 = vmax.f32 %v941_v5, %v1413_v9  ;;  %v3229_v19 = vpop.f32.mrb[16].mxu0  ;;  %v3293_v20 = vpop.f32.mrb[16].mxu1 }
 0x10a   : > { %v1605_v18 = vmax.f32 %v1197_v6, %v1477_v10  ;;  %v2790_v21 = vpack.c.bf16 %v1543_v13, %v1542_v11  ;;  %v962_v23 = vadd.f32 %v3229_v19, %v3613_v4  ;;  %v1218_v24 = vadd.f32 %v3293_v20, %v3613_v4  ;;  %v953_v25 = vpop.f32.mrb[17].mxu0  ;;  %v1209_v26 = vpop.f32.mrb[17].mxu1 }
 0x10b   : > { %v2950_v22 = vpack.c.bf16 %v1607_v14, %v1606_v12  ;;  %v2785_v27 = vpack.c.bf16 %v1541_v17, %v1540_v15  ;;  %v954_v29 = vadd.f32 %v3613_v4, %v953_v25  ;;  %v1210_v30 = vadd.f32 %v3613_v4, %v1209_v26  ;;  %v3230_v31 = vpop.f32.mrb[18].mxu0  ;;  %v3294_v32 = vpop.f32.mrb[18].mxu1 }
 0x10c   : > { %v2945_v28 = vpack.c.bf16 %v1605_v18, %v1604_v16  ;;  %3078 = vst [vmem:[%s3628_s4 + $0x38] sm:$0xff] %v2790_v21   ;;  %v1418_v33 = vmul.f32 0.01, %v962_v23  ;;  %v1482_v34 = vmul.f32 0.01, %v1218_v24  ;;  %v965_v35 = vadd.f32 %v3230_v31, %v3613_v4  ;;  %v956_v37 = vpop.f32.mrb[19].mxu0 }
 0x10d   : > { %3110 = vst [vmem:[%s3628_s4 + $0x138] sm:$0xff] %v2950_v22   ;;  %v1221_v36 = vadd.f32 %v3294_v32, %v3613_v4  ;;  %v1212_v38 = vpop.f32.mrb[19].mxu1  ;;  %3077 = vst [vmem:[%s3628_s4 + $0x30] sm:$0xff] %v2785_v27   ;;  %v1416_v39 = vmul.f32 0.01, %v954_v29  ;;  %v957_v41 = vadd.f32 %v3613_v4, %v956_v37 }
 0x10e   : > { %3109 = vst [vmem:[%s3628_s4 + $0x130] sm:$0xff] %v2945_v28   ;;  %v1480_v40 = vmul.f32 0.01, %v1210_v30  ;;  %v1213_v42 = vadd.f32 %v3613_v4, %v1212_v38  ;;  %v1419_v43 = vmul.f32 0.01, %v965_v35  ;;  %v1546_v47 = vmax.f32 %v962_v23, %v1418_v33 }
 0x10f   : > { %v1483_v44 = vmul.f32 0.01, %v1221_v36  ;;  %v1417_v45 = vmul.f32 0.01, %v957_v41  ;;  %v1610_v48 = vmax.f32 %v1218_v24, %v1482_v34  ;;  %v1544_v51 = vmax.f32 %v954_v29, %v1416_v39 }
 0x110   : > { %v1481_v46 = vmul.f32 0.01, %v1213_v42  ;;  %v1547_v49 = vmax.f32 %v965_v35, %v1419_v43  ;;  %v1608_v52 = vmax.f32 %v1210_v30, %v1480_v40 }
 0x111   : > { %v1611_v50 = vmax.f32 %v1221_v36, %v1483_v44  ;;  %v1545_v53 = vmax.f32 %v957_v41, %v1417_v45  ;;  %v3233_v55 = vpop.f32.mrb[20].mxu0  ;;  %v3297_v56 = vpop.f32.mrb[20].mxu1 }
 0x112   : > { %v1609_v54 = vmax.f32 %v1213_v42, %v1481_v46  ;;  %v2800_v57 = vpack.c.bf16 %v1547_v49, %v1546_v47  ;;  %v978_v59 = vadd.f32 %v3233_v55, %v3613_v4  ;;  %v1234_v60 = vadd.f32 %v3297_v56, %v3613_v4  ;;  %v969_v61 = vpop.f32.mrb[21].mxu0  ;;  %v1225_v62 = vpop.f32.mrb[21].mxu1 }
 0x113   : > { %v2960_v58 = vpack.c.bf16 %v1611_v50, %v1610_v48  ;;  %v2795_v63 = vpack.c.bf16 %v1545_v53, %v1544_v51  ;;  %v970_v1 = vadd.f32 %v3613_v4, %v969_v61  ;;  %v1226_v2 = vadd.f32 %v3613_v4, %v1225_v62  ;;  %v3234_v3 = vpop.f32.mrb[22].mxu0  ;;  %v3298_v5 = vpop.f32.mrb[22].mxu1 }
 0x114   : > { %v2955_v0 = vpack.c.bf16 %v1609_v54, %v1608_v52  ;;  %3080 = vst [vmem:[%s3628_s4 + $0x48] sm:$0xff] %v2800_v57   ;;  %v1422_v6 = vmul.f32 0.01, %v978_v59  ;;  %v1486_v7 = vmul.f32 0.01, %v1234_v60  ;;  %v981_v8 = vadd.f32 %v3234_v3, %v3613_v4  ;;  %v972_v10 = vpop.f32.mrb[23].mxu0 }
 0x115   : > { %3112 = vst [vmem:[%s3628_s4 + $0x148] sm:$0xff] %v2960_v58   ;;  %v1237_v9 = vadd.f32 %v3298_v5, %v3613_v4  ;;  %v1228_v11 = vpop.f32.mrb[23].mxu1  ;;  %3079 = vst [vmem:[%s3628_s4 + $0x40] sm:$0xff] %v2795_v63   ;;  %v1420_v12 = vmul.f32 0.01, %v970_v1  ;;  %v973_v14 = vadd.f32 %v3613_v4, %v972_v10 }
 0x116   : > { %3111 = vst [vmem:[%s3628_s4 + $0x140] sm:$0xff] %v2955_v0   ;;  %v1484_v13 = vmul.f32 0.01, %v1226_v2  ;;  %v1229_v15 = vadd.f32 %v3613_v4, %v1228_v11  ;;  %v1423_v16 = vmul.f32 0.01, %v981_v8  ;;  %v1550_v20 = vmax.f32 %v978_v59, %v1422_v6 }
 0x117   : > { %v1487_v17 = vmul.f32 0.01, %v1237_v9  ;;  %v1421_v18 = vmul.f32 0.01, %v973_v14  ;;  %v1614_v21 = vmax.f32 %v1234_v60, %v1486_v7  ;;  %v1548_v24 = vmax.f32 %v970_v1, %v1420_v12 }
 0x118   : > { %v1485_v19 = vmul.f32 0.01, %v1229_v15  ;;  %v1551_v22 = vmax.f32 %v981_v8, %v1423_v16  ;;  %v1612_v25 = vmax.f32 %v1226_v2, %v1484_v13 }
 0x119   : > { %v1615_v23 = vmax.f32 %v1237_v9, %v1487_v17  ;;  %v1549_v26 = vmax.f32 %v973_v14, %v1421_v18  ;;  %v3237_v28 = vpop.f32.mrb[24].mxu0  ;;  %v3301_v29 = vpop.f32.mrb[24].mxu1 }
 0x11a   : > { %v1613_v27 = vmax.f32 %v1229_v15, %v1485_v19  ;;  %v2810_v30 = vpack.c.bf16 %v1551_v22, %v1550_v20  ;;  %v994_v32 = vadd.f32 %v3237_v28, %v3613_v4  ;;  %v1250_v33 = vadd.f32 %v3301_v29, %v3613_v4  ;;  %v985_v34 = vpop.f32.mrb[25].mxu0  ;;  %v1241_v35 = vpop.f32.mrb[25].mxu1 }
 0x11b   : > { %v2970_v31 = vpack.c.bf16 %v1615_v23, %v1614_v21  ;;  %v2805_v36 = vpack.c.bf16 %v1549_v26, %v1548_v24  ;;  %v986_v38 = vadd.f32 %v3613_v4, %v985_v34  ;;  %v1242_v39 = vadd.f32 %v3613_v4, %v1241_v35  ;;  %v3238_v40 = vpop.f32.mrb[26].mxu0  ;;  %v3302_v41 = vpop.f32.mrb[26].mxu1 }
 0x11c   : > { %v2965_v37 = vpack.c.bf16 %v1613_v27, %v1612_v25  ;;  %3082 = vst [vmem:[%s3628_s4 + $0x58] sm:$0xff] %v2810_v30   ;;  %v1426_v42 = vmul.f32 0.01, %v994_v32  ;;  %v1490_v43 = vmul.f32 0.01, %v1250_v33  ;;  %v997_v44 = vadd.f32 %v3238_v40, %v3613_v4  ;;  %v988_v46 = vpop.f32.mrb[27].mxu0 }
 0x11d   : > { %3114 = vst [vmem:[%s3628_s4 + $0x158] sm:$0xff] %v2970_v31   ;;  %v1253_v45 = vadd.f32 %v3302_v41, %v3613_v4  ;;  %v1244_v47 = vpop.f32.mrb[27].mxu1  ;;  %3081 = vst [vmem:[%s3628_s4 + $0x50] sm:$0xff] %v2805_v36   ;;  %v1424_v48 = vmul.f32 0.01, %v986_v38  ;;  %v989_v50 = vadd.f32 %v3613_v4, %v988_v46 }
 0x11e   : > { %3113 = vst [vmem:[%s3628_s4 + $0x150] sm:$0xff] %v2965_v37   ;;  %v1488_v49 = vmul.f32 0.01, %v1242_v39  ;;  %v1245_v51 = vadd.f32 %v3613_v4, %v1244_v47  ;;  %v1427_v52 = vmul.f32 0.01, %v997_v44  ;;  %v1554_v56 = vmax.f32 %v994_v32, %v1426_v42 }
 0x11f   : > { %v1491_v53 = vmul.f32 0.01, %v1253_v45  ;;  %v1425_v54 = vmul.f32 0.01, %v989_v50  ;;  %v1618_v57 = vmax.f32 %v1250_v33, %v1490_v43  ;;  %v1552_v60 = vmax.f32 %v986_v38, %v1424_v48 }
 0x120   : > { %v1489_v55 = vmul.f32 0.01, %v1245_v51  ;;  %v1555_v58 = vmax.f32 %v997_v44, %v1427_v52  ;;  %v1616_v61 = vmax.f32 %v1242_v39, %v1488_v49 }
 0x121   : > { %v1619_v59 = vmax.f32 %v1253_v45, %v1491_v53  ;;  %v1553_v62 = vmax.f32 %v989_v50, %v1425_v54  ;;  %v3241_v0 = vpop.f32.mrb[28].mxu0  ;;  %v3305_v1 = vpop.f32.mrb[28].mxu1 }
 0x122   : > { %v1617_v63 = vmax.f32 %v1245_v51, %v1489_v55  ;;  %v2820_v2 = vpack.c.bf16 %v1555_v58, %v1554_v56  ;;  %v1010_v5 = vadd.f32 %v3241_v0, %v3613_v4  ;;  %v1266_v6 = vadd.f32 %v3305_v1, %v3613_v4  ;;  %v1001_v7 = vpop.f32.mrb[29].mxu0  ;;  %v1257_v8 = vpop.f32.mrb[29].mxu1 }
 0x123   : > { %v2980_v3 = vpack.c.bf16 %v1619_v59, %v1618_v57  ;;  %v2815_v9 = vpack.c.bf16 %v1553_v62, %v1552_v60  ;;  %v1002_v11 = vadd.f32 %v3613_v4, %v1001_v7  ;;  %v1258_v12 = vadd.f32 %v3613_v4, %v1257_v8  ;;  %v3242_v13 = vpop.f32.mrb[30].mxu0  ;;  %v3306_v14 = vpop.f32.mrb[30].mxu1 }
 0x124   : > { %v2975_v10 = vpack.c.bf16 %v1617_v63, %v1616_v61  ;;  %3084 = vst [vmem:[%s3628_s4 + $0x68] sm:$0xff] %v2820_v2   ;;  %v1430_v15 = vmul.f32 0.01, %v1010_v5  ;;  %v1494_v16 = vmul.f32 0.01, %v1266_v6  ;;  %v1013_v17 = vadd.f32 %v3242_v13, %v3613_v4  ;;  %v1004_v19 = vpop.f32.mrb[31].mxu0 }
 0x125   : > { %3116 = vst [vmem:[%s3628_s4 + $0x168] sm:$0xff] %v2980_v3   ;;  %v1269_v18 = vadd.f32 %v3306_v14, %v3613_v4  ;;  %v1260_v20 = vpop.f32.mrb[31].mxu1  ;;  %3083 = vst [vmem:[%s3628_s4 + $0x60] sm:$0xff] %v2815_v9   ;;  %v1428_v21 = vmul.f32 0.01, %v1002_v11  ;;  %v1005_v23 = vadd.f32 %v3613_v4, %v1004_v19 }
 0x126   : > { %3115 = vst [vmem:[%s3628_s4 + $0x160] sm:$0xff] %v2975_v10   ;;  %v1492_v22 = vmul.f32 0.01, %v1258_v12  ;;  %v1261_v24 = vadd.f32 %v3613_v4, %v1260_v20  ;;  %v1431_v25 = vmul.f32 0.01, %v1013_v17  ;;  %v1558_v29 = vmax.f32 %v1010_v5, %v1430_v15 }
 0x127   : > { %v1495_v26 = vmul.f32 0.01, %v1269_v18  ;;  %v1429_v27 = vmul.f32 0.01, %v1005_v23  ;;  %v1622_v30 = vmax.f32 %v1266_v6, %v1494_v16  ;;  %v1556_v33 = vmax.f32 %v1002_v11, %v1428_v21 }
 0x128   : > { %v1493_v28 = vmul.f32 0.01, %v1261_v24  ;;  %v1559_v31 = vmax.f32 %v1013_v17, %v1431_v25  ;;  %v1620_v34 = vmax.f32 %v1258_v12, %v1492_v22 }
 0x129   : > { %v1623_v32 = vmax.f32 %v1269_v18, %v1495_v26  ;;  %v1557_v35 = vmax.f32 %v1005_v23, %v1429_v27  ;;  %v3245_v37 = vpop.f32.mrb[32].mxu0  ;;  %v3309_v38 = vpop.f32.mrb[32].mxu1 }
 0x12a   : > { %v1621_v36 = vmax.f32 %v1261_v24, %v1493_v28  ;;  %v2830_v39 = vpack.c.bf16 %v1559_v31, %v1558_v29  ;;  %v1026_v41 = vadd.f32 %v3245_v37, %v3613_v4  ;;  %v1282_v42 = vadd.f32 %v3309_v38, %v3613_v4  ;;  %v1017_v43 = vpop.f32.mrb[33].mxu0  ;;  %v1273_v44 = vpop.f32.mrb[33].mxu1 }
 0x12b   : > { %v2990_v40 = vpack.c.bf16 %v1623_v32, %v1622_v30  ;;  %v2825_v45 = vpack.c.bf16 %v1557_v35, %v1556_v33  ;;  %v1018_v47 = vadd.f32 %v3613_v4, %v1017_v43  ;;  %v1274_v48 = vadd.f32 %v3613_v4, %v1273_v44  ;;  %v3246_v49 = vpop.f32.mrb[34].mxu0  ;;  %v3310_v50 = vpop.f32.mrb[34].mxu1 }
 0x12c   : > { %v2985_v46 = vpack.c.bf16 %v1621_v36, %v1620_v34  ;;  %3086 = vst [vmem:[%s3628_s4 + $0x78] sm:$0xff] %v2830_v39   ;;  %v1434_v51 = vmul.f32 0.01, %v1026_v41  ;;  %v1498_v52 = vmul.f32 0.01, %v1282_v42  ;;  %v1029_v53 = vadd.f32 %v3246_v49, %v3613_v4  ;;  %v1020_v55 = vpop.f32.mrb[35].mxu0 }
 0x12d   : > { %3118 = vst [vmem:[%s3628_s4 + $0x178] sm:$0xff] %v2990_v40   ;;  %v1285_v54 = vadd.f32 %v3310_v50, %v3613_v4  ;;  %v1276_v56 = vpop.f32.mrb[35].mxu1  ;;  %3085 = vst [vmem:[%s3628_s4 + $0x70] sm:$0xff] %v2825_v45   ;;  %v1432_v57 = vmul.f32 0.01, %v1018_v47  ;;  %v1021_v59 = vadd.f32 %v3613_v4, %v1020_v55 }
 0x12e   : > { %3117 = vst [vmem:[%s3628_s4 + $0x170] sm:$0xff] %v2985_v46   ;;  %v1496_v58 = vmul.f32 0.01, %v1274_v48  ;;  %v1277_v60 = vadd.f32 %v3613_v4, %v1276_v56  ;;  %v1435_v61 = vmul.f32 0.01, %v1029_v53  ;;  %v1562_v1 = vmax.f32 %v1026_v41, %v1434_v51 }
 0x12f   : > { %v1499_v62 = vmul.f32 0.01, %v1285_v54  ;;  %v1433_v63 = vmul.f32 0.01, %v1021_v59  ;;  %v1626_v2 = vmax.f32 %v1282_v42, %v1498_v52  ;;  %v1560_v6 = vmax.f32 %v1018_v47, %v1432_v57 }
 0x130   : > { %v1497_v0 = vmul.f32 0.01, %v1277_v60  ;;  %v1563_v3 = vmax.f32 %v1029_v53, %v1435_v61  ;;  %v1624_v7 = vmax.f32 %v1274_v48, %v1496_v58 }
 0x131   : > { %v1627_v5 = vmax.f32 %v1285_v54, %v1499_v62  ;;  %v1561_v8 = vmax.f32 %v1021_v59, %v1433_v63  ;;  %v3249_v10 = vpop.f32.mrb[36].mxu0  ;;  %v3313_v11 = vpop.f32.mrb[36].mxu1 }
 0x132   : > { %v1625_v9 = vmax.f32 %v1277_v60, %v1497_v0  ;;  %v2840_v12 = vpack.c.bf16 %v1563_v3, %v1562_v1  ;;  %v1042_v14 = vadd.f32 %v3249_v10, %v3613_v4  ;;  %v1298_v15 = vadd.f32 %v3313_v11, %v3613_v4  ;;  %v1033_v16 = vpop.f32.mrb[37].mxu0  ;;  %v1289_v17 = vpop.f32.mrb[37].mxu1 }
 0x133   : > { %v3000_v13 = vpack.c.bf16 %v1627_v5, %v1626_v2  ;;  %v2835_v18 = vpack.c.bf16 %v1561_v8, %v1560_v6  ;;  %v1034_v20 = vadd.f32 %v3613_v4, %v1033_v16  ;;  %v1290_v21 = vadd.f32 %v3613_v4, %v1289_v17  ;;  %v3250_v22 = vpop.f32.mrb[38].mxu0  ;;  %v3314_v23 = vpop.f32.mrb[38].mxu1 }
 0x134   : > { %v2995_v19 = vpack.c.bf16 %v1625_v9, %v1624_v7  ;;  %3088 = vst [vmem:[%s3628_s4 + $0x88] sm:$0xff] %v2840_v12   ;;  %v1438_v24 = vmul.f32 0.01, %v1042_v14  ;;  %v1502_v25 = vmul.f32 0.01, %v1298_v15  ;;  %v1045_v26 = vadd.f32 %v3250_v22, %v3613_v4  ;;  %v1036_v28 = vpop.f32.mrb[39].mxu0 }
 0x135   : > { %3120 = vst [vmem:[%s3628_s4 + $0x188] sm:$0xff] %v3000_v13   ;;  %v1301_v27 = vadd.f32 %v3314_v23, %v3613_v4  ;;  %v1292_v29 = vpop.f32.mrb[39].mxu1  ;;  %3087 = vst [vmem:[%s3628_s4 + $0x80] sm:$0xff] %v2835_v18   ;;  %v1436_v30 = vmul.f32 0.01, %v1034_v20  ;;  %v1037_v32 = vadd.f32 %v3613_v4, %v1036_v28 }
 0x136   : > { %3119 = vst [vmem:[%s3628_s4 + $0x180] sm:$0xff] %v2995_v19   ;;  %v1500_v31 = vmul.f32 0.01, %v1290_v21  ;;  %v1293_v33 = vadd.f32 %v3613_v4, %v1292_v29  ;;  %v1439_v34 = vmul.f32 0.01, %v1045_v26  ;;  %v1566_v38 = vmax.f32 %v1042_v14, %v1438_v24 }
 0x137   : > { %v1503_v35 = vmul.f32 0.01, %v1301_v27  ;;  %v1437_v36 = vmul.f32 0.01, %v1037_v32  ;;  %v1630_v39 = vmax.f32 %v1298_v15, %v1502_v25  ;;  %v1564_v42 = vmax.f32 %v1034_v20, %v1436_v30 }
 0x138   : > { %v1501_v37 = vmul.f32 0.01, %v1293_v33  ;;  %v1567_v40 = vmax.f32 %v1045_v26, %v1439_v34  ;;  %v1628_v43 = vmax.f32 %v1290_v21, %v1500_v31 }
 0x139   : > { %v1631_v41 = vmax.f32 %v1301_v27, %v1503_v35  ;;  %v1565_v44 = vmax.f32 %v1037_v32, %v1437_v36  ;;  %v3253_v46 = vpop.f32.mrb[40].mxu0  ;;  %v3317_v47 = vpop.f32.mrb[40].mxu1 }
 0x13a   : > { %v1629_v45 = vmax.f32 %v1293_v33, %v1501_v37  ;;  %v2850_v48 = vpack.c.bf16 %v1567_v40, %v1566_v38  ;;  %v1058_v50 = vadd.f32 %v3253_v46, %v3613_v4  ;;  %v1314_v51 = vadd.f32 %v3317_v47, %v3613_v4  ;;  %v1049_v52 = vpop.f32.mrb[41].mxu0  ;;  %v1305_v53 = vpop.f32.mrb[41].mxu1 }
 0x13b   : > { %v3010_v49 = vpack.c.bf16 %v1631_v41, %v1630_v39  ;;  %v2845_v54 = vpack.c.bf16 %v1565_v44, %v1564_v42  ;;  %v1050_v56 = vadd.f32 %v3613_v4, %v1049_v52  ;;  %v1306_v57 = vadd.f32 %v3613_v4, %v1305_v53  ;;  %v3254_v58 = vpop.f32.mrb[42].mxu0  ;;  %v3318_v59 = vpop.f32.mrb[42].mxu1 }
 0x13c   : > { %v3005_v55 = vpack.c.bf16 %v1629_v45, %v1628_v43  ;;  %3090 = vst [vmem:[%s3628_s4 + $0x98] sm:$0xff] %v2850_v48   ;;  %v1442_v60 = vmul.f32 0.01, %v1058_v50  ;;  %v1506_v61 = vmul.f32 0.01, %v1314_v51  ;;  %v1061_v62 = vadd.f32 %v3254_v58, %v3613_v4  ;;  %v1052_v0 = vpop.f32.mrb[43].mxu0 }
 0x13d   : > { %3122 = vst [vmem:[%s3628_s4 + $0x198] sm:$0xff] %v3010_v49   ;;  %v1317_v63 = vadd.f32 %v3318_v59, %v3613_v4  ;;  %v1308_v1 = vpop.f32.mrb[43].mxu1  ;;  %3089 = vst [vmem:[%s3628_s4 + $0x90] sm:$0xff] %v2845_v54   ;;  %v1440_v2 = vmul.f32 0.01, %v1050_v56  ;;  %v1053_v5 = vadd.f32 %v3613_v4, %v1052_v0 }
 0x13e   : > { %3121 = vst [vmem:[%s3628_s4 + $0x190] sm:$0xff] %v3005_v55   ;;  %v1504_v3 = vmul.f32 0.01, %v1306_v57  ;;  %v1309_v6 = vadd.f32 %v3613_v4, %v1308_v1  ;;  %v1443_v7 = vmul.f32 0.01, %v1061_v62  ;;  %v1570_v11 = vmax.f32 %v1058_v50, %v1442_v60 }
 0x13f   : > { %v1507_v8 = vmul.f32 0.01, %v1317_v63  ;;  %v1441_v9 = vmul.f32 0.01, %v1053_v5  ;;  %v1634_v12 = vmax.f32 %v1314_v51, %v1506_v61  ;;  %v1568_v15 = vmax.f32 %v1050_v56, %v1440_v2 }
 0x140   : > { %v1505_v10 = vmul.f32 0.01, %v1309_v6  ;;  %v1571_v13 = vmax.f32 %v1061_v62, %v1443_v7  ;;  %v1632_v16 = vmax.f32 %v1306_v57, %v1504_v3 }
 0x141   : > { %v1635_v14 = vmax.f32 %v1317_v63, %v1507_v8  ;;  %v1569_v17 = vmax.f32 %v1053_v5, %v1441_v9  ;;  %v3257_v19 = vpop.f32.mrb[44].mxu0  ;;  %v3321_v20 = vpop.f32.mrb[44].mxu1 }
 0x142   : > { %v1633_v18 = vmax.f32 %v1309_v6, %v1505_v10  ;;  %v2860_v21 = vpack.c.bf16 %v1571_v13, %v1570_v11  ;;  %v1074_v23 = vadd.f32 %v3257_v19, %v3613_v4  ;;  %v1330_v24 = vadd.f32 %v3321_v20, %v3613_v4  ;;  %v1065_v25 = vpop.f32.mrb[45].mxu0  ;;  %v1321_v26 = vpop.f32.mrb[45].mxu1 }
 0x143   : > { %v3020_v22 = vpack.c.bf16 %v1635_v14, %v1634_v12  ;;  %v2855_v27 = vpack.c.bf16 %v1569_v17, %v1568_v15  ;;  %v1066_v29 = vadd.f32 %v3613_v4, %v1065_v25  ;;  %v1322_v30 = vadd.f32 %v3613_v4, %v1321_v26  ;;  %v3258_v31 = vpop.f32.mrb[46].mxu0  ;;  %v3322_v32 = vpop.f32.mrb[46].mxu1 }
 0x144   : > { %v3015_v28 = vpack.c.bf16 %v1633_v18, %v1632_v16  ;;  %3092 = vst [vmem:[%s3628_s4 + $0xa8] sm:$0xff] %v2860_v21   ;;  %v1446_v33 = vmul.f32 0.01, %v1074_v23  ;;  %v1510_v34 = vmul.f32 0.01, %v1330_v24  ;;  %v1077_v35 = vadd.f32 %v3258_v31, %v3613_v4  ;;  %v1068_v37 = vpop.f32.mrb[47].mxu0 }
 0x145   : > { %3124 = vst [vmem:[%s3628_s4 + $0x1a8] sm:$0xff] %v3020_v22   ;;  %v1333_v36 = vadd.f32 %v3322_v32, %v3613_v4  ;;  %v1324_v38 = vpop.f32.mrb[47].mxu1  ;;  %3091 = vst [vmem:[%s3628_s4 + $0xa0] sm:$0xff] %v2855_v27   ;;  %v1444_v39 = vmul.f32 0.01, %v1066_v29  ;;  %v1069_v41 = vadd.f32 %v3613_v4, %v1068_v37 }
 0x146   : > { %3123 = vst [vmem:[%s3628_s4 + $0x1a0] sm:$0xff] %v3015_v28   ;;  %v1508_v40 = vmul.f32 0.01, %v1322_v30  ;;  %v1325_v42 = vadd.f32 %v3613_v4, %v1324_v38  ;;  %v1447_v43 = vmul.f32 0.01, %v1077_v35  ;;  %v1574_v47 = vmax.f32 %v1074_v23, %v1446_v33 }
 0x147   : > { %v1511_v44 = vmul.f32 0.01, %v1333_v36  ;;  %v1445_v45 = vmul.f32 0.01, %v1069_v41  ;;  %v1638_v48 = vmax.f32 %v1330_v24, %v1510_v34  ;;  %v1572_v51 = vmax.f32 %v1066_v29, %v1444_v39 }
 0x148   : > { %v1509_v46 = vmul.f32 0.01, %v1325_v42  ;;  %v1575_v49 = vmax.f32 %v1077_v35, %v1447_v43  ;;  %v1636_v52 = vmax.f32 %v1322_v30, %v1508_v40 }
 0x149   : > { %v1639_v50 = vmax.f32 %v1333_v36, %v1511_v44  ;;  %v1573_v53 = vmax.f32 %v1069_v41, %v1445_v45  ;;  %v3261_v55 = vpop.f32.mrb[48].mxu0  ;;  %v3325_v56 = vpop.f32.mrb[48].mxu1 }
 0x14a   : > { %v1637_v54 = vmax.f32 %v1325_v42, %v1509_v46  ;;  %v2870_v57 = vpack.c.bf16 %v1575_v49, %v1574_v47  ;;  %v1090_v59 = vadd.f32 %v3261_v55, %v3613_v4  ;;  %v1346_v60 = vadd.f32 %v3325_v56, %v3613_v4  ;;  %v1081_v61 = vpop.f32.mrb[49].mxu0  ;;  %v1337_v62 = vpop.f32.mrb[49].mxu1 }
 0x14b   : > { %v3030_v58 = vpack.c.bf16 %v1639_v50, %v1638_v48  ;;  %v2865_v63 = vpack.c.bf16 %v1573_v53, %v1572_v51  ;;  %v1082_v1 = vadd.f32 %v3613_v4, %v1081_v61  ;;  %v1338_v2 = vadd.f32 %v3613_v4, %v1337_v62  ;;  %v3262_v3 = vpop.f32.mrb[50].mxu0  ;;  %v3326_v5 = vpop.f32.mrb[50].mxu1 }
 0x14c   : > { %v3025_v0 = vpack.c.bf16 %v1637_v54, %v1636_v52  ;;  %3094 = vst [vmem:[%s3628_s4 + $0xb8] sm:$0xff] %v2870_v57   ;;  %v1450_v6 = vmul.f32 0.01, %v1090_v59  ;;  %v1514_v7 = vmul.f32 0.01, %v1346_v60  ;;  %v1093_v8 = vadd.f32 %v3262_v3, %v3613_v4  ;;  %v1084_v10 = vpop.f32.mrb[51].mxu0 }
 0x14d   : > { %3126 = vst [vmem:[%s3628_s4 + $0x1b8] sm:$0xff] %v3030_v58   ;;  %v1349_v9 = vadd.f32 %v3326_v5, %v3613_v4  ;;  %v1340_v11 = vpop.f32.mrb[51].mxu1  ;;  %3093 = vst [vmem:[%s3628_s4 + $0xb0] sm:$0xff] %v2865_v63   ;;  %v1448_v12 = vmul.f32 0.01, %v1082_v1  ;;  %v1085_v14 = vadd.f32 %v3613_v4, %v1084_v10 }
 0x14e   : > { %3125 = vst [vmem:[%s3628_s4 + $0x1b0] sm:$0xff] %v3025_v0   ;;  %v1512_v13 = vmul.f32 0.01, %v1338_v2  ;;  %v1341_v15 = vadd.f32 %v3613_v4, %v1340_v11  ;;  %v1451_v16 = vmul.f32 0.01, %v1093_v8  ;;  %v1578_v20 = vmax.f32 %v1090_v59, %v1450_v6 }
 0x14f   : > { %v1515_v17 = vmul.f32 0.01, %v1349_v9  ;;  %v1449_v18 = vmul.f32 0.01, %v1085_v14  ;;  %v1642_v21 = vmax.f32 %v1346_v60, %v1514_v7  ;;  %v1576_v24 = vmax.f32 %v1082_v1, %v1448_v12  ;;  %v3777_v4 = vld [vmem:[%s3824_s2] ss:$0 sm:$0xff] }
 0x150   : > { %v1513_v19 = vmul.f32 0.01, %v1341_v15  ;;  %v1579_v22 = vmax.f32 %v1093_v8, %v1451_v16  ;;  %v1640_v25 = vmax.f32 %v1338_v2, %v1512_v13 }
 0x151   : > { %v1643_v23 = vmax.f32 %v1349_v9, %v1515_v17  ;;  %v1577_v26 = vmax.f32 %v1085_v14, %v1449_v18  ;;  %v3265_v28 = vpop.f32.mrb[52].mxu0  ;;  %v3329_v29 = vpop.f32.mrb[52].mxu1 }
 0x152   : > { %v1641_v27 = vmax.f32 %v1341_v15, %v1513_v19  ;;  %v2880_v30 = vpack.c.bf16 %v1579_v22, %v1578_v20  ;;  %v1106_v32 = vadd.f32 %v3777_v4, %v3265_v28  ;;  %v1362_v33 = vadd.f32 %v3777_v4, %v3329_v29  ;;  %v1097_v34 = vpop.f32.mrb[53].mxu0  ;;  %v1353_v35 = vpop.f32.mrb[53].mxu1 }
 0x153   : > { %v3040_v31 = vpack.c.bf16 %v1643_v23, %v1642_v21  ;;  %v2875_v36 = vpack.c.bf16 %v1577_v26, %v1576_v24  ;;  %v1098_v38 = vadd.f32 %v3777_v4, %v1097_v34  ;;  %v1354_v39 = vadd.f32 %v3777_v4, %v1353_v35  ;;  %v3266_v40 = vpop.f32.mrb[54].mxu0  ;;  %v3330_v41 = vpop.f32.mrb[54].mxu1 }
 0x154   : > { %v3035_v37 = vpack.c.bf16 %v1641_v27, %v1640_v25  ;;  %3096 = vst [vmem:[%s3628_s4 + $0xc8] sm:$0xff] %v2880_v30   ;;  %v1454_v42 = vmul.f32 0.01, %v1106_v32  ;;  %v1518_v43 = vmul.f32 0.01, %v1362_v33  ;;  %v1109_v44 = vadd.f32 %v3777_v4, %v3266_v40  ;;  %v1100_v46 = vpop.f32.mrb[55].mxu0 }
 0x155   : > { %3128 = vst [vmem:[%s3628_s4 + $0x1c8] sm:$0xff] %v3040_v31   ;;  %v1365_v45 = vadd.f32 %v3777_v4, %v3330_v41  ;;  %v1356_v47 = vpop.f32.mrb[55].mxu1  ;;  %3095 = vst [vmem:[%s3628_s4 + $0xc0] sm:$0xff] %v2875_v36   ;;  %v1452_v48 = vmul.f32 0.01, %v1098_v38  ;;  %v1101_v50 = vadd.f32 %v3777_v4, %v1100_v46 }
 0x156   : > { %3127 = vst [vmem:[%s3628_s4 + $0x1c0] sm:$0xff] %v3035_v37   ;;  %v1516_v49 = vmul.f32 0.01, %v1354_v39  ;;  %v1357_v51 = vadd.f32 %v3777_v4, %v1356_v47  ;;  %v1455_v52 = vmul.f32 0.01, %v1109_v44  ;;  %v1582_v56 = vmax.f32 %v1106_v32, %v1454_v42 }
 0x157   : > { %v1519_v53 = vmul.f32 0.01, %v1365_v45  ;;  %v1453_v54 = vmul.f32 0.01, %v1101_v50  ;;  %v1646_v57 = vmax.f32 %v1362_v33, %v1518_v43  ;;  %v1580_v60 = vmax.f32 %v1098_v38, %v1452_v48 }
 0x158   : > { %v1517_v55 = vmul.f32 0.01, %v1357_v51  ;;  %v1583_v58 = vmax.f32 %v1109_v44, %v1455_v52  ;;  %v1644_v61 = vmax.f32 %v1354_v39, %v1516_v49 }
 0x159   : > { %v1647_v59 = vmax.f32 %v1365_v45, %v1519_v53  ;;  %v1581_v62 = vmax.f32 %v1101_v50, %v1453_v54  ;;  %v3269_v0 = vpop.f32.mrb[56].mxu0  ;;  %v3333_v1 = vpop.f32.mrb[56].mxu1 }
 0x15a   : > { %v1645_v63 = vmax.f32 %v1357_v51, %v1517_v55  ;;  %v2890_v2 = vpack.c.bf16 %v1583_v58, %v1582_v56  ;;  %v1122_v5 = vadd.f32 %v3777_v4, %v3269_v0  ;;  %v1378_v6 = vadd.f32 %v3777_v4, %v3333_v1  ;;  %v1113_v7 = vpop.f32.mrb[57].mxu0  ;;  %v1369_v8 = vpop.f32.mrb[57].mxu1 }
 0x15b   : > { %v3050_v3 = vpack.c.bf16 %v1647_v59, %v1646_v57  ;;  %v2885_v9 = vpack.c.bf16 %v1581_v62, %v1580_v60  ;;  %v1114_v11 = vadd.f32 %v3777_v4, %v1113_v7  ;;  %v1370_v12 = vadd.f32 %v3777_v4, %v1369_v8  ;;  %v3270_v13 = vpop.f32.mrb[58].mxu0  ;;  %v3334_v14 = vpop.f32.mrb[58].mxu1 }
 0x15c   : > { %v3045_v10 = vpack.c.bf16 %v1645_v63, %v1644_v61  ;;  %3098 = vst [vmem:[%s3628_s4 + $0xd8] sm:$0xff] %v2890_v2   ;;  %v1458_v15 = vmul.f32 0.01, %v1122_v5  ;;  %v1522_v16 = vmul.f32 0.01, %v1378_v6  ;;  %v1125_v17 = vadd.f32 %v3777_v4, %v3270_v13  ;;  %v1116_v19 = vpop.f32.mrb[59].mxu0 }
 0x15d   : > { %3130 = vst [vmem:[%s3628_s4 + $0x1d8] sm:$0xff] %v3050_v3   ;;  %v1381_v18 = vadd.f32 %v3777_v4, %v3334_v14  ;;  %v1372_v20 = vpop.f32.mrb[59].mxu1  ;;  %3097 = vst [vmem:[%s3628_s4 + $0xd0] sm:$0xff] %v2885_v9   ;;  %v1456_v21 = vmul.f32 0.01, %v1114_v11  ;;  %v1117_v23 = vadd.f32 %v3777_v4, %v1116_v19 }
 0x15e   : > { %3129 = vst [vmem:[%s3628_s4 + $0x1d0] sm:$0xff] %v3045_v10   ;;  %v1520_v22 = vmul.f32 0.01, %v1370_v12  ;;  %v1373_v24 = vadd.f32 %v3777_v4, %v1372_v20  ;;  %v1459_v25 = vmul.f32 0.01, %v1125_v17  ;;  %v1586_v29 = vmax.f32 %v1122_v5, %v1458_v15 }
 0x15f   : > { %v1523_v26 = vmul.f32 0.01, %v1381_v18  ;;  %v1457_v27 = vmul.f32 0.01, %v1117_v23  ;;  %v1650_v30 = vmax.f32 %v1378_v6, %v1522_v16  ;;  %v1584_v33 = vmax.f32 %v1114_v11, %v1456_v21 }
 0x160   : > { %v1521_v28 = vmul.f32 0.01, %v1373_v24  ;;  %v1587_v31 = vmax.f32 %v1125_v17, %v1459_v25  ;;  %v1648_v34 = vmax.f32 %v1370_v12, %v1520_v22 }
 0x161   : > { %v1651_v32 = vmax.f32 %v1381_v18, %v1523_v26  ;;  %v1585_v35 = vmax.f32 %v1117_v23, %v1457_v27  ;;  %v3273_v37 = vpop.f32.mrb[60].mxu0  ;;  %v3337_v38 = vpop.f32.mrb[60].mxu1 }
 0x162   : > { %v1649_v36 = vmax.f32 %v1373_v24, %v1521_v28  ;;  %v2900_v39 = vpack.c.bf16 %v1587_v31, %v1586_v29  ;;  %v1138_v41 = vadd.f32 %v3777_v4, %v3273_v37  ;;  %v1394_v42 = vadd.f32 %v3777_v4, %v3337_v38  ;;  %v1129_v43 = vpop.f32.mrb[61].mxu0  ;;  %v1385_v44 = vpop.f32.mrb[61].mxu1 }
 0x163   : > { %v3060_v40 = vpack.c.bf16 %v1651_v32, %v1650_v30  ;;  %v2895_v45 = vpack.c.bf16 %v1585_v35, %v1584_v33  ;;  %v1130_v47 = vadd.f32 %v3777_v4, %v1129_v43  ;;  %v1386_v48 = vadd.f32 %v3777_v4, %v1385_v44  ;;  %v3274_v49 = vpop.f32.mrb[62].mxu0  ;;  %v3338_v50 = vpop.f32.mrb[62].mxu1 }
 0x164   : > { %v3055_v46 = vpack.c.bf16 %v1649_v36, %v1648_v34  ;;  %3100 = vst [vmem:[%s3628_s4 + $0xe8] sm:$0xff] %v2900_v39   ;;  %v1462_v51 = vmul.f32 0.01, %v1138_v41  ;;  %v1526_v52 = vmul.f32 0.01, %v1394_v42  ;;  %v1141_v53 = vadd.f32 %v3777_v4, %v3274_v49  ;;  %v1132_v55 = vpop.f32.mrb[63].mxu0 }
 0x165   : > { %3132 = vst [vmem:[%s3628_s4 + $0x1e8] sm:$0xff] %v3060_v40   ;;  %v1397_v54 = vadd.f32 %v3777_v4, %v3338_v50  ;;  %v1388_v56 = vpop.f32.mrb[63].mxu1  ;;  %3099 = vst [vmem:[%s3628_s4 + $0xe0] sm:$0xff] %v2895_v45   ;;  %v1460_v57 = vmul.f32 0.01, %v1130_v47  ;;  %v1133_v59 = vadd.f32 %v3777_v4, %v1132_v55 }
 0x166   : > { %3131 = vst [vmem:[%s3628_s4 + $0x1e0] sm:$0xff] %v3055_v46   ;;  %v1524_v58 = vmul.f32 0.01, %v1386_v48  ;;  %v1389_v60 = vadd.f32 %v3777_v4, %v1388_v56  ;;  %v1463_v61 = vmul.f32 0.01, %v1141_v53  ;;  %v1590_v1 = vmax.f32 %v1138_v41, %v1462_v51 }
 0x167   : > { %v1527_v62 = vmul.f32 0.01, %v1397_v54  ;;  %v1461_v63 = vmul.f32 0.01, %v1133_v59  ;;  %v1654_v2 = vmax.f32 %v1394_v42, %v1526_v52  ;;  %v1588_v6 = vmax.f32 %v1130_v47, %v1460_v57 }
 0x168   : > { %v1525_v0 = vmul.f32 0.01, %v1389_v60  ;;  %v1591_v3 = vmax.f32 %v1141_v53, %v1463_v61  ;;  %v1652_v7 = vmax.f32 %v1386_v48, %v1524_v58 }
 0x169   : > { %v1655_v5 = vmax.f32 %v1397_v54, %v1527_v62  ;;  %v1589_v8 = vmax.f32 %v1133_v59, %v1461_v63 }
 0x16a   : > { %v1653_v9 = vmax.f32 %v1389_v60, %v1525_v0  ;;  %v2910_v10 = vpack.c.bf16 %v1591_v3, %v1590_v1 }
 0x16b   : > { %v3070_v11 = vpack.c.bf16 %v1655_v5, %v1654_v2  ;;  %v2905_v12 = vpack.c.bf16 %v1589_v8, %v1588_v6 }
 0x16c   : > { %v3065_v4 = vpack.c.bf16 %v1653_v9, %v1652_v7  ;;  %3102 = vst [vmem:[%s3628_s4 + $0xf8] sm:$0xff] %v2910_v10  }
 0x16d   : > { %3134 = vst [vmem:[%s3628_s4 + $0x1f8] sm:$0xff] %v3070_v11   ;;  %3101 = vst [vmem:[%s3628_s4 + $0xf0] sm:$0xff] %v2905_v12  }
 0x16e   : > { %3133 = vst [vmem:[%s3628_s4 + $0x1f0] sm:$0xff] %v3065_v4  }
 0x16f PF: > { %s13_s12 = sadd.s32 1, %s3430_s12  }
 0x170   : > { %p10_p4 = scmp.ge.s32.totalorder %s13_s12, 4  }
 0x172   :  { %12 = sbr.rel (!%p10_p4) target bundleno = 1 (0x1), region = 62 }

// kernel: discriminator_forward.6
= control target key start
LH: loop header
LB: loop body
LE: loop exit
PB: predicated region body
PF: predicated region fallthrough
CT: control target
= control target key end

     0   :  { %s2084_s12 = smov 0   ;;  %s2324_s0 = inlined_call_operand.vmem [shape: bf16[512,512], index: 0, kind: input, shape index: {}]   ;;  %s2325_s1 = inlined_call_operand.vmem [shape: bf16[512,128], index: 1, kind: input, shape index: {}]   ;;  %s2326_s2 = inlined_call_operand.vmem [shape: f32[1,128], index: 2, kind: input, shape index: {}]   ;;  %s2327_s3 = inlined_call_operand.vmem [shape: bf16[512,128], index: 3, kind: output, shape index: {}]  }
   0x1 LB: > { %s1427_s13 = sadd.s32 4294967295, %s2062_s12   ;;  %p1431_p0 = scmp.ge.s32.totalorder %s2062_s12, 1  ;;  %s2062_s12 = sphi %s2084_s12, %s13_s12  }
   0x2   : > { %p139_p1 = scmp.lt.s32.totalorder %s2062_s12, 3 }
   0x4   : > { %p140_p2 = pnand %p1431_p0, %p139_p1 }
   0x5   : > { %v1928_v0 = vld [vmem:[%s2325_s1 + $0x40] sm:$0xff] (!%p140_p2)   ;;  %v1932_v4 = vld [vmem:[%s2325_s1 + $0x48] sm:$0xff] (!%p140_p2)   ;;  %v1936_v8 = vld [vmem:[%s2325_s1 + $0x50] sm:$0xff] (!%p140_p2)   ;;  %s1432_s21 = sshll.u32 (!%p140_p2), %s1427_s13, 5 }
   0x6   : > { %143 = sbr.rel (%p140_p2) target bundleno = 387 (0x183), region = 32  ;;  %v1929_v1 = vld [vmem:[%s2325_s1 + $0xc0] sm:$0xff] (!%p140_p2)   ;;  %1696 = vmatprep.subr.bf16.mxu0 (!%p140_p2), %v1928_v0  ;;  %v1933_v5 = vld [vmem:[%s2325_s1 + $0xc8] sm:$0xff] (!%p140_p2)   ;;  %v1937_v9 = vld [vmem:[%s2325_s1 + $0xd0] sm:$0xff] (!%p140_p2)   ;;  %p165_p3 = scmp.lt.s32.totalorder (!%p140_p2), %s1432_s21, 63 }
   0x7   : > { %v1930_v2 = vld [vmem:[%s2325_s1] sm:$0xff] (!%p140_p2)   ;;  %1808 = vmatprep.subr.bf16.mxu1 (!%p140_p2), %v1929_v1  ;;  %v1934_v6 = vld [vmem:[%s2325_s1 + $0x8] sm:$0xff] (!%p140_p2)   ;;  %v1938_v10 = vld [vmem:[%s2325_s1 + $0x10] sm:$0xff] (!%p140_p2)  }
   0x8   : > { %v1931_v3 = vld [vmem:[%s2325_s1 + $0x80] sm:$0xff] (!%p140_p2)   ;;  %1697 = vmatpush3.bf16.msra.mxu0 (!%p140_p2), %v1930_v2  ;;  %v1935_v7 = vld [vmem:[%s2325_s1 + $0x88] sm:$0xff] (!%p140_p2)   ;;  %v1939_v11 = vld [vmem:[%s2325_s1 + $0x90] sm:$0xff] (!%p140_p2)  }
   0x9   : > { %1809 = vmatpush3.bf16.msra.mxu1 (!%p140_p2), %v1931_v3  ;;  %1698 = vmatprep.subr.bf16.mxu0 (!%p140_p2), %v1932_v4  ;;  %v1940_v12 = vld [vmem:[%s2325_s1 + $0x58] sm:$0xff] (!%p140_p2)   ;;  %v1944_v16 = vld [vmem:[%s2325_s1 + $0x60] sm:$0xff] (!%p140_p2)   ;;  %v1948_v20 = vld [vmem:[%s2325_s1 + $0x68] sm:$0xff] (!%p140_p2)  }
   0xa   : > { %1810 = vmatprep.subr.bf16.mxu1 (!%p140_p2), %v1933_v5  ;;  %v1941_v13 = vld [vmem:[%s2325_s1 + $0xd8] sm:$0xff] (!%p140_p2)   ;;  %v1945_v17 = vld [vmem:[%s2325_s1 + $0xe0] sm:$0xff] (!%p140_p2)   ;;  %v1949_v21 = vld [vmem:[%s2325_s1 + $0xe8] sm:$0xff] (!%p140_p2)  }
   0xb   : > { %v1942_v14 = vld [vmem:[%s2325_s1 + $0x18] sm:$0xff] (!%p140_p2)   ;;  %v1946_v18 = vld [vmem:[%s2325_s1 + $0x20] sm:$0xff] (!%p140_p2)   ;;  %v1950_v22 = vld [vmem:[%s2325_s1 + $0x28] sm:$0xff] (!%p140_p2)  }
   0xc   : > { %1699 = vmatpush3.bf16.msra.mxu0 (!%p140_p2), %v1934_v6  ;;  %v1943_v15 = vld [vmem:[%s2325_s1 + $0x98] sm:$0xff] (!%p140_p2)   ;;  %v1947_v19 = vld [vmem:[%s2325_s1 + $0xa0] sm:$0xff] (!%p140_p2)   ;;  %v1951_v23 = vld [vmem:[%s2325_s1 + $0xa8] sm:$0xff] (!%p140_p2)  }
   0xd   : > { %1811 = vmatpush3.bf16.msra.mxu1 %v1935_v7  ;;  %1700 = vmatprep.subr.bf16.mxu0 %v1936_v8  ;;  %s2329_s21 = smov (!%p165_p3, %s1432_s21), 63  ;;  %v1952_v24 = vld [vmem:[%s2325_s1 + $0x70] sm:$0xff]   ;;  %v1956_v28 = vld [vmem:[%s2325_s1 + $0x78] sm:$0xff]  }
   0xe   : > { %1812 = vmatprep.subr.bf16.mxu1 %v1937_v9  ;;  %v1953_v25 = vld [vmem:[%s2325_s1 + $0xf0] sm:$0xff]   ;;  %s1568_s18 = sshll.u32 %s2329_s21, 4  ;;  %v1957_v29 = vld [vmem:[%s2325_s1 + $0xf8] sm:$0xff]   ;;  %s1436_s7 = sshll.u32 %s2329_s21, 2 }
   0xf   : > { %v1954_v26 = vld [vmem:[%s2325_s1 + $0x30] sm:$0xff]   ;;  %s2190_s28 = scalar_lea.vmem %s2324_s0, %s1568_s18  ;;  %v1958_v30 = vld [vmem:[%s2325_s1 + $0x38] sm:$0xff]   ;;  %s2274_s10 = scalar_lea.vmem %s2327_s3, %s1436_s7 }
  0x10   : > { %1701 = vmatpush3.bf16.msra.mxu0 %v1938_v10  ;;  %v1955_v27 = vld [vmem:[%s2325_s1 + $0xb0] sm:$0xff]   ;;  %v1959_v31 = vld [vmem:[%s2325_s1 + $0xb8] sm:$0xff]  }
  0x11   : > { %1813 = vmatpush3.bf16.msra.mxu1 %v1939_v11  ;;  %1702 = vmatprep.subr.bf16.mxu0 %v1940_v12  ;;  %v1960_v32 = vld [vmem:[%s2190_s28] ss:$16 sps:$4 sm:$0xff]   ;;  %v1962_v33 = vld [vmem:[%s2190_s28 + $0x4] ss:$16 sps:$4 sm:$0xff]   ;;  %v1963_v34 = vld [vmem:[%s2190_s28 + $0x8] ss:$16 sps:$4 sm:$0xff]  }
  0x12   : > { %1814 = vmatprep.subr.bf16.mxu1 %v1941_v13  ;;  %v1965_v35 = vld [vmem:[%s2190_s28 + $0xc] ss:$16 sps:$4 sm:$0xff]   ;;  %857 = vmatprep.mubr.bf16.mxu0 %v1962_v33  ;;  %v1966_v36 = vld [vmem:[%s2190_s28 + $0x24] ss:$16 sps:$4 sm:$0xff]   ;;  %v1970_v38 = vld [vmem:[%s2190_s28 + $0x20] ss:$16 sps:$4 sm:$0xff]  }
  0x13   : > { %1018 = vmatprep.mubr.bf16.mxu1 %v1965_v35  ;;  %v1968_v37 = vld [vmem:[%s2190_s28 + $0x2c] ss:$16 sps:$4 sm:$0xff]   ;;  %v1971_v39 = vld [vmem:[%s2190_s28 + $0x28] ss:$16 sps:$4 sm:$0xff]   ;;  %v1972_v40 = vld [vmem:[%s2190_s28 + $0x44] ss:$16 sps:$4 sm:$0xff]  }
  0x14   : > { %1703 = vmatpush3.bf16.msra.mxu0 %v1942_v14  ;;  %v1974_v41 = vld [vmem:[%s2190_s28 + $0x4c] ss:$16 sps:$4 sm:$0xff]   ;;  %v1976_v42 = vld [vmem:[%s2190_s28 + $0x40] ss:$16 sps:$4 sm:$0xff]   ;;  %v1977_v43 = vld [vmem:[%s2190_s28 + $0x48] ss:$16 sps:$4 sm:$0xff]  }
  0x15   : > { %1815 = vmatpush3.bf16.msra.mxu1 %v1943_v15  ;;  %1704 = vmatprep.subr.bf16.mxu0 %v1944_v16  ;;  %v1978_v44 = vld [vmem:[%s2190_s28 + $0x64] ss:$16 sps:$4 sm:$0xff]   ;;  %v1980_v45 = vld [vmem:[%s2190_s28 + $0x6c] ss:$16 sps:$4 sm:$0xff]   ;;  %v1982_v46 = vld [vmem:[%s2190_s28 + $0x60] ss:$16 sps:$4 sm:$0xff]  }
  0x16   : > { %1816 = vmatprep.subr.bf16.mxu1 %v1945_v17  ;;  %v1983_v47 = vld [vmem:[%s2190_s28 + $0x68] ss:$16 sps:$4 sm:$0xff]   ;;  %v1984_v48 = vld [vmem:[%s2190_s28 + $0x84] ss:$16 sps:$4 sm:$0xff]   ;;  %v1986_v49 = vld [vmem:[%s2190_s28 + $0x8c] ss:$16 sps:$4 sm:$0xff]  }
  0x17   : > { %v1988_v50 = vld [vmem:[%s2190_s28 + $0x80] ss:$16 sps:$4 sm:$0xff]   ;;  %v1989_v51 = vld [vmem:[%s2190_s28 + $0x88] ss:$16 sps:$4 sm:$0xff]   ;;  %v1990_v52 = vld [vmem:[%s2190_s28 + $0xa4] ss:$16 sps:$4 sm:$0xff]  }
  0x18   : > { %1705 = vmatpush3.bf16.msra.mxu0 %v1946_v18  ;;  %v1992_v53 = vld [vmem:[%s2190_s28 + $0xac] ss:$16 sps:$4 sm:$0xff]   ;;  %v1994_v54 = vld [vmem:[%s2190_s28 + $0xa0] ss:$16 sps:$4 sm:$0xff]   ;;  %v1995_v55 = vld [vmem:[%s2190_s28 + $0xa8] ss:$16 sps:$4 sm:$0xff]  }
  0x19   : > { %1817 = vmatpush3.bf16.msra.mxu1 %v1947_v19  ;;  %1706 = vmatprep.subr.bf16.mxu0 %v1948_v20  ;;  %v1996_v56 = vld [vmem:[%s2190_s28 + $0xc4] ss:$16 sps:$4 sm:$0xff]   ;;  %v1998_v57 = vld [vmem:[%s2190_s28 + $0xcc] ss:$16 sps:$4 sm:$0xff]   ;;  %v2000_v58 = vld [vmem:[%s2190_s28 + $0xc0] ss:$16 sps:$4 sm:$0xff]  }
  0x1a   : > { %1818 = vmatprep.subr.bf16.mxu1 %v1949_v21  ;;  %v2001_v59 = vld [vmem:[%s2190_s28 + $0xc8] ss:$16 sps:$4 sm:$0xff]   ;;  %v2002_v60 = vld [vmem:[%s2190_s28 + $0xe4] ss:$16 sps:$4 sm:$0xff]   ;;  %v2004_v61 = vld [vmem:[%s2190_s28 + $0xec] ss:$16 sps:$4 sm:$0xff]  }
  0x1b   : > { %v2006_v62 = vld [vmem:[%s2190_s28 + $0xe0] ss:$16 sps:$4 sm:$0xff]   ;;  %v2007_v63 = vld [vmem:[%s2190_s28 + $0xe8] ss:$16 sps:$4 sm:$0xff]   ;;  %v2008_v0 = vld [vmem:[%s2190_s28 + $0x104] ss:$16 sps:$4 sm:$0xff]  }
  0x1c   : > { %1707 = vmatpush3.bf16.msra.mxu0 %v1950_v22  ;;  %v2010_v1 = vld [vmem:[%s2190_s28 + $0x10c] ss:$16 sps:$4 sm:$0xff]   ;;  %v2012_v2 = vld [vmem:[%s2190_s28 + $0x100] ss:$16 sps:$4 sm:$0xff]   ;;  %v2013_v3 = vld [vmem:[%s2190_s28 + $0x108] ss:$16 sps:$4 sm:$0xff]  }
  0x1d   : > { %1819 = vmatpush3.bf16.msra.mxu1 %v1951_v23  ;;  %1708 = vmatprep.subr.bf16.mxu0 %v1952_v24  ;;  %v2014_v4 = vld [vmem:[%s2190_s28 + $0x124] ss:$16 sps:$4 sm:$0xff]   ;;  %v2016_v5 = vld [vmem:[%s2190_s28 + $0x12c] ss:$16 sps:$4 sm:$0xff]   ;;  %v2018_v6 = vld [vmem:[%s2190_s28 + $0x120] ss:$16 sps:$4 sm:$0xff]  }
  0x1e   : > { %1820 = vmatprep.subr.bf16.mxu1 %v1953_v25  ;;  %v2019_v7 = vld [vmem:[%s2190_s28 + $0x128] ss:$16 sps:$4 sm:$0xff]   ;;  %v2020_v8 = vld [vmem:[%s2190_s28 + $0x144] ss:$16 sps:$4 sm:$0xff]   ;;  %v2022_v9 = vld [vmem:[%s2190_s28 + $0x14c] ss:$16 sps:$4 sm:$0xff]  }
  0x1f   : > { %v2024_v10 = vld [vmem:[%s2190_s28 + $0x140] ss:$16 sps:$4 sm:$0xff]   ;;  %v2025_v11 = vld [vmem:[%s2190_s28 + $0x148] ss:$16 sps:$4 sm:$0xff]   ;;  %v2026_v12 = vld [vmem:[%s2190_s28 + $0x164] ss:$16 sps:$4 sm:$0xff]  }
  0x20   : > { %1709 = vmatpush3.bf16.msra.mxu0 %v1954_v26  ;;  %v2028_v13 = vld [vmem:[%s2190_s28 + $0x16c] ss:$16 sps:$4 sm:$0xff]   ;;  %v2030_v14 = vld [vmem:[%s2190_s28 + $0x160] ss:$16 sps:$4 sm:$0xff]   ;;  %v2031_v15 = vld [vmem:[%s2190_s28 + $0x168] ss:$16 sps:$4 sm:$0xff]  }
  0x21   : > { %1821 = vmatpush3.bf16.msra.mxu1 %v1955_v27  ;;  %1710 = vmatprep.subr.bf16.mxu0 %v1956_v28  ;;  %v2032_v16 = vld [vmem:[%s2190_s28 + $0x184] ss:$16 sps:$4 sm:$0xff]   ;;  %v2034_v17 = vld [vmem:[%s2190_s28 + $0x18c] ss:$16 sps:$4 sm:$0xff]   ;;  %v2036_v18 = vld [vmem:[%s2190_s28 + $0x180] ss:$16 sps:$4 sm:$0xff]  }
  0x22   : > { %1822 = vmatprep.subr.bf16.mxu1 %v1957_v29  ;;  %v2037_v19 = vld [vmem:[%s2190_s28 + $0x188] ss:$16 sps:$4 sm:$0xff]   ;;  %v2038_v20 = vld [vmem:[%s2190_s28 + $0x1a4] ss:$16 sps:$4 sm:$0xff]   ;;  %v2040_v21 = vld [vmem:[%s2190_s28 + $0x1ac] ss:$16 sps:$4 sm:$0xff]  }
  0x23   : > { %v2042_v22 = vld [vmem:[%s2190_s28 + $0x1a0] ss:$16 sps:$4 sm:$0xff]   ;;  %v2043_v23 = vld [vmem:[%s2190_s28 + $0x1a8] ss:$16 sps:$4 sm:$0xff]   ;;  %v2044_v24 = vld [vmem:[%s2190_s28 + $0x1c4] ss:$16 sps:$4 sm:$0xff]  }
  0x24   : > { %1711 = vmatpush3.bf16.msra.mxu0 %v1958_v30  ;;  %v2046_v25 = vld [vmem:[%s2190_s28 + $0x1cc] ss:$16 sps:$4 sm:$0xff]   ;;  %v2048_v26 = vld [vmem:[%s2190_s28 + $0x1c0] ss:$16 sps:$4 sm:$0xff]   ;;  %v2049_v27 = vld [vmem:[%s2190_s28 + $0x1c8] ss:$16 sps:$4 sm:$0xff]  }
  0x25   : > { %1823 = vmatpush3.bf16.msra.mxu1 %v1959_v31  ;;  %v2050_v28 = vld [vmem:[%s2190_s28 + $0x1e4] ss:$16 sps:$4 sm:$0xff]   ;;  %v2052_v29 = vld [vmem:[%s2190_s28 + $0x1ec] ss:$16 sps:$4 sm:$0xff]   ;;  %v2054_v30 = vld [vmem:[%s2190_s28 + $0x1e0] ss:$16 sps:$4 sm:$0xff]  }
  0x26   : > { %v2055_v31 = vld [vmem:[%s2190_s28 + $0x1e8] ss:$16 sps:$4 sm:$0xff]  }
  0x27   : > { %858 = vmatmul.mubr.bf16.vlgmr.msra.gmra.mrb[0].mxu0 %v1960_v32 }
  0x28   : > { %1019 = vmatmul.mubr.bf16.vlgmr.msra.gmra.mrb[0].mxu1 %v1963_v34  ;;  %865 = vmatprep.mubr.bf16.mxu0 %v1966_v36  ;;  %v2265_v34 = vld [vmem:[%s2326_s2] ss:$0 sm:$0xff] }
  0x29   : > { %1026 = vmatprep.mubr.bf16.mxu1 %v1968_v37 }
  0x2f   : > { %866 = vmatmul.mubr.bf16.gmra.mrb[4].mxu0 %v1970_v38 }
  0x30   : > { %1027 = vmatmul.mubr.bf16.gmra.mrb[4].mxu1 %v1971_v39  ;;  %873 = vmatprep.mubr.bf16.mxu0 %v1972_v40 }
  0x31   : > { %1034 = vmatprep.mubr.bf16.mxu1 %v1974_v41 }
  0x37   : > { %874 = vmatmul.mubr.bf16.gmra.mrb[8].mxu0 %v1976_v42 }
  0x38   : > { %1035 = vmatmul.mubr.bf16.gmra.mrb[8].mxu1 %v1977_v43  ;;  %881 = vmatprep.mubr.bf16.mxu0 %v1978_v44 }
  0x39   : > { %1042 = vmatprep.mubr.bf16.mxu1 %v1980_v45 }
  0x3f   : > { %882 = vmatmul.mubr.bf16.gmra.mrb[12].mxu0 %v1982_v46 }
  0x40   : > { %1043 = vmatmul.mubr.bf16.gmra.mrb[12].mxu1 %v1983_v47  ;;  %889 = vmatprep.mubr.bf16.mxu0 %v1984_v48 }
  0x41   : > { %1050 = vmatprep.mubr.bf16.mxu1 %v1986_v49 }
  0x47   : > { %890 = vmatmul.mubr.bf16.gmra.mrb[16].mxu0 %v1988_v50 }
  0x48   : > { %1051 = vmatmul.mubr.bf16.gmra.mrb[16].mxu1 %v1989_v51  ;;  %897 = vmatprep.mubr.bf16.mxu0 %v1990_v52 }
  0x49   : > { %1058 = vmatprep.mubr.bf16.mxu1 %v1992_v53 }
  0x4f   : > { %898 = vmatmul.mubr.bf16.gmra.mrb[20].mxu0 %v1994_v54 }
  0x50   : > { %1059 = vmatmul.mubr.bf16.gmra.mrb[20].mxu1 %v1995_v55  ;;  %905 = vmatprep.mubr.bf16.mxu0 %v1996_v56 }
  0x51   : > { %1066 = vmatprep.mubr.bf16.mxu1 %v1998_v57 }
  0x57   : > { %906 = vmatmul.mubr.bf16.gmra.mrb[24].mxu0 %v2000_v58 }
  0x58   : > { %1067 = vmatmul.mubr.bf16.gmra.mrb[24].mxu1 %v2001_v59  ;;  %913 = vmatprep.mubr.bf16.mxu0 %v2002_v60 }
  0x59   : > { %1074 = vmatprep.mubr.bf16.mxu1 %v2004_v61 }
  0x5f   : > { %914 = vmatmul.mubr.bf16.gmra.mrb[28].mxu0 %v2006_v62 }
  0x60   : > { %1075 = vmatmul.mubr.bf16.gmra.mrb[28].mxu1 %v2007_v63  ;;  %921 = vmatprep.mubr.bf16.mxu0 %v2008_v0 }
  0x61   : > { %1082 = vmatprep.mubr.bf16.mxu1 %v2010_v1 }
  0x67   : > { %922 = vmatmul.mubr.bf16.gmra.mrb[32].mxu0 %v2012_v2 }
  0x68   : > { %1083 = vmatmul.mubr.bf16.gmra.mrb[32].mxu1 %v2013_v3  ;;  %929 = vmatprep.mubr.bf16.mxu0 %v2014_v4 }
  0x69   : > { %1090 = vmatprep.mubr.bf16.mxu1 %v2016_v5 }
  0x6f   : > { %930 = vmatmul.mubr.bf16.gmra.mrb[36].mxu0 %v2018_v6 }
  0x70   : > { %1091 = vmatmul.mubr.bf16.gmra.mrb[36].mxu1 %v2019_v7  ;;  %937 = vmatprep.mubr.bf16.mxu0 %v2020_v8 }
  0x71   : > { %1098 = vmatprep.mubr.bf16.mxu1 %v2022_v9 }
  0x77   : > { %938 = vmatmul.mubr.bf16.gmra.mrb[40].mxu0 %v2024_v10 }
  0x78   : > { %1099 = vmatmul.mubr.bf16.gmra.mrb[40].mxu1 %v2025_v11  ;;  %945 = vmatprep.mubr.bf16.mxu0 %v2026_v12 }
  0x79   : > { %1106 = vmatprep.mubr.bf16.mxu1 %v2028_v13 }
  0x7f   : > { %946 = vmatmul.mubr.bf16.gmra.mrb[44].mxu0 %v2030_v14 }
  0x80   : > { %1107 = vmatmul.mubr.bf16.gmra.mrb[44].mxu1 %v2031_v15  ;;  %953 = vmatprep.mubr.bf16.mxu0 %v2032_v16 }
  0x81   : > { %1114 = vmatprep.mubr.bf16.mxu1 %v2034_v17 }
  0x87   : > { %954 = vmatmul.mubr.bf16.gmra.mrb[48].mxu0 %v2036_v18 }
  0x88   : > { %1115 = vmatmul.mubr.bf16.gmra.mrb[48].mxu1 %v2037_v19  ;;  %961 = vmatprep.mubr.bf16.mxu0 %v2038_v20 }
  0x89   : > { %1122 = vmatprep.mubr.bf16.mxu1 %v2040_v21 }
  0x8f   : > { %962 = vmatmul.mubr.bf16.gmra.mrb[52].mxu0 %v2042_v22 }
  0x90   : > { %1123 = vmatmul.mubr.bf16.gmra.mrb[52].mxu1 %v2043_v23  ;;  %969 = vmatprep.mubr.bf16.mxu0 %v2044_v24 }
  0x91   : > { %1130 = vmatprep.mubr.bf16.mxu1 %v2046_v25 }
  0x97   : > { %970 = vmatmul.mubr.bf16.gmra.mrb[56].mxu0 %v2048_v26 }
  0x98   : > { %1131 = vmatmul.mubr.bf16.gmra.mrb[56].mxu1 %v2049_v27  ;;  %977 = vmatprep.mubr.bf16.mxu0 %v2050_v28 }
  0x99   : > { %1138 = vmatprep.mubr.bf16.mxu1 %v2052_v29 }
  0x9f   : > { %978 = vmatmul.mubr.bf16.gmra.mrb[60].mxu0 %v2054_v30 }
  0xa0   : > { %1139 = vmatmul.mubr.bf16.gmra.mrb[60].mxu1 %v2055_v31 }
  0xfa   : > { %v1712_v32 = vpop.f32.mrb[0].mxu0 }
  0xfb   : > { %v1824_v33 = vpop.f32.mrb[0].mxu1  ;;  %v1713_v35 = vpop.f32.mrb[1].mxu0 }
  0xfc   : > { %v1714_v36 = vadd.f32 %v1713_v35, %v1712_v32  ;;  %v1825_v37 = vpop.f32.mrb[1].mxu1  ;;  %v1715_v38 = vpop.f32.mrb[2].mxu0 }
  0xfd   : > { %v1826_v39 = vadd.f32 %v1825_v37, %v1824_v33  ;;  %v1827_v40 = vpop.f32.mrb[2].mxu1  ;;  %v1716_v41 = vpop.f32.mrb[3].mxu0 }
  0xfe   : > { %v860_v42 = vadd.f32 %v1714_v36, %v2265_v34  ;;  %v1717_v43 = vadd.f32 %v1716_v41, %v1715_v38  ;;  %v1828_v44 = vpop.f32.mrb[3].mxu1 }
  0xff   : > { %v1829_v45 = vadd.f32 %v1828_v44, %v1827_v40 }
 0x100   : > { %v1021_v46 = vadd.f32 %v1826_v39, %v860_v42  ;;  %v863_v47 = vadd.f32 %v1717_v43, %v2265_v34 }
 0x102   : > { %v1147_v48 = vmul.f32 0.01, %v1021_v46  ;;  %v1024_v49 = vadd.f32 %v1829_v45, %v863_v47  ;;  %v1718_v50 = vpop.f32.mrb[4].mxu0 }
 0x103   : > { %v1830_v51 = vpop.f32.mrb[4].mxu1  ;;  %v1719_v52 = vpop.f32.mrb[5].mxu0 }
 0x104   : > { %v1148_v53 = vmul.f32 0.01, %v1024_v49  ;;  %v1720_v54 = vadd.f32 %v1719_v52, %v1718_v50  ;;  %v1831_v55 = vpop.f32.mrb[5].mxu1  ;;  %v1721_v56 = vpop.f32.mrb[6].mxu0  ;;  %v1179_v60 = vmax.f32 %v1021_v46, %v1147_v48 }
 0x105   : > { %v1832_v57 = vadd.f32 %v1831_v55, %v1830_v51  ;;  %v1833_v58 = vpop.f32.mrb[6].mxu1  ;;  %v1722_v59 = vpop.f32.mrb[7].mxu0 }
 0x106   : > { %v1180_v61 = vmax.f32 %v1024_v49, %v1148_v53  ;;  %v868_v62 = vadd.f32 %v1720_v54, %v2265_v34  ;;  %v1723_v63 = vadd.f32 %v1722_v59, %v1721_v56  ;;  %v1834_v0 = vpop.f32.mrb[7].mxu1 }
 0x107   : > { %v1835_v1 = vadd.f32 %v1834_v0, %v1833_v58 }
 0x108   : > { %v1604_v2 = vpack.c.bf16 %v1180_v61, %v1179_v60  ;;  %v1029_v3 = vadd.f32 %v1832_v57, %v868_v62  ;;  %v871_v4 = vadd.f32 %v1723_v63, %v2265_v34 }
 0x10a   : > { %1605 = vst [vmem:[%s2274_s10] sm:$0xff] %v1604_v2   ;;  %v1149_v5 = vmul.f32 0.01, %v1029_v3  ;;  %v1032_v6 = vadd.f32 %v1835_v1, %v871_v4  ;;  %v1724_v7 = vpop.f32.mrb[8].mxu0 }
 0x10b   : > { %v1836_v8 = vpop.f32.mrb[8].mxu1  ;;  %v1725_v9 = vpop.f32.mrb[9].mxu0 }
 0x10c   : > { %v1150_v10 = vmul.f32 0.01, %v1032_v6  ;;  %v1726_v11 = vadd.f32 %v1725_v9, %v1724_v7  ;;  %v1837_v12 = vpop.f32.mrb[9].mxu1  ;;  %v1727_v13 = vpop.f32.mrb[10].mxu0  ;;  %v1181_v17 = vmax.f32 %v1029_v3, %v1149_v5 }
 0x10d   : > { %v1838_v14 = vadd.f32 %v1837_v12, %v1836_v8  ;;  %v1839_v15 = vpop.f32.mrb[10].mxu1  ;;  %v1728_v16 = vpop.f32.mrb[11].mxu0 }
 0x10e   : > { %v1182_v18 = vmax.f32 %v1032_v6, %v1150_v10  ;;  %v876_v19 = vadd.f32 %v1726_v11, %v2265_v34  ;;  %v1729_v20 = vadd.f32 %v1728_v16, %v1727_v13  ;;  %v1840_v21 = vpop.f32.mrb[11].mxu1 }
 0x10f   : > { %v1841_v22 = vadd.f32 %v1840_v21, %v1839_v15 }
 0x110   : > { %v1609_v23 = vpack.c.bf16 %v1182_v18, %v1181_v17  ;;  %v1037_v24 = vadd.f32 %v1838_v14, %v876_v19  ;;  %v879_v25 = vadd.f32 %v1729_v20, %v2265_v34 }
 0x112   : > { %1681 = vst [vmem:[%s2274_s10 + $0x8] sm:$0xff] %v1609_v23   ;;  %v1151_v26 = vmul.f32 0.01, %v1037_v24  ;;  %v1040_v27 = vadd.f32 %v1841_v22, %v879_v25  ;;  %v1730_v28 = vpop.f32.mrb[12].mxu0 }
 0x113   : > { %v1842_v29 = vpop.f32.mrb[12].mxu1  ;;  %v1731_v30 = vpop.f32.mrb[13].mxu0 }
 0x114   : > { %v1152_v31 = vmul.f32 0.01, %v1040_v27  ;;  %v1732_v32 = vadd.f32 %v1731_v30, %v1730_v28  ;;  %v1843_v33 = vpop.f32.mrb[13].mxu1  ;;  %v1733_v35 = vpop.f32.mrb[14].mxu0  ;;  %v1183_v39 = vmax.f32 %v1037_v24, %v1151_v26 }
 0x115   : > { %v1844_v36 = vadd.f32 %v1843_v33, %v1842_v29  ;;  %v1845_v37 = vpop.f32.mrb[14].mxu1  ;;  %v1734_v38 = vpop.f32.mrb[15].mxu0 }
 0x116   : > { %v1184_v40 = vmax.f32 %v1040_v27, %v1152_v31  ;;  %v884_v41 = vadd.f32 %v1732_v32, %v2265_v34  ;;  %v1735_v42 = vadd.f32 %v1734_v38, %v1733_v35  ;;  %v1846_v43 = vpop.f32.mrb[15].mxu1 }
 0x117   : > { %v1847_v44 = vadd.f32 %v1846_v43, %v1845_v37 }
 0x118   : > { %v1614_v45 = vpack.c.bf16 %v1184_v40, %v1183_v39  ;;  %v1045_v46 = vadd.f32 %v1844_v36, %v884_v41  ;;  %v887_v47 = vadd.f32 %v1735_v42, %v2265_v34 }
 0x11a   : > { %1682 = vst [vmem:[%s2274_s10 + $0x10] sm:$0xff] %v1614_v45   ;;  %v1153_v48 = vmul.f32 0.01, %v1045_v46  ;;  %v1048_v49 = vadd.f32 %v1847_v44, %v887_v47  ;;  %v1736_v50 = vpop.f32.mrb[16].mxu0 }
 0x11b   : > { %v1848_v51 = vpop.f32.mrb[16].mxu1  ;;  %v1737_v52 = vpop.f32.mrb[17].mxu0 }
 0x11c   : > { %v1154_v53 = vmul.f32 0.01, %v1048_v49  ;;  %v1738_v54 = vadd.f32 %v1737_v52, %v1736_v50  ;;  %v1849_v55 = vpop.f32.mrb[17].mxu1  ;;  %v1739_v56 = vpop.f32.mrb[18].mxu0  ;;  %v1185_v60 = vmax.f32 %v1045_v46, %v1153_v48 }
 0x11d   : > { %v1850_v57 = vadd.f32 %v1849_v55, %v1848_v51  ;;  %v1851_v58 = vpop.f32.mrb[18].mxu1  ;;  %v1740_v59 = vpop.f32.mrb[19].mxu0 }
 0x11e   : > { %v1186_v61 = vmax.f32 %v1048_v49, %v1154_v53  ;;  %v892_v62 = vadd.f32 %v1738_v54, %v2265_v34  ;;  %v1741_v63 = vadd.f32 %v1740_v59, %v1739_v56  ;;  %v1852_v0 = vpop.f32.mrb[19].mxu1 }
 0x11f   : > { %v1853_v1 = vadd.f32 %v1852_v0, %v1851_v58 }
 0x120   : > { %v1619_v2 = vpack.c.bf16 %v1186_v61, %v1185_v60  ;;  %v1053_v3 = vadd.f32 %v1850_v57, %v892_v62  ;;  %v895_v4 = vadd.f32 %v1741_v63, %v2265_v34 }
 0x122   : > { %1683 = vst [vmem:[%s2274_s10 + $0x18] sm:$0xff] %v1619_v2   ;;  %v1155_v5 = vmul.f32 0.01, %v1053_v3  ;;  %v1056_v6 = vadd.f32 %v1853_v1, %v895_v4  ;;  %v1742_v7 = vpop.f32.mrb[20].mxu0 }
 0x123   : > { %v1854_v8 = vpop.f32.mrb[20].mxu1  ;;  %v1743_v9 = vpop.f32.mrb[21].mxu0 }
 0x124   : > { %v1156_v10 = vmul.f32 0.01, %v1056_v6  ;;  %v1744_v11 = vadd.f32 %v1743_v9, %v1742_v7  ;;  %v1855_v12 = vpop.f32.mrb[21].mxu1  ;;  %v1745_v13 = vpop.f32.mrb[22].mxu0  ;;  %v1187_v17 = vmax.f32 %v1053_v3, %v1155_v5 }
 0x125   : > { %v1856_v14 = vadd.f32 %v1855_v12, %v1854_v8  ;;  %v1857_v15 = vpop.f32.mrb[22].mxu1  ;;  %v1746_v16 = vpop.f32.mrb[23].mxu0 }
 0x126   : > { %v1188_v18 = vmax.f32 %v1056_v6, %v1156_v10  ;;  %v900_v19 = vadd.f32 %v1744_v11, %v2265_v34  ;;  %v1747_v20 = vadd.f32 %v1746_v16, %v1745_v13  ;;  %v1858_v21 = vpop.f32.mrb[23].mxu1 }
 0x127   : > { %v1859_v22 = vadd.f32 %v1858_v21, %v1857_v15 }
 0x128   : > { %v1624_v23 = vpack.c.bf16 %v1188_v18, %v1187_v17  ;;  %v1061_v24 = vadd.f32 %v1856_v14, %v900_v19  ;;  %v903_v25 = vadd.f32 %v1747_v20, %v2265_v34 }
 0x12a   : > { %1684 = vst [vmem:[%s2274_s10 + $0x20] sm:$0xff] %v1624_v23   ;;  %v1157_v26 = vmul.f32 0.01, %v1061_v24  ;;  %v1064_v27 = vadd.f32 %v1859_v22, %v903_v25  ;;  %v1748_v28 = vpop.f32.mrb[24].mxu0 }
 0x12b   : > { %v1860_v29 = vpop.f32.mrb[24].mxu1  ;;  %v1749_v30 = vpop.f32.mrb[25].mxu0 }
 0x12c   : > { %v1158_v31 = vmul.f32 0.01, %v1064_v27  ;;  %v1750_v32 = vadd.f32 %v1749_v30, %v1748_v28  ;;  %v1861_v33 = vpop.f32.mrb[25].mxu1  ;;  %v1751_v35 = vpop.f32.mrb[26].mxu0  ;;  %v1189_v39 = vmax.f32 %v1061_v24, %v1157_v26 }
 0x12d   : > { %v1862_v36 = vadd.f32 %v1861_v33, %v1860_v29  ;;  %v1863_v37 = vpop.f32.mrb[26].mxu1  ;;  %v1752_v38 = vpop.f32.mrb[27].mxu0 }
 0x12e   : > { %v1190_v40 = vmax.f32 %v1064_v27, %v1158_v31  ;;  %v908_v41 = vadd.f32 %v1750_v32, %v2265_v34  ;;  %v1753_v42 = vadd.f32 %v1752_v38, %v1751_v35  ;;  %v1864_v43 = vpop.f32.mrb[27].mxu1 }
 0x12f   : > { %v1865_v44 = vadd.f32 %v1864_v43, %v1863_v37 }
 0x130   : > { %v1629_v45 = vpack.c.bf16 %v1190_v40, %v1189_v39  ;;  %v1069_v46 = vadd.f32 %v1862_v36, %v908_v41  ;;  %v911_v47 = vadd.f32 %v1753_v42, %v2265_v34 }
 0x132   : > { %1685 = vst [vmem:[%s2274_s10 + $0x28] sm:$0xff] %v1629_v45   ;;  %v1159_v48 = vmul.f32 0.01, %v1069_v46  ;;  %v1072_v49 = vadd.f32 %v1865_v44, %v911_v47  ;;  %v1754_v50 = vpop.f32.mrb[28].mxu0 }
 0x133   : > { %v1866_v51 = vpop.f32.mrb[28].mxu1  ;;  %v1755_v52 = vpop.f32.mrb[29].mxu0 }
 0x134   : > { %v1160_v53 = vmul.f32 0.01, %v1072_v49  ;;  %v1756_v54 = vadd.f32 %v1755_v52, %v1754_v50  ;;  %v1867_v55 = vpop.f32.mrb[29].mxu1  ;;  %v1757_v56 = vpop.f32.mrb[30].mxu0  ;;  %v1191_v60 = vmax.f32 %v1069_v46, %v1159_v48 }
 0x135   : > { %v1868_v57 = vadd.f32 %v1867_v55, %v1866_v51  ;;  %v1869_v58 = vpop.f32.mrb[30].mxu1  ;;  %v1758_v59 = vpop.f32.mrb[31].mxu0 }
 0x136   : > { %v1192_v61 = vmax.f32 %v1072_v49, %v1160_v53  ;;  %v916_v62 = vadd.f32 %v1756_v54, %v2265_v34  ;;  %v1759_v63 = vadd.f32 %v1758_v59, %v1757_v56  ;;  %v1870_v0 = vpop.f32.mrb[31].mxu1 }
 0x137   : > { %v1871_v1 = vadd.f32 %v1870_v0, %v1869_v58 }
 0x138   : > { %v1634_v2 = vpack.c.bf16 %v1192_v61, %v1191_v60  ;;  %v1077_v3 = vadd.f32 %v1868_v57, %v916_v62  ;;  %v919_v4 = vadd.f32 %v1759_v63, %v2265_v34 }
 0x13a   : > { %1686 = vst [vmem:[%s2274_s10 + $0x30] sm:$0xff] %v1634_v2   ;;  %v1161_v5 = vmul.f32 0.01, %v1077_v3  ;;  %v1080_v6 = vadd.f32 %v1871_v1, %v919_v4  ;;  %v1760_v7 = vpop.f32.mrb[32].mxu0 }
 0x13b   : > { %v1872_v8 = vpop.f32.mrb[32].mxu1  ;;  %v1761_v9 = vpop.f32.mrb[33].mxu0 }
 0x13c   : > { %v1162_v10 = vmul.f32 0.01, %v1080_v6  ;;  %v1762_v11 = vadd.f32 %v1761_v9, %v1760_v7  ;;  %v1873_v12 = vpop.f32.mrb[33].mxu1  ;;  %v1763_v13 = vpop.f32.mrb[34].mxu0  ;;  %v1193_v17 = vmax.f32 %v1077_v3, %v1161_v5 }
 0x13d   : > { %v1874_v14 = vadd.f32 %v1873_v12, %v1872_v8  ;;  %v1875_v15 = vpop.f32.mrb[34].mxu1  ;;  %v1764_v16 = vpop.f32.mrb[35].mxu0 }
 0x13e   : > { %v1194_v18 = vmax.f32 %v1080_v6, %v1162_v10  ;;  %v924_v19 = vadd.f32 %v1762_v11, %v2265_v34  ;;  %v1765_v20 = vadd.f32 %v1764_v16, %v1763_v13  ;;  %v1876_v21 = vpop.f32.mrb[35].mxu1 }
 0x13f   : > { %v1877_v22 = vadd.f32 %v1876_v21, %v1875_v15 }
 0x140   : > { %v1639_v23 = vpack.c.bf16 %v1194_v18, %v1193_v17  ;;  %v1085_v24 = vadd.f32 %v1874_v14, %v924_v19  ;;  %v927_v25 = vadd.f32 %v1765_v20, %v2265_v34 }
 0x142   : > { %1687 = vst [vmem:[%s2274_s10 + $0x38] sm:$0xff] %v1639_v23   ;;  %v1163_v26 = vmul.f32 0.01, %v1085_v24  ;;  %v1088_v27 = vadd.f32 %v1877_v22, %v927_v25  ;;  %v1766_v28 = vpop.f32.mrb[36].mxu0 }
 0x143   : > { %v1878_v29 = vpop.f32.mrb[36].mxu1  ;;  %v1767_v30 = vpop.f32.mrb[37].mxu0 }
 0x144   : > { %v1164_v31 = vmul.f32 0.01, %v1088_v27  ;;  %v1768_v32 = vadd.f32 %v1767_v30, %v1766_v28  ;;  %v1879_v33 = vpop.f32.mrb[37].mxu1  ;;  %v1769_v35 = vpop.f32.mrb[38].mxu0  ;;  %v1195_v39 = vmax.f32 %v1085_v24, %v1163_v26 }
 0x145   : > { %v1880_v36 = vadd.f32 %v1879_v33, %v1878_v29  ;;  %v1881_v37 = vpop.f32.mrb[38].mxu1  ;;  %v1770_v38 = vpop.f32.mrb[39].mxu0 }
 0x146   : > { %v1196_v40 = vmax.f32 %v1088_v27, %v1164_v31  ;;  %v932_v41 = vadd.f32 %v1768_v32, %v2265_v34  ;;  %v1771_v42 = vadd.f32 %v1770_v38, %v1769_v35  ;;  %v1882_v43 = vpop.f32.mrb[39].mxu1 }
 0x147   : > { %v1883_v44 = vadd.f32 %v1882_v43, %v1881_v37 }
 0x148   : > { %v1644_v45 = vpack.c.bf16 %v1196_v40, %v1195_v39  ;;  %v1093_v46 = vadd.f32 %v1880_v36, %v932_v41  ;;  %v935_v47 = vadd.f32 %v1771_v42, %v2265_v34 }
 0x14a   : > { %1688 = vst [vmem:[%s2274_s10 + $0x40] sm:$0xff] %v1644_v45   ;;  %v1165_v48 = vmul.f32 0.01, %v1093_v46  ;;  %v1096_v49 = vadd.f32 %v1883_v44, %v935_v47  ;;  %v1772_v50 = vpop.f32.mrb[40].mxu0 }
 0x14b   : > { %v1884_v51 = vpop.f32.mrb[40].mxu1  ;;  %v1773_v52 = vpop.f32.mrb[41].mxu0 }
 0x14c   : > { %v1166_v53 = vmul.f32 0.01, %v1096_v49  ;;  %v1774_v54 = vadd.f32 %v1773_v52, %v1772_v50  ;;  %v1885_v55 = vpop.f32.mrb[41].mxu1  ;;  %v1775_v56 = vpop.f32.mrb[42].mxu0  ;;  %v1197_v60 = vmax.f32 %v1093_v46, %v1165_v48 }
 0x14d   : > { %v1886_v57 = vadd.f32 %v1885_v55, %v1884_v51  ;;  %v1887_v58 = vpop.f32.mrb[42].mxu1  ;;  %v1776_v59 = vpop.f32.mrb[43].mxu0 }
 0x14e   : > { %v1198_v61 = vmax.f32 %v1096_v49, %v1166_v53  ;;  %v940_v62 = vadd.f32 %v1774_v54, %v2265_v34  ;;  %v1777_v63 = vadd.f32 %v1776_v59, %v1775_v56  ;;  %v1888_v0 = vpop.f32.mrb[43].mxu1 }
 0x14f   : > { %v1889_v1 = vadd.f32 %v1888_v0, %v1887_v58 }
 0x150   : > { %v1649_v2 = vpack.c.bf16 %v1198_v61, %v1197_v60  ;;  %v1101_v3 = vadd.f32 %v1886_v57, %v940_v62  ;;  %v943_v4 = vadd.f32 %v1777_v63, %v2265_v34 }
 0x152   : > { %1689 = vst [vmem:[%s2274_s10 + $0x48] sm:$0xff] %v1649_v2   ;;  %v1167_v5 = vmul.f32 0.01, %v1101_v3  ;;  %v1104_v6 = vadd.f32 %v1889_v1, %v943_v4  ;;  %v1778_v7 = vpop.f32.mrb[44].mxu0 }
 0x153   : > { %v1890_v8 = vpop.f32.mrb[44].mxu1  ;;  %v1779_v9 = vpop.f32.mrb[45].mxu0 }
 0x154   : > { %v1168_v10 = vmul.f32 0.01, %v1104_v6  ;;  %v1780_v11 = vadd.f32 %v1779_v9, %v1778_v7  ;;  %v1891_v12 = vpop.f32.mrb[45].mxu1  ;;  %v1781_v13 = vpop.f32.mrb[46].mxu0  ;;  %v1199_v17 = vmax.f32 %v1101_v3, %v1167_v5 }
 0x155   : > { %v1892_v14 = vadd.f32 %v1891_v12, %v1890_v8  ;;  %v1893_v15 = vpop.f32.mrb[46].mxu1  ;;  %v1782_v16 = vpop.f32.mrb[47].mxu0 }
 0x156   : > { %v1200_v18 = vmax.f32 %v1104_v6, %v1168_v10  ;;  %v948_v19 = vadd.f32 %v1780_v11, %v2265_v34  ;;  %v1783_v20 = vadd.f32 %v1782_v16, %v1781_v13  ;;  %v1894_v21 = vpop.f32.mrb[47].mxu1 }
 0x157   : > { %v1895_v22 = vadd.f32 %v1894_v21, %v1893_v15 }
 0x158   : > { %v1654_v23 = vpack.c.bf16 %v1200_v18, %v1199_v17  ;;  %v1109_v24 = vadd.f32 %v1892_v14, %v948_v19  ;;  %v951_v25 = vadd.f32 %v1783_v20, %v2265_v34 }
 0x15a   : > { %1690 = vst [vmem:[%s2274_s10 + $0x50] sm:$0xff] %v1654_v23   ;;  %v1169_v26 = vmul.f32 0.01, %v1109_v24  ;;  %v1112_v27 = vadd.f32 %v1895_v22, %v951_v25  ;;  %v1784_v28 = vpop.f32.mrb[48].mxu0 }
 0x15b   : > { %v1896_v29 = vpop.f32.mrb[48].mxu1  ;;  %v1785_v30 = vpop.f32.mrb[49].mxu0 }
 0x15c   : > { %v1170_v31 = vmul.f32 0.01, %v1112_v27  ;;  %v1786_v32 = vadd.f32 %v1785_v30, %v1784_v28  ;;  %v1897_v33 = vpop.f32.mrb[49].mxu1  ;;  %v1787_v35 = vpop.f32.mrb[50].mxu0  ;;  %v1201_v39 = vmax.f32 %v1109_v24, %v1169_v26 }
 0x15d   : > { %v1898_v36 = vadd.f32 %v1897_v33, %v1896_v29  ;;  %v1899_v37 = vpop.f32.mrb[50].mxu1  ;;  %v1788_v38 = vpop.f32.mrb[51].mxu0 }
 0x15e   : > { %v1202_v40 = vmax.f32 %v1112_v27, %v1170_v31  ;;  %v956_v41 = vadd.f32 %v1786_v32, %v2265_v34  ;;  %v1789_v42 = vadd.f32 %v1788_v38, %v1787_v35  ;;  %v1900_v43 = vpop.f32.mrb[51].mxu1 }
 0x15f   : > { %v1901_v44 = vadd.f32 %v1900_v43, %v1899_v37 }
 0x160   : > { %v1659_v45 = vpack.c.bf16 %v1202_v40, %v1201_v39  ;;  %v1117_v46 = vadd.f32 %v1898_v36, %v956_v41  ;;  %v959_v47 = vadd.f32 %v1789_v42, %v2265_v34 }
 0x162   : > { %1691 = vst [vmem:[%s2274_s10 + $0x58] sm:$0xff] %v1659_v45   ;;  %v1171_v48 = vmul.f32 0.01, %v1117_v46  ;;  %v1120_v49 = vadd.f32 %v1901_v44, %v959_v47  ;;  %v1790_v50 = vpop.f32.mrb[52].mxu0 }
 0x163   : > { %v1902_v51 = vpop.f32.mrb[52].mxu1  ;;  %v1791_v52 = vpop.f32.mrb[53].mxu0 }
 0x164   : > { %v1172_v53 = vmul.f32 0.01, %v1120_v49  ;;  %v1792_v54 = vadd.f32 %v1791_v52, %v1790_v50  ;;  %v1903_v55 = vpop.f32.mrb[53].mxu1  ;;  %v1793_v56 = vpop.f32.mrb[54].mxu0  ;;  %v1203_v60 = vmax.f32 %v1117_v46, %v1171_v48 }
 0x165   : > { %v1904_v57 = vadd.f32 %v1903_v55, %v1902_v51  ;;  %v1905_v58 = vpop.f32.mrb[54].mxu1  ;;  %v1794_v59 = vpop.f32.mrb[55].mxu0 }
 0x166   : > { %v1204_v61 = vmax.f32 %v1120_v49, %v1172_v53  ;;  %v964_v62 = vadd.f32 %v1792_v54, %v2265_v34  ;;  %v1795_v63 = vadd.f32 %v1794_v59, %v1793_v56  ;;  %v1906_v0 = vpop.f32.mrb[55].mxu1 }
 0x167   : > { %v1907_v1 = vadd.f32 %v1906_v0, %v1905_v58 }
 0x168   : > { %v1664_v2 = vpack.c.bf16 %v1204_v61, %v1203_v60  ;;  %v1125_v3 = vadd.f32 %v1904_v57, %v964_v62  ;;  %v967_v4 = vadd.f32 %v1795_v63, %v2265_v34 }
 0x16a   : > { %1692 = vst [vmem:[%s2274_s10 + $0x60] sm:$0xff] %v1664_v2   ;;  %v1173_v5 = vmul.f32 0.01, %v1125_v3  ;;  %v1128_v6 = vadd.f32 %v1907_v1, %v967_v4  ;;  %v1796_v7 = vpop.f32.mrb[56].mxu0 }
 0x16b   : > { %v1908_v8 = vpop.f32.mrb[56].mxu1  ;;  %v1797_v9 = vpop.f32.mrb[57].mxu0 }
 0x16c   : > { %v1174_v10 = vmul.f32 0.01, %v1128_v6  ;;  %v1798_v11 = vadd.f32 %v1797_v9, %v1796_v7  ;;  %v1909_v12 = vpop.f32.mrb[57].mxu1  ;;  %v1799_v13 = vpop.f32.mrb[58].mxu0  ;;  %v1205_v17 = vmax.f32 %v1125_v3, %v1173_v5 }
 0x16d   : > { %v1910_v14 = vadd.f32 %v1909_v12, %v1908_v8  ;;  %v1911_v15 = vpop.f32.mrb[58].mxu1  ;;  %v1800_v16 = vpop.f32.mrb[59].mxu0 }
 0x16e   : > { %v1206_v18 = vmax.f32 %v1128_v6, %v1174_v10  ;;  %v972_v19 = vadd.f32 %v1798_v11, %v2265_v34  ;;  %v1801_v20 = vadd.f32 %v1800_v16, %v1799_v13  ;;  %v1912_v21 = vpop.f32.mrb[59].mxu1 }
 0x16f   : > { %v1913_v22 = vadd.f32 %v1912_v21, %v1911_v15 }
 0x170   : > { %v1669_v23 = vpack.c.bf16 %v1206_v18, %v1205_v17  ;;  %v1133_v24 = vadd.f32 %v1910_v14, %v972_v19  ;;  %v975_v25 = vadd.f32 %v1801_v20, %v2265_v34 }
 0x172   : > { %1693 = vst [vmem:[%s2274_s10 + $0x68] sm:$0xff] %v1669_v23   ;;  %v1175_v26 = vmul.f32 0.01, %v1133_v24  ;;  %v1136_v27 = vadd.f32 %v1913_v22, %v975_v25  ;;  %v1802_v28 = vpop.f32.mrb[60].mxu0 }
 0x173   : > { %v1914_v29 = vpop.f32.mrb[60].mxu1  ;;  %v1803_v30 = vpop.f32.mrb[61].mxu0 }
 0x174   : > { %v1176_v31 = vmul.f32 0.01, %v1136_v27  ;;  %v1804_v32 = vadd.f32 %v1803_v30, %v1802_v28  ;;  %v1915_v33 = vpop.f32.mrb[61].mxu1  ;;  %v1805_v35 = vpop.f32.mrb[62].mxu0  ;;  %v1207_v39 = vmax.f32 %v1133_v24, %v1175_v26 }
 0x175   : > { %v1916_v36 = vadd.f32 %v1915_v33, %v1914_v29  ;;  %v1917_v37 = vpop.f32.mrb[62].mxu1  ;;  %v1806_v38 = vpop.f32.mrb[63].mxu0 }
 0x176   : > { %v1208_v40 = vmax.f32 %v1136_v27, %v1176_v31  ;;  %v980_v41 = vadd.f32 %v1804_v32, %v2265_v34  ;;  %v1807_v42 = vadd.f32 %v1806_v38, %v1805_v35  ;;  %v1918_v43 = vpop.f32.mrb[63].mxu1 }
 0x177   : > { %v1919_v44 = vadd.f32 %v1918_v43, %v1917_v37 }
 0x178   : > { %v1674_v45 = vpack.c.bf16 %v1208_v40, %v1207_v39  ;;  %v1141_v46 = vadd.f32 %v1916_v36, %v980_v41  ;;  %v983_v47 = vadd.f32 %v1807_v42, %v2265_v34 }
 0x17a   : > { %1694 = vst [vmem:[%s2274_s10 + $0x70] sm:$0xff] %v1674_v45   ;;  %v1177_v48 = vmul.f32 0.01, %v1141_v46  ;;  %v1144_v49 = vadd.f32 %v1919_v44, %v983_v47 }
 0x17c   : > { %v1178_v50 = vmul.f32 0.01, %v1144_v49  ;;  %v1209_v51 = vmax.f32 %v1141_v46, %v1177_v48 }
 0x17e   : > { %v1210_v52 = vmax.f32 %v1144_v49, %v1178_v50 }
 0x180   : > { %v1679_v53 = vpack.c.bf16 %v1210_v52, %v1209_v51 }
 0x182   : > { %1695 = vst [vmem:[%s2274_s10 + $0x78] sm:$0xff] %v1679_v53  }
 0x183 PF: > { %s13_s12 = sadd.s32 1, %s2062_s12  }
 0x184   : > { %p10_p4 = scmp.ge.s32.totalorder %s13_s12, 4  }
 0x186   :  { %12 = sbr.rel (!%p10_p4) target bundleno = 1 (0x1), region = 62 }

// kernel: discriminator_forward.7
= control target key start
LH: loop header
LB: loop body
LE: loop exit
PB: predicated region body
PF: predicated region fallthrough
CT: control target
= control target key end

     0   :  { %s1052_s12 = smov 0   ;;  %s1208_s0 = inlined_call_operand.vmem [shape: bf16[128,512], index: 0, kind: input, shape index: {}]   ;;  %s1209_s1 = inlined_call_operand.vmem [shape: bf16[512,128], index: 1, kind: input, shape index: {}]   ;;  %s1210_s2 = inlined_call_operand.vmem [shape: f32[1,128], index: 2, kind: input, shape index: {}]   ;;  %s1211_s3 = inlined_call_operand.vmem [shape: bf16[128,128], index: 3, kind: output, shape index: {}]  }
   0x1 LB: > { %s779_s13 = sadd.s32 4294967295, %s1030_s12   ;;  %p783_p0 = scmp.ge.s32.totalorder %s1030_s12, 1  ;;  %s1030_s12 = sphi %s1052_s12, %s13_s12  }
   0x2   : > { %p139_p1 = scmp.lt.s32.totalorder %s1030_s12, 3 }
   0x4   : > { %p140_p2 = pnand %p783_p0, %p139_p1 }
   0x5   : > { %v968_v0 = vld [vmem:[%s1209_s1 + $0x40] sm:$0xff] (!%p140_p2)   ;;  %v972_v4 = vld [vmem:[%s1209_s1 + $0x48] sm:$0xff] (!%p140_p2)   ;;  %v976_v8 = vld [vmem:[%s1209_s1 + $0x50] sm:$0xff] (!%p140_p2)   ;;  %s784_s21 = sshll.u32 (!%p140_p2), %s779_s13, 3 }
   0x6   : > { %143 = sbr.rel (%p140_p2) target bundleno = 291 (0x123), region = 32  ;;  %v969_v1 = vld [vmem:[%s1209_s1 + $0xc0] sm:$0xff] (!%p140_p2)   ;;  %880 = vmatprep.subr.bf16.mxu0 (!%p140_p2), %v968_v0  ;;  %v973_v5 = vld [vmem:[%s1209_s1 + $0xc8] sm:$0xff] (!%p140_p2)   ;;  %v977_v9 = vld [vmem:[%s1209_s1 + $0xd0] sm:$0xff] (!%p140_p2)   ;;  %p165_p3 = scmp.lt.s32.totalorder (!%p140_p2), %s784_s21, 15 }
   0x7   : > { %v970_v2 = vld [vmem:[%s1209_s1] sm:$0xff] (!%p140_p2)   ;;  %920 = vmatprep.subr.bf16.mxu1 (!%p140_p2), %v969_v1  ;;  %v974_v6 = vld [vmem:[%s1209_s1 + $0x8] sm:$0xff] (!%p140_p2)   ;;  %v978_v10 = vld [vmem:[%s1209_s1 + $0x10] sm:$0xff] (!%p140_p2)  }
   0x8   : > { %v971_v3 = vld [vmem:[%s1209_s1 + $0x80] sm:$0xff] (!%p140_p2)   ;;  %881 = vmatpush3.bf16.msra.mxu0 (!%p140_p2), %v970_v2  ;;  %v975_v7 = vld [vmem:[%s1209_s1 + $0x88] sm:$0xff] (!%p140_p2)   ;;  %v979_v11 = vld [vmem:[%s1209_s1 + $0x90] sm:$0xff] (!%p140_p2)  }
   0x9   : > { %921 = vmatpush3.bf16.msra.mxu1 (!%p140_p2), %v971_v3  ;;  %882 = vmatprep.subr.bf16.mxu0 (!%p140_p2), %v972_v4  ;;  %v980_v12 = vld [vmem:[%s1209_s1 + $0x58] sm:$0xff] (!%p140_p2)   ;;  %v984_v16 = vld [vmem:[%s1209_s1 + $0x60] sm:$0xff] (!%p140_p2)   ;;  %v988_v20 = vld [vmem:[%s1209_s1 + $0x68] sm:$0xff] (!%p140_p2)  }
   0xa   : > { %922 = vmatprep.subr.bf16.mxu1 (!%p140_p2), %v973_v5  ;;  %v981_v13 = vld [vmem:[%s1209_s1 + $0xd8] sm:$0xff] (!%p140_p2)   ;;  %v985_v17 = vld [vmem:[%s1209_s1 + $0xe0] sm:$0xff] (!%p140_p2)   ;;  %v989_v21 = vld [vmem:[%s1209_s1 + $0xe8] sm:$0xff] (!%p140_p2)  }
   0xb   : > { %v982_v14 = vld [vmem:[%s1209_s1 + $0x18] sm:$0xff] (!%p140_p2)   ;;  %v986_v18 = vld [vmem:[%s1209_s1 + $0x20] sm:$0xff] (!%p140_p2)   ;;  %v990_v22 = vld [vmem:[%s1209_s1 + $0x28] sm:$0xff] (!%p140_p2)  }
   0xc   : > { %883 = vmatpush3.bf16.msra.mxu0 (!%p140_p2), %v974_v6  ;;  %v983_v15 = vld [vmem:[%s1209_s1 + $0x98] sm:$0xff] (!%p140_p2)   ;;  %v987_v19 = vld [vmem:[%s1209_s1 + $0xa0] sm:$0xff] (!%p140_p2)   ;;  %v991_v23 = vld [vmem:[%s1209_s1 + $0xa8] sm:$0xff] (!%p140_p2)  }
   0xd   : > { %923 = vmatpush3.bf16.msra.mxu1 %v975_v7  ;;  %884 = vmatprep.subr.bf16.mxu0 %v976_v8  ;;  %s1213_s21 = smov (!%p165_p3, %s784_s21), 15  ;;  %v992_v24 = vld [vmem:[%s1209_s1 + $0x70] sm:$0xff]   ;;  %v996_v28 = vld [vmem:[%s1209_s1 + $0x78] sm:$0xff]   ;;  %v1185_v50 = vld [vmem:[%s1210_s2] ss:$0 sm:$0xff] }
   0xe   : > { %924 = vmatprep.subr.bf16.mxu1 %v977_v9  ;;  %v993_v25 = vld [vmem:[%s1209_s1 + $0xf0] sm:$0xff]   ;;  %s848_s18 = sshll.u32 %s1213_s21, 4  ;;  %v997_v29 = vld [vmem:[%s1209_s1 + $0xf8] sm:$0xff]   ;;  %s788_s7 = sshll.u32 %s1213_s21, 2 }
   0xf   : > { %v994_v26 = vld [vmem:[%s1209_s1 + $0x30] sm:$0xff]   ;;  %s1158_s28 = scalar_lea.vmem %s1208_s0, %s848_s18  ;;  %v998_v30 = vld [vmem:[%s1209_s1 + $0x38] sm:$0xff]   ;;  %s1194_s10 = scalar_lea.vmem %s1211_s3, %s788_s7 }
  0x10   : > { %885 = vmatpush3.bf16.msra.mxu0 %v978_v10  ;;  %v995_v27 = vld [vmem:[%s1209_s1 + $0xb0] sm:$0xff]   ;;  %v999_v31 = vld [vmem:[%s1209_s1 + $0xb8] sm:$0xff]  }
  0x11   : > { %925 = vmatpush3.bf16.msra.mxu1 %v979_v11  ;;  %886 = vmatprep.subr.bf16.mxu0 %v980_v12  ;;  %v1000_v32 = vld [vmem:[%s1158_s28] ss:$16 sps:$4 sm:$0xff]   ;;  %v1002_v33 = vld [vmem:[%s1158_s28 + $0x4] ss:$16 sps:$4 sm:$0xff]   ;;  %v1003_v34 = vld [vmem:[%s1158_s28 + $0x8] ss:$16 sps:$4 sm:$0xff]  }
  0x12   : > { %926 = vmatprep.subr.bf16.mxu1 %v981_v13  ;;  %v1005_v35 = vld [vmem:[%s1158_s28 + $0xc] ss:$16 sps:$4 sm:$0xff]   ;;  %569 = vmatprep.mubr.bf16.mxu0 %v1002_v33  ;;  %v1006_v36 = vld [vmem:[%s1158_s28 + $0x24] ss:$16 sps:$4 sm:$0xff]   ;;  %v1010_v38 = vld [vmem:[%s1158_s28 + $0x20] ss:$16 sps:$4 sm:$0xff]  }
  0x13   : > { %634 = vmatprep.mubr.bf16.mxu1 %v1005_v35  ;;  %v1008_v37 = vld [vmem:[%s1158_s28 + $0x2c] ss:$16 sps:$4 sm:$0xff]   ;;  %v1011_v39 = vld [vmem:[%s1158_s28 + $0x28] ss:$16 sps:$4 sm:$0xff]   ;;  %v1012_v40 = vld [vmem:[%s1158_s28 + $0x44] ss:$16 sps:$4 sm:$0xff]  }
  0x14   : > { %887 = vmatpush3.bf16.msra.mxu0 %v982_v14  ;;  %v1014_v41 = vld [vmem:[%s1158_s28 + $0x4c] ss:$16 sps:$4 sm:$0xff]   ;;  %v1016_v42 = vld [vmem:[%s1158_s28 + $0x40] ss:$16 sps:$4 sm:$0xff]   ;;  %v1017_v43 = vld [vmem:[%s1158_s28 + $0x48] ss:$16 sps:$4 sm:$0xff]  }
  0x15   : > { %927 = vmatpush3.bf16.msra.mxu1 %v983_v15  ;;  %888 = vmatprep.subr.bf16.mxu0 %v984_v16  ;;  %v1018_v44 = vld [vmem:[%s1158_s28 + $0x64] ss:$16 sps:$4 sm:$0xff]   ;;  %v1020_v45 = vld [vmem:[%s1158_s28 + $0x6c] ss:$16 sps:$4 sm:$0xff]   ;;  %v1022_v46 = vld [vmem:[%s1158_s28 + $0x60] ss:$16 sps:$4 sm:$0xff]  }
  0x16   : > { %928 = vmatprep.subr.bf16.mxu1 %v985_v17  ;;  %v1023_v47 = vld [vmem:[%s1158_s28 + $0x68] ss:$16 sps:$4 sm:$0xff]  }
  0x18   : > { %889 = vmatpush3.bf16.msra.mxu0 %v986_v18 }
  0x19   : > { %929 = vmatpush3.bf16.msra.mxu1 %v987_v19  ;;  %890 = vmatprep.subr.bf16.mxu0 %v988_v20 }
  0x1a   : > { %930 = vmatprep.subr.bf16.mxu1 %v989_v21 }
  0x1c   : > { %891 = vmatpush3.bf16.msra.mxu0 %v990_v22 }
  0x1d   : > { %931 = vmatpush3.bf16.msra.mxu1 %v991_v23  ;;  %892 = vmatprep.subr.bf16.mxu0 %v992_v24 }
  0x1e   : > { %932 = vmatprep.subr.bf16.mxu1 %v993_v25 }
  0x20   : > { %893 = vmatpush3.bf16.msra.mxu0 %v994_v26 }
  0x21   : > { %933 = vmatpush3.bf16.msra.mxu1 %v995_v27  ;;  %894 = vmatprep.subr.bf16.mxu0 %v996_v28 }
  0x22   : > { %934 = vmatprep.subr.bf16.mxu1 %v997_v29 }
  0x24   : > { %895 = vmatpush3.bf16.msra.mxu0 %v998_v30 }
  0x25   : > { %935 = vmatpush3.bf16.msra.mxu1 %v999_v31 }
  0x27   : > { %570 = vmatmul.mubr.bf16.vlgmr.msra.gmra.mrb[0].mxu0 %v1000_v32 }
  0x28   : > { %635 = vmatmul.mubr.bf16.vlgmr.msra.gmra.mrb[0].mxu1 %v1003_v34  ;;  %577 = vmatprep.mubr.bf16.mxu0 %v1006_v36 }
  0x29   : > { %642 = vmatprep.mubr.bf16.mxu1 %v1008_v37 }
  0x2f   : > { %578 = vmatmul.mubr.bf16.gmra.mrb[4].mxu0 %v1010_v38 }
  0x30   : > { %643 = vmatmul.mubr.bf16.gmra.mrb[4].mxu1 %v1011_v39  ;;  %585 = vmatprep.mubr.bf16.mxu0 %v1012_v40 }
  0x31   : > { %650 = vmatprep.mubr.bf16.mxu1 %v1014_v41 }
  0x37   : > { %586 = vmatmul.mubr.bf16.gmra.mrb[8].mxu0 %v1016_v42 }
  0x38   : > { %651 = vmatmul.mubr.bf16.gmra.mrb[8].mxu1 %v1017_v43  ;;  %593 = vmatprep.mubr.bf16.mxu0 %v1018_v44 }
  0x39   : > { %658 = vmatprep.mubr.bf16.mxu1 %v1020_v45 }
  0x3f   : > { %594 = vmatmul.mubr.bf16.gmra.mrb[12].mxu0 %v1022_v46 }
  0x40   : > { %659 = vmatmul.mubr.bf16.gmra.mrb[12].mxu1 %v1023_v47 }
  0xfa   : > { %v896_v48 = vpop.f32.mrb[0].mxu0 }
  0xfb   : > { %v936_v49 = vpop.f32.mrb[0].mxu1  ;;  %v897_v51 = vpop.f32.mrb[1].mxu0 }
  0xfc   : > { %v898_v52 = vadd.f32 %v897_v51, %v896_v48  ;;  %v937_v53 = vpop.f32.mrb[1].mxu1  ;;  %v899_v54 = vpop.f32.mrb[2].mxu0 }
  0xfd   : > { %v938_v55 = vadd.f32 %v937_v53, %v936_v49  ;;  %v939_v56 = vpop.f32.mrb[2].mxu1  ;;  %v900_v57 = vpop.f32.mrb[3].mxu0 }
  0xfe   : > { %v572_v58 = vadd.f32 %v898_v52, %v1185_v50  ;;  %v901_v59 = vadd.f32 %v900_v57, %v899_v54  ;;  %v940_v60 = vpop.f32.mrb[3].mxu1 }
  0xff   : > { %v941_v61 = vadd.f32 %v940_v60, %v939_v56 }
 0x100   : > { %v637_v62 = vadd.f32 %v938_v55, %v572_v58  ;;  %v575_v63 = vadd.f32 %v901_v59, %v1185_v50 }
 0x102   : > { %v667_v0 = vmul.f32 0.01, %v637_v62  ;;  %v640_v1 = vadd.f32 %v941_v61, %v575_v63  ;;  %v902_v2 = vpop.f32.mrb[4].mxu0 }
 0x103   : > { %v942_v3 = vpop.f32.mrb[4].mxu1  ;;  %v903_v4 = vpop.f32.mrb[5].mxu0 }
 0x104   : > { %v668_v5 = vmul.f32 0.01, %v640_v1  ;;  %v904_v6 = vadd.f32 %v903_v4, %v902_v2  ;;  %v943_v7 = vpop.f32.mrb[5].mxu1  ;;  %v905_v8 = vpop.f32.mrb[6].mxu0  ;;  %v675_v12 = vmax.f32 %v637_v62, %v667_v0 }
 0x105   : > { %v944_v9 = vadd.f32 %v943_v7, %v942_v3  ;;  %v945_v10 = vpop.f32.mrb[6].mxu1  ;;  %v906_v11 = vpop.f32.mrb[7].mxu0 }
 0x106   : > { %v676_v13 = vmax.f32 %v640_v1, %v668_v5  ;;  %v580_v14 = vadd.f32 %v904_v6, %v1185_v50  ;;  %v907_v15 = vadd.f32 %v906_v11, %v905_v8  ;;  %v946_v16 = vpop.f32.mrb[7].mxu1 }
 0x107   : > { %v947_v17 = vadd.f32 %v946_v16, %v945_v10 }
 0x108   : > { %v860_v18 = vpack.c.bf16 %v676_v13, %v675_v12  ;;  %v645_v19 = vadd.f32 %v944_v9, %v580_v14  ;;  %v583_v20 = vadd.f32 %v907_v15, %v1185_v50 }
 0x10a   : > { %861 = vst [vmem:[%s1194_s10] sm:$0xff] %v860_v18   ;;  %v669_v21 = vmul.f32 0.01, %v645_v19  ;;  %v648_v22 = vadd.f32 %v947_v17, %v583_v20  ;;  %v908_v23 = vpop.f32.mrb[8].mxu0 }
 0x10b   : > { %v948_v24 = vpop.f32.mrb[8].mxu1  ;;  %v909_v25 = vpop.f32.mrb[9].mxu0 }
 0x10c   : > { %v670_v26 = vmul.f32 0.01, %v648_v22  ;;  %v910_v27 = vadd.f32 %v909_v25, %v908_v23  ;;  %v949_v28 = vpop.f32.mrb[9].mxu1  ;;  %v911_v29 = vpop.f32.mrb[10].mxu0  ;;  %v677_v33 = vmax.f32 %v645_v19, %v669_v21 }
 0x10d   : > { %v950_v30 = vadd.f32 %v949_v28, %v948_v24  ;;  %v951_v31 = vpop.f32.mrb[10].mxu1  ;;  %v912_v32 = vpop.f32.mrb[11].mxu0 }
 0x10e   : > { %v678_v34 = vmax.f32 %v648_v22, %v670_v26  ;;  %v588_v35 = vadd.f32 %v910_v27, %v1185_v50  ;;  %v913_v36 = vadd.f32 %v912_v32, %v911_v29  ;;  %v952_v37 = vpop.f32.mrb[11].mxu1 }
 0x10f   : > { %v953_v38 = vadd.f32 %v952_v37, %v951_v31 }
 0x110   : > { %v865_v39 = vpack.c.bf16 %v678_v34, %v677_v33  ;;  %v653_v40 = vadd.f32 %v950_v30, %v588_v35  ;;  %v591_v41 = vadd.f32 %v913_v36, %v1185_v50 }
 0x112   : > { %877 = vst [vmem:[%s1194_s10 + $0x8] sm:$0xff] %v865_v39   ;;  %v671_v42 = vmul.f32 0.01, %v653_v40  ;;  %v656_v43 = vadd.f32 %v953_v38, %v591_v41  ;;  %v914_v44 = vpop.f32.mrb[12].mxu0 }
 0x113   : > { %v954_v45 = vpop.f32.mrb[12].mxu1  ;;  %v915_v46 = vpop.f32.mrb[13].mxu0 }
 0x114   : > { %v672_v47 = vmul.f32 0.01, %v656_v43  ;;  %v916_v48 = vadd.f32 %v915_v46, %v914_v44  ;;  %v955_v49 = vpop.f32.mrb[13].mxu1  ;;  %v917_v51 = vpop.f32.mrb[14].mxu0  ;;  %v679_v55 = vmax.f32 %v653_v40, %v671_v42 }
 0x115   : > { %v956_v52 = vadd.f32 %v955_v49, %v954_v45  ;;  %v957_v53 = vpop.f32.mrb[14].mxu1  ;;  %v918_v54 = vpop.f32.mrb[15].mxu0 }
 0x116   : > { %v680_v56 = vmax.f32 %v656_v43, %v672_v47  ;;  %v596_v57 = vadd.f32 %v916_v48, %v1185_v50  ;;  %v919_v58 = vadd.f32 %v918_v54, %v917_v51  ;;  %v958_v59 = vpop.f32.mrb[15].mxu1 }
 0x117   : > { %v959_v60 = vadd.f32 %v958_v59, %v957_v53 }
 0x118   : > { %v870_v61 = vpack.c.bf16 %v680_v56, %v679_v55  ;;  %v661_v62 = vadd.f32 %v956_v52, %v596_v57  ;;  %v599_v63 = vadd.f32 %v919_v58, %v1185_v50 }
 0x11a   : > { %878 = vst [vmem:[%s1194_s10 + $0x10] sm:$0xff] %v870_v61   ;;  %v673_v0 = vmul.f32 0.01, %v661_v62  ;;  %v664_v1 = vadd.f32 %v959_v60, %v599_v63 }
 0x11c   : > { %v674_v2 = vmul.f32 0.01, %v664_v1  ;;  %v681_v3 = vmax.f32 %v661_v62, %v673_v0 }
 0x11e   : > { %v682_v4 = vmax.f32 %v664_v1, %v674_v2 }
 0x120   : > { %v875_v5 = vpack.c.bf16 %v682_v4, %v681_v3 }
 0x122   : > { %879 = vst [vmem:[%s1194_s10 + $0x18] sm:$0xff] %v875_v5  }
 0x123 PF: > { %s13_s12 = sadd.s32 1, %s1030_s12  }
 0x124   : > { %p10_p4 = scmp.ge.s32.totalorder %s13_s12, 4  }
 0x126   :  { %12 = sbr.rel (!%p10_p4) target bundleno = 1 (0x1), region = 62 }

// kernel: discriminator_forward.8
= control target key start
LH: loop header
LB: loop body
LE: loop exit
PB: predicated region body
PF: predicated region fallthrough
CT: control target
= control target key end

     0   :  { %s1262_s12 = smov 0   ;;  %s1490_s0 = inlined_call_operand.vmem [shape: bf16[32,1024], index: 0, kind: input, shape index: {}]   ;;  %s1491_s1 = inlined_call_operand.vmem [shape: bf16[1024,128], index: 1, kind: input, shape index: {}]   ;;  %s1492_s2 = inlined_call_operand.vmem [shape: f32[1,128], index: 2, kind: input, shape index: {}]   ;;  %s1493_s3 = inlined_call_operand.vmem [shape: bf16[32,128], index: 3, kind: output, shape index: {}]  }
   0x1 LB: > { %s979_s13 = sadd.s32 4294967295, %s1240_s12   ;;  %p983_p0 = scmp.ge.s32.totalorder %s1240_s12, 1  ;;  %s1240_s12 = sphi %s1262_s12, %s13_s12  }
   0x2   : > { %p139_p1 = scmp.lt.s32.totalorder %s1240_s12, 3 }
   0x4   : > { %p140_p2 = pnand %p983_p0, %p139_p1 }
   0x5   : > { %v1170_v0 = vld [vmem:[%s1491_s1 + $0x40] sm:$0xff] (!%p140_p2)   ;;  %v1174_v4 = vld [vmem:[%s1491_s1 + $0x48] sm:$0xff] (!%p140_p2)   ;;  %v1178_v8 = vld [vmem:[%s1491_s1 + $0x50] sm:$0xff] (!%p140_p2)   ;;  %s984_s21 = sshll.u32 (!%p140_p2), %s979_s13, 1 }
   0x6   : > { %143 = sbr.rel (%p140_p2) target bundleno = 299 (0x12b), region = 32  ;;  %v1171_v1 = vld [vmem:[%s1491_s1 + $0xc0] sm:$0xff] (!%p140_p2)   ;;  %1074 = vmatprep.subr.bf16.mxu0 (!%p140_p2), %v1170_v0  ;;  %v1175_v5 = vld [vmem:[%s1491_s1 + $0xc8] sm:$0xff] (!%p140_p2)   ;;  %v1179_v9 = vld [vmem:[%s1491_s1 + $0xd0] sm:$0xff] (!%p140_p2)   ;;  %p165_p3 = scmp.lt.s32.totalorder (!%p140_p2), %s984_s21, 3 }
   0x7   : > { %v1172_v2 = vld [vmem:[%s1491_s1] sm:$0xff] (!%p140_p2)   ;;  %1096 = vmatprep.subr.bf16.mxu1 (!%p140_p2), %v1171_v1  ;;  %v1176_v6 = vld [vmem:[%s1491_s1 + $0x8] sm:$0xff] (!%p140_p2)   ;;  %v1180_v10 = vld [vmem:[%s1491_s1 + $0x10] sm:$0xff] (!%p140_p2)  }
   0x8   : > { %v1173_v3 = vld [vmem:[%s1491_s1 + $0x80] sm:$0xff] (!%p140_p2)   ;;  %1075 = vmatpush3.bf16.msra.mxu0 (!%p140_p2), %v1172_v2  ;;  %v1177_v7 = vld [vmem:[%s1491_s1 + $0x88] sm:$0xff] (!%p140_p2)   ;;  %v1181_v11 = vld [vmem:[%s1491_s1 + $0x90] sm:$0xff] (!%p140_p2)  }
   0x9   : > { %1097 = vmatpush3.bf16.msra.mxu1 (!%p140_p2), %v1173_v3  ;;  %1076 = vmatprep.subr.bf16.mxu0 (!%p140_p2), %v1174_v4  ;;  %v1182_v12 = vld [vmem:[%s1491_s1 + $0x58] sm:$0xff] (!%p140_p2)   ;;  %v1186_v16 = vld [vmem:[%s1491_s1 + $0x60] sm:$0xff] (!%p140_p2)   ;;  %v1190_v20 = vld [vmem:[%s1491_s1 + $0x68] sm:$0xff] (!%p140_p2)  }
   0xa   : > { %1098 = vmatprep.subr.bf16.mxu1 (!%p140_p2), %v1175_v5  ;;  %v1183_v13 = vld [vmem:[%s1491_s1 + $0xd8] sm:$0xff] (!%p140_p2)   ;;  %v1187_v17 = vld [vmem:[%s1491_s1 + $0xe0] sm:$0xff] (!%p140_p2)   ;;  %v1191_v21 = vld [vmem:[%s1491_s1 + $0xe8] sm:$0xff] (!%p140_p2)  }
   0xb   : > { %v1184_v14 = vld [vmem:[%s1491_s1 + $0x18] sm:$0xff] (!%p140_p2)   ;;  %v1188_v18 = vld [vmem:[%s1491_s1 + $0x20] sm:$0xff] (!%p140_p2)   ;;  %v1192_v22 = vld [vmem:[%s1491_s1 + $0x28] sm:$0xff] (!%p140_p2)  }
   0xc   : > { %1077 = vmatpush3.bf16.msra.mxu0 (!%p140_p2), %v1176_v6  ;;  %v1185_v15 = vld [vmem:[%s1491_s1 + $0x98] sm:$0xff] (!%p140_p2)   ;;  %v1189_v19 = vld [vmem:[%s1491_s1 + $0xa0] sm:$0xff] (!%p140_p2)   ;;  %v1193_v23 = vld [vmem:[%s1491_s1 + $0xa8] sm:$0xff] (!%p140_p2)  }
   0xd   : > { %1099 = vmatpush3.bf16.msra.mxu1 %v1177_v7  ;;  %1078 = vmatprep.subr.bf16.mxu0 %v1178_v8  ;;  %s1495_s21 = smov (!%p165_p3, %s984_s21), 3  ;;  %v1194_v24 = vld [vmem:[%s1491_s1 + $0x70] sm:$0xff]   ;;  %v1198_v28 = vld [vmem:[%s1491_s1 + $0x78] sm:$0xff]   ;;  %v1202_v40 = vld [vmem:[%s1491_s1 + $0x140] sm:$0xff]  }
   0xe   : > { %1100 = vmatprep.subr.bf16.mxu1 %v1179_v9  ;;  %v1195_v25 = vld [vmem:[%s1491_s1 + $0xf0] sm:$0xff]   ;;  %s1066_s18 = sshll.u32 %s1495_s21, 5  ;;  %v1199_v29 = vld [vmem:[%s1491_s1 + $0xf8] sm:$0xff]   ;;  %v1203_v41 = vld [vmem:[%s1491_s1 + $0x1c0] sm:$0xff]  }
   0xf   : > { %v1196_v26 = vld [vmem:[%s1491_s1 + $0x30] sm:$0xff]   ;;  %s1368_s28 = scalar_lea.vmem %s1490_s0, %s1066_s18  ;;  %v1200_v30 = vld [vmem:[%s1491_s1 + $0x38] sm:$0xff]   ;;  %v1204_v42 = vld [vmem:[%s1491_s1 + $0x100] sm:$0xff]  }
  0x10   : > { %1079 = vmatpush3.bf16.msra.mxu0 %v1180_v10  ;;  %v1197_v27 = vld [vmem:[%s1491_s1 + $0xb0] sm:$0xff]   ;;  %v1201_v31 = vld [vmem:[%s1491_s1 + $0xb8] sm:$0xff]   ;;  %v178_v32 = vld [vmem:[%s1368_s28] sm:$0xff] }
  0x11   : > { %1101 = vmatpush3.bf16.msra.mxu1 %v1181_v11  ;;  %1080 = vmatprep.subr.bf16.mxu0 %v1182_v12  ;;  %v182_v33 = vld [vmem:[%s1368_s28 + $0x20] sm:$0xff]  ;;  %v179_v34 = vld [vmem:[%s1368_s28 + $0x8] sm:$0xff]  ;;  %v1210_v48 = vld [vmem:[%s1491_s1 + $0x150] sm:$0xff]  }
  0x12   : > { %1102 = vmatprep.subr.bf16.mxu1 %v1183_v13  ;;  %v990_v35 = vcombine.low %v178_v32, %v182_v33  ;;  %v991_v36 = vcombine.high %v178_v32, %v182_v33  ;;  %v183_v37 = vld [vmem:[%s1368_s28 + $0x28] sm:$0xff]  ;;  %v1205_v43 = vld [vmem:[%s1491_s1 + $0x180] sm:$0xff]   ;;  %v1211_v49 = vld [vmem:[%s1491_s1 + $0x1d0] sm:$0xff]  }
  0x13   : > { %v992_v38 = vcombine.low %v179_v34, %v183_v37  ;;  %v993_v39 = vcombine.high %v179_v34, %v183_v37  ;;  %v1206_v44 = vld [vmem:[%s1491_s1 + $0x148] sm:$0xff]   ;;  %v1212_v50 = vld [vmem:[%s1491_s1 + $0x110] sm:$0xff]   ;;  %v1214_v52 = vld [vmem:[%s1491_s1 + $0x158] sm:$0xff]  }
  0x14   : > { %1081 = vmatpush3.bf16.msra.mxu0 %v1184_v14  ;;  %777 = vmatprep.mubr.bf16.mxu0 %v991_v36  ;;  %v1207_v45 = vld [vmem:[%s1491_s1 + $0x1c8] sm:$0xff]   ;;  %v1213_v51 = vld [vmem:[%s1491_s1 + $0x190] sm:$0xff]   ;;  %v1215_v53 = vld [vmem:[%s1491_s1 + $0x1d8] sm:$0xff]  }
  0x15   : > { %1103 = vmatpush3.bf16.msra.mxu1 %v1185_v15  ;;  %1082 = vmatprep.subr.bf16.mxu0 %v1186_v16  ;;  %v1208_v46 = vld [vmem:[%s1491_s1 + $0x108] sm:$0xff]   ;;  %v1216_v54 = vld [vmem:[%s1491_s1 + $0x118] sm:$0xff]   ;;  %v1218_v56 = vld [vmem:[%s1491_s1 + $0x160] sm:$0xff]  }
  0x16   : > { %1104 = vmatprep.subr.bf16.mxu1 %v1187_v17  ;;  %818 = vmatprep.mubr.bf16.mxu1 %v993_v39  ;;  %v1209_v47 = vld [vmem:[%s1491_s1 + $0x188] sm:$0xff]   ;;  %v1217_v55 = vld [vmem:[%s1491_s1 + $0x198] sm:$0xff]   ;;  %v1219_v57 = vld [vmem:[%s1491_s1 + $0x1e0] sm:$0xff]  }
  0x17   : > { %v1220_v58 = vld [vmem:[%s1491_s1 + $0x120] sm:$0xff]   ;;  %v1222_v60 = vld [vmem:[%s1491_s1 + $0x168] sm:$0xff]   ;;  %v1226_v0 = vld [vmem:[%s1491_s1 + $0x170] sm:$0xff]  }
  0x18   : > { %1083 = vmatpush3.bf16.msra.mxu0 %v1188_v18  ;;  %v1221_v59 = vld [vmem:[%s1491_s1 + $0x1a0] sm:$0xff]   ;;  %v1223_v61 = vld [vmem:[%s1491_s1 + $0x1e8] sm:$0xff]   ;;  %v1227_v1 = vld [vmem:[%s1491_s1 + $0x1f0] sm:$0xff]  }
  0x19   : > { %1105 = vmatpush3.bf16.msra.mxu1 %v1189_v19  ;;  %1084 = vmatprep.subr.bf16.mxu0 %v1190_v20  ;;  %v1224_v62 = vld [vmem:[%s1491_s1 + $0x128] sm:$0xff]   ;;  %v1228_v2 = vld [vmem:[%s1491_s1 + $0x130] sm:$0xff]   ;;  %v1230_v4 = vld [vmem:[%s1491_s1 + $0x178] sm:$0xff]  }
  0x1a   : > { %1106 = vmatprep.subr.bf16.mxu1 %v1191_v21  ;;  %v1225_v63 = vld [vmem:[%s1491_s1 + $0x1a8] sm:$0xff]   ;;  %v1229_v3 = vld [vmem:[%s1491_s1 + $0x1b0] sm:$0xff]   ;;  %v1231_v5 = vld [vmem:[%s1491_s1 + $0x1f8] sm:$0xff]  }
  0x1b   : > { %v1232_v6 = vld [vmem:[%s1491_s1 + $0x138] sm:$0xff]   ;;  %v180_v8 = vld [vmem:[%s1368_s28 + $0x10] sm:$0xff]  ;;  %v989_v18 = vld [vmem:[%s1492_s2] ss:$0 sm:$0xff] }
  0x1c   : > { %1085 = vmatpush3.bf16.msra.mxu0 %v1192_v22  ;;  %v1233_v7 = vld [vmem:[%s1491_s1 + $0x1b8] sm:$0xff]   ;;  %v184_v9 = vld [vmem:[%s1368_s28 + $0x30] sm:$0xff] }
  0x1d   : > { %1107 = vmatpush3.bf16.msra.mxu1 %v1193_v23  ;;  %1086 = vmatprep.subr.bf16.mxu0 %v1194_v24  ;;  %v994_v10 = vcombine.low %v180_v8, %v184_v9  ;;  %v995_v11 = vcombine.high %v180_v8, %v184_v9  ;;  %v181_v12 = vld [vmem:[%s1368_s28 + $0x18] sm:$0xff] }
  0x1e   : > { %1108 = vmatprep.subr.bf16.mxu1 %v1195_v25  ;;  %v185_v13 = vld [vmem:[%s1368_s28 + $0x38] sm:$0xff]  ;;  %s988_s28 = sshll.u32 %s1495_s21, 2 }
  0x1f   : > { %v996_v14 = vcombine.low %v181_v12, %v185_v13  ;;  %v997_v15 = vcombine.high %v181_v12, %v185_v13  ;;  %s175_s29 = scalar_lea.vmem %s1493_s3, %s988_s28 }
  0x20   : > { %1087 = vmatpush3.bf16.msra.mxu0 %v1196_v26 }
  0x21   : > { %1109 = vmatpush3.bf16.msra.mxu1 %v1197_v27  ;;  %1088 = vmatprep.subr.bf16.mxu0 %v1198_v28 }
  0x22   : > { %1110 = vmatprep.subr.bf16.mxu1 %v1199_v29 }
  0x24   : > { %1089 = vmatpush3.bf16.msra.mxu0 %v1200_v30 }
  0x25   : > { %1111 = vmatpush3.bf16.msra.mxu1 %v1201_v31  ;;  %1118 = vmatprep.subr.bf16.mxu0 %v1202_v40 }
  0x26   : > { %1140 = vmatprep.subr.bf16.mxu1 %v1203_v41 }
  0x27   : > { %778 = vmatmul.mubr.bf16.vlgmr.msra.gmra.mrb[0].mxu0 %v990_v35 }
  0x28   : > { %819 = vmatmul.mubr.bf16.vlgmr.msra.gmra.mrb[0].mxu1 %v992_v38  ;;  %1119 = vmatpush3.bf16.msra.mxu0 %v1204_v42 }
  0x29   : > { %1141 = vmatpush3.bf16.msra.mxu1 %v1205_v43  ;;  %1120 = vmatprep.subr.bf16.mxu0 %v1206_v44 }
  0x2a   : > { %1142 = vmatprep.subr.bf16.mxu1 %v1207_v45  ;;  %859 = vmatprep.mubr.bf16.mxu0 %v995_v11 }
  0x2b   : > { %900 = vmatprep.mubr.bf16.mxu1 %v997_v15 }
  0x2c   : > { %1121 = vmatpush3.bf16.msra.mxu0 %v1208_v46 }
  0x2d   : > { %1143 = vmatpush3.bf16.msra.mxu1 %v1209_v47  ;;  %1122 = vmatprep.subr.bf16.mxu0 %v1210_v48 }
  0x2e   : > { %1144 = vmatprep.subr.bf16.mxu1 %v1211_v49 }
  0x30   : > { %1123 = vmatpush3.bf16.msra.mxu0 %v1212_v50 }
  0x31   : > { %1145 = vmatpush3.bf16.msra.mxu1 %v1213_v51  ;;  %1124 = vmatprep.subr.bf16.mxu0 %v1214_v52 }
  0x32   : > { %1146 = vmatprep.subr.bf16.mxu1 %v1215_v53 }
  0x34   : > { %1125 = vmatpush3.bf16.msra.mxu0 %v1216_v54 }
  0x35   : > { %1147 = vmatpush3.bf16.msra.mxu1 %v1217_v55  ;;  %1126 = vmatprep.subr.bf16.mxu0 %v1218_v56 }
  0x36   : > { %1148 = vmatprep.subr.bf16.mxu1 %v1219_v57 }
  0x38   : > { %1127 = vmatpush3.bf16.msra.mxu0 %v1220_v58 }
  0x39   : > { %1149 = vmatpush3.bf16.msra.mxu1 %v1221_v59  ;;  %1128 = vmatprep.subr.bf16.mxu0 %v1222_v60 }
  0x3a   : > { %1150 = vmatprep.subr.bf16.mxu1 %v1223_v61 }
  0x3c   : > { %1129 = vmatpush3.bf16.msra.mxu0 %v1224_v62 }
  0x3d   : > { %1151 = vmatpush3.bf16.msra.mxu1 %v1225_v63  ;;  %1130 = vmatprep.subr.bf16.mxu0 %v1226_v0 }
  0x3e   : > { %1152 = vmatprep.subr.bf16.mxu1 %v1227_v1 }
  0x40   : > { %1131 = vmatpush3.bf16.msra.mxu0 %v1228_v2 }
  0x41   : > { %1153 = vmatpush3.bf16.msra.mxu1 %v1229_v3  ;;  %1132 = vmatprep.subr.bf16.mxu0 %v1230_v4 }
  0x42   : > { %1154 = vmatprep.subr.bf16.mxu1 %v1231_v5 }
  0x44   : > { %1133 = vmatpush3.bf16.msra.mxu0 %v1232_v6 }
  0x45   : > { %1155 = vmatpush3.bf16.msra.mxu1 %v1233_v7 }
  0x47   : > { %860 = vmatmul.mubr.bf16.vlgmr.msra.gmra.mrb[4].mxu0 %v994_v10 }
  0x48   : > { %901 = vmatmul.mubr.bf16.vlgmr.msra.gmra.mrb[4].mxu1 %v996_v14 }
  0xfa   : > { %v1090_v16 = vpop.f32.mrb[0].mxu0 }
  0xfb   : > { %v1112_v17 = vpop.f32.mrb[0].mxu1  ;;  %v1091_v19 = vpop.f32.mrb[1].mxu0 }
  0xfc   : > { %v1092_v20 = vadd.f32 %v1091_v19, %v1090_v16  ;;  %v1113_v21 = vpop.f32.mrb[1].mxu1  ;;  %v1093_v22 = vpop.f32.mrb[2].mxu0 }
  0xfd   : > { %v1114_v23 = vadd.f32 %v1113_v21, %v1112_v17  ;;  %v1115_v24 = vpop.f32.mrb[2].mxu1  ;;  %v1094_v25 = vpop.f32.mrb[3].mxu0 }
  0xfe   : > { %v780_v26 = vadd.f32 %v1092_v20, %v989_v18  ;;  %v1095_v27 = vadd.f32 %v1094_v25, %v1093_v22  ;;  %v1116_v28 = vpop.f32.mrb[3].mxu1 }
  0xff   : > { %v1117_v29 = vadd.f32 %v1116_v28, %v1115_v24 }
 0x100   : > { %v821_v30 = vadd.f32 %v1114_v23, %v780_v26  ;;  %v783_v31 = vadd.f32 %v1095_v27, %v989_v18 }
 0x102   : > { %v824_v32 = vadd.f32 %v1117_v29, %v783_v31 }
 0x11a   : > { %v1134_v33 = vpop.f32.mrb[4].mxu0 }
 0x11b   : > { %v1156_v34 = vpop.f32.mrb[4].mxu1  ;;  %v1135_v35 = vpop.f32.mrb[5].mxu0 }
 0x11c   : > { %v1136_v36 = vadd.f32 %v1135_v35, %v1134_v33  ;;  %v1157_v37 = vpop.f32.mrb[5].mxu1  ;;  %v1137_v38 = vpop.f32.mrb[6].mxu0 }
 0x11d   : > { %v1158_v39 = vadd.f32 %v1157_v37, %v1156_v34  ;;  %v1159_v40 = vpop.f32.mrb[6].mxu1  ;;  %v1138_v41 = vpop.f32.mrb[7].mxu0 }
 0x11e   : > { %v862_v42 = vadd.f32 %v1136_v36, %v821_v30  ;;  %v1139_v43 = vadd.f32 %v1138_v41, %v1137_v38  ;;  %v1160_v44 = vpop.f32.mrb[7].mxu1 }
 0x11f   : > { %v1161_v45 = vadd.f32 %v1160_v44, %v1159_v40 }
 0x120   : > { %v903_v46 = vadd.f32 %v1158_v39, %v862_v42  ;;  %v865_v47 = vadd.f32 %v1139_v43, %v824_v32 }
 0x122   : > { %v909_v48 = vmul.f32 0.01, %v903_v46  ;;  %v906_v49 = vadd.f32 %v1161_v45, %v865_v47 }
 0x124   : > { %v910_v50 = vmul.f32 0.01, %v906_v49  ;;  %v911_v51 = vmax.f32 %v903_v46, %v909_v48 }
 0x126   : > { %v912_v52 = vmax.f32 %v906_v49, %v910_v50 }
 0x128   : > { %v1072_v53 = vpack.c.bf16 %v912_v52, %v911_v51 }
 0x12a   : > { %1073 = vst [vmem:[%s175_s29] sm:$0xff] %v1072_v53  }
 0x12b PF: > { %s13_s12 = sadd.s32 1, %s1240_s12  }
 0x12c   : > { %p10_p4 = scmp.ge.s32.totalorder %s13_s12, 4  }
 0x12e   :  { %12 = sbr.rel (!%p10_p4) target bundleno = 1 (0x1), region = 62 }

// kernel: discriminator_forward.9
= control target key start
LH: loop header
LB: loop body
LE: loop exit
PB: predicated region body
PF: predicated region fallthrough
CT: control target
= control target key end

     0   :  { %v5105_v1 = vmov 0   ;;  %v307_v27 = vlaneseq  ;;  %v5106_v28 = vmov 1966171168   ;;  %vm3812_vm0 = vcmask 1041408   ;;  %s6807_s2 = inlined_call_operand.vmem [shape: bf16[2048,256], index: 2, kind: input, shape index: {}]   ;;  %s6808_s4 = inlined_call_operand.vmem [shape: bf16[128,512], index: 4, kind: input, shape index: {}]   ;;  %s6809_s1 = inlined_call_operand.vmem [shape: bf16[2,128], index: 1, kind: input, shape index: {}]   ;;  %s6810_s0 = inlined_call_operand.vmem [shape: bf16[2,2048], index: 0, kind: input, shape index: {}]   ;;  %s6811_s6 = inlined_call_operand.vmem [shape: bf16[512,512], index: 6, kind: input, shape index: {}]   ;;  %s6812_s5 = inlined_call_operand.vmem [shape: f32[1,512], index: 5, kind: input, shape index: {}]   ;;  %s6813_s8 = inlined_call_operand.vmem [shape: bf16[512,256], index: 8, kind: input, shape index: {}]   ;;  %s6814_s7 = inlined_call_operand.vmem [shape: f32[1,512], index: 7, kind: input, shape index: {}]   ;;  %s6815_s3 = inlined_call_operand.vmem [shape: f32[1,256], index: 3, kind: input, shape index: {}]   ;;  %s6816_s10 = inlined_call_operand.vmem [shape: f32[1,256], index: 10, kind: input, shape index: {}]   ;;  %s6817_s12 = inlined_call_operand.<no memory space> [shape: f32[1,1], index: 12, kind: input, shape index: {}]   ;;  %s6818_s9 = inlined_call_operand.vmem [shape: f32[1,256], index: 9, kind: input, shape index: {}]   ;;  %s6819_s11 = inlined_call_operand.vmem [shape: f32[1,256], index: 11, kind: input, shape index: {}]   ;;  %s6820_s13 = inlined_call_operand.vmem [shape: f32[2,1], index: 13, kind: output, shape index: {}]  }
   0x1   :  { %v4383_v0 = vld [vmem:[%s6807_s2 + $0x4] ss:$8 sps:$4 sm:$0xff]   ;;  %2288 = vmatprep.mubr.bf16.mxu1 %v5105_v1  ;;  %v4387_v3 = vld [vmem:[%s6807_s2] ss:$8 sps:$4 sm:$0xff]   ;;  %v4389_v5 = vld [vmem:[%s6807_s2 + $0x14] ss:$8 sps:$4 sm:$0xff]   ;;  %v321_v29 = vunpack.c.l.s4 %v5106_v28 }
   0x2   :  { %v4385_v2 = vld [vmem:[%s6808_s4 + $0x4] ss:$16 sps:$4 sm:$0xff]   ;;  %1713 = vmatprep.subr.bf16.mxu0 %v4383_v0  ;;  %v4388_v4 = vld [vmem:[%s6808_s4] ss:$16 sps:$4 sm:$0xff]   ;;  %v5268_v34 = vshrl.u32 %v307_v27, 7  ;;  %vm3846_vm1 = vcmask 1024  }
   0x3   :  { %2256 = vmatprep.subr.bf16.mxu1 %v4385_v2  ;;  %1714 = vmatpush1.bf16.msra.mxu0 %v4387_v3  ;;  %v4391_v6 = vld [vmem:[%s6808_s4 + $0x24] ss:$16 sps:$4 sm:$0xff]   ;;  %v4393_v7 = vld [vmem:[%s6807_s2 + $0x10] ss:$8 sps:$4 sm:$0xff]   ;;  %v4399_v11 = vld [vmem:[%s6807_s2 + $0x20] ss:$8 sps:$4 sm:$0xff]   ;;  %v322_v35 = vunpack.c.0.s8 %v321_v29 }
   0x4   :  { %2257 = vmatpush1.bf16.msra.mxu1 %v4388_v4  ;;  %1715 = vmatprep.subr.bf16.mxu0 %v4389_v5  ;;  %v4394_v8 = vld [vmem:[%s6808_s4 + $0x20] ss:$16 sps:$4 sm:$0xff]   ;;  %v4395_v9 = vld [vmem:[%s6807_s2 + $0x24] ss:$8 sps:$4 sm:$0xff]   ;;  %v4401_v13 = vld [vmem:[%s6807_s2 + $0x34] ss:$8 sps:$4 sm:$0xff]  }
   0x5   :  { %2258 = vmatprep.subr.bf16.mxu1 %v4391_v6  ;;  %v4397_v10 = vld [vmem:[%s6808_s4 + $0x44] ss:$16 sps:$4 sm:$0xff]   ;;  %v4400_v12 = vld [vmem:[%s6808_s4 + $0x40] ss:$16 sps:$4 sm:$0xff]   ;;  %v5285_v40 = vsub.s32 %v322_v35, %v5268_v34  ;;  %v4455_v43 = vld [vmem:[%s6808_s4 + $0x8] ss:$16 sps:$4 sm:$0xff]  }
   0x6   :  { %v4403_v14 = vld [vmem:[%s6808_s4 + $0x64] ss:$16 sps:$4 sm:$0xff]   ;;  %v4405_v15 = vld [vmem:[%s6807_s2 + $0x30] ss:$8 sps:$4 sm:$0xff]   ;;  %v4411_v19 = vld [vmem:[%s6807_s2 + $0x40] ss:$8 sps:$4 sm:$0xff]  }
   0x7   :  { %1716 = vmatpush1.bf16.msra.mxu0 %v4393_v7  ;;  %v4406_v16 = vld [vmem:[%s6808_s4 + $0x60] ss:$16 sps:$4 sm:$0xff]   ;;  %v4407_v17 = vld [vmem:[%s6807_s2 + $0x44] ss:$8 sps:$4 sm:$0xff]   ;;  %v4413_v21 = vld [vmem:[%s6807_s2 + $0x54] ss:$8 sps:$4 sm:$0xff]  }
   0x8   :  { %2259 = vmatpush1.bf16.msra.mxu1 %v4394_v8  ;;  %1717 = vmatprep.subr.bf16.mxu0 %v4395_v9  ;;  %v4409_v18 = vld [vmem:[%s6808_s4 + $0x84] ss:$16 sps:$4 sm:$0xff]   ;;  %v4412_v20 = vld [vmem:[%s6808_s4 + $0x80] ss:$16 sps:$4 sm:$0xff]   ;;  %v4457_v44 = vld [vmem:[%s6808_s4 + $0xc] ss:$16 sps:$4 sm:$0xff]  }
   0x9   :  { %2260 = vmatprep.subr.bf16.mxu1 %v4397_v10  ;;  %v4415_v22 = vld [vmem:[%s6808_s4 + $0xa4] ss:$16 sps:$4 sm:$0xff]   ;;  %v4417_v23 = vld [vmem:[%s6807_s2 + $0x50] ss:$8 sps:$4 sm:$0xff]   ;;  %v4423_v30 = vld [vmem:[%s6807_s2 + $0x60] ss:$8 sps:$4 sm:$0xff]  }
   0xa   :  { %v4418_v24 = vld [vmem:[%s6808_s4 + $0xa0] ss:$16 sps:$4 sm:$0xff]   ;;  %v4419_v25 = vld [vmem:[%s6807_s2 + $0x64] ss:$8 sps:$4 sm:$0xff]   ;;  %v4425_v32 = vld [vmem:[%s6807_s2 + $0x74] ss:$8 sps:$4 sm:$0xff]  }
   0xb   :  { %1718 = vmatpush1.bf16.msra.mxu0 %v4399_v11  ;;  %v4421_v26 = vld [vmem:[%s6808_s4 + $0xc4] ss:$16 sps:$4 sm:$0xff]   ;;  %v4424_v31 = vld [vmem:[%s6808_s4 + $0xc0] ss:$16 sps:$4 sm:$0xff]   ;;  %v4465_v50 = vld [vmem:[%s6808_s4 + $0x2c] ss:$16 sps:$4 sm:$0xff]  }
   0xc   :  { %2261 = vmatpush1.bf16.msra.mxu1 %v4400_v12  ;;  %1719 = vmatprep.subr.bf16.mxu0 %v4401_v13  ;;  %v4427_v33 = vld [vmem:[%s6808_s4 + $0xe4] ss:$16 sps:$4 sm:$0xff]   ;;  %v4429_v36 = vld [vmem:[%s6807_s2 + $0x70] ss:$8 sps:$4 sm:$0xff]   ;;  %v5282_v39 = vld [vmem:[%s6809_s1] sm:$0x1] }
   0xd   :  { %2262 = vmatprep.subr.bf16.mxu1 %v4403_v14  ;;  %v4430_v37 = vld [vmem:[%s6808_s4 + $0xe0] ss:$16 sps:$4 sm:$0xff]   ;;  %v4431_v38 = vld [vmem:[%s6807_s2 + $0x84] ss:$8 sps:$4 sm:$0xff]   ;;  %v4434_v42 = vld [vmem:[%s6807_s2 + $0x94] ss:$8 sps:$4 sm:$0xff]  }
   0xe   :  { %v4433_v41 = vld [vmem:[%s6807_s2 + $0x80] ss:$8 sps:$4 sm:$0xff]   ;;  %v4436_v47 = vld [vmem:[%s6807_s2 + $0x90] ss:$8 sps:$4 sm:$0xff]   ;;  %v4437_v48 = vld [vmem:[%s6807_s2 + $0xa4] ss:$8 sps:$4 sm:$0xff]  }
   0xf   :  { %1720 = vmatpush1.bf16.msra.mxu0 %v4405_v15  ;;  %v5302_v45 = vld [vmem:[%s6810_s0] sm:$0xff]  ;;  %v4463_v51 = vld [vmem:[%s6808_s4 + $0x28] ss:$16 sps:$4 sm:$0xff]   ;;  %v4471_v53 = vld [vmem:[%s6808_s4 + $0x4c] ss:$16 sps:$4 sm:$0xff]  }
  0x10   :  { %2263 = vmatpush1.bf16.msra.mxu1 %v4406_v16  ;;  %1721 = vmatprep.subr.bf16.mxu0 %v4407_v17  ;;  %v5306_v46 = vrot.slane %v5302_v45, %v5285_v40  ;;  %v4439_v54 = vld [vmem:[%s6807_s2 + $0xa0] ss:$8 sps:$4 sm:$0xff]   ;;  %v4440_v55 = vld [vmem:[%s6807_s2 + $0xb4] ss:$8 sps:$4 sm:$0xff]   ;;  %v4442_v58 = vld [vmem:[%s6807_s2 + $0xb0] ss:$8 sps:$4 sm:$0xff]  }
  0x11   :  { %2264 = vmatprep.subr.bf16.mxu1 %v4409_v18  ;;  %v4469_v56 = vld [vmem:[%s6808_s4 + $0x48] ss:$16 sps:$4 sm:$0xff]   ;;  %v4477_v57 = vld [vmem:[%s6808_s4 + $0x6c] ss:$16 sps:$4 sm:$0xff]   ;;  %v4577_v27 = vld [vmem:[%s6811_s6] ss:$16 sps:$4 sm:$0xff]  }
  0x12   :  { %v334_v49 = vcombine.high %v5306_v46, %v5306_v46  ;;  %v4443_v59 = vld [vmem:[%s6807_s2 + $0xc4] ss:$8 sps:$4 sm:$0xff]   ;;  %v4475_v60 = vld [vmem:[%s6808_s4 + $0x68] ss:$16 sps:$4 sm:$0xff]   ;;  %v4446_v63 = vld [vmem:[%s6807_s2 + $0xd4] ss:$8 sps:$4 sm:$0xff]   ;;  %v5402_v13 = vrot.slane %v5306_v46, %v5285_v40 }
  0x13   :  { %1722 = vmatpush1.bf16.msra.mxu0 %v4411_v19  ;;  %v4483_v61 = vld [vmem:[%s6808_s4 + $0x8c] ss:$16 sps:$4 sm:$0xff]   ;;  %v4445_v62 = vld [vmem:[%s6807_s2 + $0xc0] ss:$8 sps:$4 sm:$0xff]   ;;  %v4448_v2 = vld [vmem:[%s6807_s2 + $0xd0] ss:$8 sps:$4 sm:$0xff]  }
  0x14   :  { %2265 = vmatpush1.bf16.msra.mxu1 %v4412_v20  ;;  %1723 = vmatprep.subr.bf16.mxu0 %v4413_v21  ;;  %v5325_v52 = vrot.slane %v334_v49, %v5285_v40  ;;  %v4481_v0 = vld [vmem:[%s6808_s4 + $0x88] ss:$16 sps:$4 sm:$0xff]   ;;  %v4449_v3 = vld [vmem:[%s6807_s2 + $0xe4] ss:$8 sps:$4 sm:$0xff]   ;;  %v4452_v7 = vld [vmem:[%s6807_s2 + $0xf4] ss:$8 sps:$4 sm:$0xff]  }
  0x15   :  { %2266 = vmatprep.subr.bf16.mxu1 %v4415_v22  ;;  %v4487_v4 = vld [vmem:[%s6808_s4 + $0xa8] ss:$16 sps:$4 sm:$0xff]   ;;  %v4495_v5 = vld [vmem:[%s6808_s4 + $0xcc] ss:$16 sps:$4 sm:$0xff]   ;;  %v4579_v28 = vld [vmem:[%s6811_s6 + $0x4] ss:$16 sps:$4 sm:$0xff]  }
  0x16   :  { %1745 = vmatprep.mubr.bf16.mxu0 %v5325_v52  ;;  %v4451_v6 = vld [vmem:[%s6807_s2 + $0xe0] ss:$8 sps:$4 sm:$0xff]   ;;  %v4501_v9 = vld [vmem:[%s6808_s4 + $0xec] ss:$16 sps:$4 sm:$0xff]   ;;  %v4454_v10 = vld [vmem:[%s6807_s2 + $0xf0] ss:$8 sps:$4 sm:$0xff]   ;;  %v366_v15 = vcombine.high %v5325_v52, %v5325_v52 }
  0x17   :  { %1724 = vmatpush1.bf16.msra.mxu0 %v4417_v23  ;;  %v4493_v8 = vld [vmem:[%s6808_s4 + $0xc8] ss:$16 sps:$4 sm:$0xff]   ;;  %v4462_v11 = vld [vmem:[%s6807_s2 + $0x104] ss:$8 sps:$4 sm:$0xff]   ;;  %v4468_v16 = vld [vmem:[%s6807_s2 + $0x114] ss:$8 sps:$4 sm:$0xff]  }
  0x18   :  { %2267 = vmatpush1.bf16.msra.mxu1 %v4418_v24  ;;  %1725 = vmatprep.subr.bf16.mxu0 %v4419_v25  ;;  %v4499_v12 = vld [vmem:[%s6808_s4 + $0xe8] ss:$16 sps:$4 sm:$0xff]   ;;  %v4474_v18 = vld [vmem:[%s6807_s2 + $0x124] ss:$8 sps:$4 sm:$0xff]   ;;  %v4480_v20 = vld [vmem:[%s6807_s2 + $0x134] ss:$8 sps:$4 sm:$0xff]  }
  0x19   :  { %2268 = vmatprep.subr.bf16.mxu1 %v4421_v26  ;;  %v4460_v14 = vld [vmem:[%s6807_s2 + $0x100] ss:$8 sps:$4 sm:$0xff]   ;;  %v4466_v17 = vld [vmem:[%s6807_s2 + $0x110] ss:$8 sps:$4 sm:$0xff]   ;;  %v4486_v22 = vld [vmem:[%s6807_s2 + $0x144] ss:$8 sps:$4 sm:$0xff]  }
  0x1a   :  { %v4472_v19 = vld [vmem:[%s6807_s2 + $0x120] ss:$8 sps:$4 sm:$0xff]   ;;  %v4478_v21 = vld [vmem:[%s6807_s2 + $0x130] ss:$8 sps:$4 sm:$0xff]   ;;  %v4492_v24 = vld [vmem:[%s6807_s2 + $0x154] ss:$8 sps:$4 sm:$0xff]  }
  0x1b   :  { %1726 = vmatpush1.bf16.msra.mxu0 %v4423_v30  ;;  %v4484_v23 = vld [vmem:[%s6807_s2 + $0x140] ss:$8 sps:$4 sm:$0xff]   ;;  %v4490_v25 = vld [vmem:[%s6807_s2 + $0x150] ss:$8 sps:$4 sm:$0xff]   ;;  %v4498_v26 = vld [vmem:[%s6807_s2 + $0x164] ss:$8 sps:$4 sm:$0xff]  }
  0x1c   :  { %2269 = vmatpush1.bf16.msra.mxu1 %v4424_v31  ;;  %1727 = vmatprep.subr.bf16.mxu0 %v4425_v32  ;;  %v4496_v29 = vld [vmem:[%s6807_s2 + $0x160] ss:$8 sps:$4 sm:$0xff]   ;;  %v4504_v30 = vld [vmem:[%s6807_s2 + $0x174] ss:$8 sps:$4 sm:$0xff]   ;;  %v4513_v46 = vld [vmem:[%s6807_s2 + $0x1a4] ss:$8 sps:$4 sm:$0xff]  }
  0x1d   :  { %2270 = vmatprep.subr.bf16.mxu1 %v4427_v33  ;;  %v4583_v31 = vld [vmem:[%s6811_s6 + $0x20] ss:$16 sps:$4 sm:$0xff]   ;;  %v4585_v32 = vld [vmem:[%s6811_s6 + $0x24] ss:$16 sps:$4 sm:$0xff]  }
  0x1e   :  { %v4502_v33 = vld [vmem:[%s6807_s2 + $0x170] ss:$8 sps:$4 sm:$0xff]   ;;  %v4591_v35 = vld [vmem:[%s6811_s6 + $0x44] ss:$16 sps:$4 sm:$0xff]   ;;  %v4511_v49 = vld [vmem:[%s6807_s2 + $0x1a0] ss:$8 sps:$4 sm:$0xff]  }
  0x1f   :  { %1728 = vmatpush1.bf16.msra.mxu0 %v4429_v36  ;;  %v4507_v36 = vld [vmem:[%s6807_s2 + $0x184] ss:$8 sps:$4 sm:$0xff]  }
  0x20   :  { %2271 = vmatpush1.bf16.msra.mxu1 %v4430_v37  ;;  %1729 = vmatprep.subr.bf16.mxu0 %v4431_v38  ;;  %v4589_v37 = vld [vmem:[%s6811_s6 + $0x40] ss:$16 sps:$4 sm:$0xff]   ;;  %v4597_v38 = vld [vmem:[%s6811_s6 + $0x64] ss:$16 sps:$4 sm:$0xff]  }
  0x21   :  { %2297 = vmatprep.subr.bf16.mxu1 %v4457_v44  ;;  %v4508_v44 = vld [vmem:[%s6807_s2 + $0x190] ss:$8 sps:$4 sm:$0xff]   ;;  %v4615_v52 = vld [vmem:[%s6811_s6 + $0xc4] ss:$16 sps:$4 sm:$0xff]  }
  0x23   :  { %2289 = vmatmul.mubr.bf16.vlgmr.msra.gmra.mrb[0].mxu1 %v5282_v39  ;;  %1730 = vmatpush1.bf16.msra.mxu0 %v4433_v41  ;;  %v4510_v41 = vld [vmem:[%s6807_s2 + $0x194] ss:$8 sps:$4 sm:$0xff]  }
  0x24   :  { %2298 = vmatpush1.bf16.msra.mxu1 %v4455_v43  ;;  %1731 = vmatprep.subr.bf16.mxu0 %v4434_v42  ;;  %v4595_v42 = vld [vmem:[%s6811_s6 + $0x60] ss:$16 sps:$4 sm:$0xff]   ;;  %v4603_v43 = vld [vmem:[%s6811_s6 + $0x84] ss:$16 sps:$4 sm:$0xff]  }
  0x25   :  { %2329 = vmatprep.mubr.bf16.mxu1 %v5105_v1  ;;  %2299 = vmatprep.subr.bf16.mxu1 %v4465_v50  ;;  %v4489_v1 = vld [vmem:[%s6808_s4 + $0xac] ss:$16 sps:$4 sm:$0xff]  }
  0x26   :  { %v4516_v50 = vld [vmem:[%s6807_s2 + $0x1b4] ss:$8 sps:$4 sm:$0xff]  }
  0x27   :  { %1732 = vmatpush1.bf16.msra.mxu0 %v4436_v47  ;;  %v4601_v47 = vld [vmem:[%s6811_s6 + $0x80] ss:$16 sps:$4 sm:$0xff]  }
  0x28   :  { %1733 = vmatprep.subr.bf16.mxu0 %v4437_v48  ;;  %2300 = vmatpush1.bf16.msra.mxu1 %v4463_v51  ;;  %v4609_v48 = vld [vmem:[%s6811_s6 + $0xa4] ss:$16 sps:$4 sm:$0xff]   ;;  %v4607_v51 = vld [vmem:[%s6811_s6 + $0xa0] ss:$16 sps:$4 sm:$0xff]  }
  0x29   :  { %2301 = vmatprep.subr.bf16.mxu1 %v4471_v53  ;;  %v4514_v53 = vld [vmem:[%s6807_s2 + $0x1b0] ss:$8 sps:$4 sm:$0xff]  }
  0x2b   :  { %1734 = vmatpush1.bf16.msra.mxu0 %v4439_v54  ;;  %v4519_v54 = vld [vmem:[%s6807_s2 + $0x1c4] ss:$8 sps:$4 sm:$0xff]  }
  0x2c   :  { %1735 = vmatprep.subr.bf16.mxu0 %v4440_v55  ;;  %2302 = vmatpush1.bf16.msra.mxu1 %v4469_v56  ;;  %v4613_v55 = vld [vmem:[%s6811_s6 + $0xc0] ss:$16 sps:$4 sm:$0xff]   ;;  %v4621_v56 = vld [vmem:[%s6811_s6 + $0xe4] ss:$16 sps:$4 sm:$0xff]  }
  0x2d   :  { %2303 = vmatprep.subr.bf16.mxu1 %v4477_v57  ;;  %v4517_v57 = vld [vmem:[%s6807_s2 + $0x1c0] ss:$8 sps:$4 sm:$0xff]  }
  0x2f   :  { %1736 = vmatpush1.bf16.msra.mxu0 %v4442_v58  ;;  %v4522_v58 = vld [vmem:[%s6807_s2 + $0x1d4] ss:$8 sps:$4 sm:$0xff]  }
  0x30   :  { %1737 = vmatprep.subr.bf16.mxu0 %v4443_v59  ;;  %2304 = vmatpush1.bf16.msra.mxu1 %v4475_v60  ;;  %v4619_v59 = vld [vmem:[%s6811_s6 + $0xe0] ss:$16 sps:$4 sm:$0xff]   ;;  %v4627_v60 = vld [vmem:[%s6811_s6 + $0x104] ss:$16 sps:$4 sm:$0xff]  }
  0x31   :  { %2305 = vmatprep.subr.bf16.mxu1 %v4483_v61  ;;  %v319_v61 = vcombine.high %v5302_v45, %v5302_v45  ;;  %v4633_v45 = vld [vmem:[%s6811_s6 + $0x124] ss:$16 sps:$4 sm:$0xff]  }
  0x33   :  { %1738 = vmatpush1.bf16.msra.mxu0 %v4445_v62  ;;  %v4520_v62 = vld [vmem:[%s6807_s2 + $0x1d0] ss:$8 sps:$4 sm:$0xff]  }
  0x34   :  { %1739 = vmatprep.subr.bf16.mxu0 %v4446_v63  ;;  %2306 = vmatpush1.bf16.msra.mxu1 %v4481_v0  ;;  %v4525_v63 = vld [vmem:[%s6807_s2 + $0x1e4] ss:$8 sps:$4 sm:$0xff]   ;;  %v4625_v0 = vld [vmem:[%s6811_s6 + $0x100] ss:$16 sps:$4 sm:$0xff]  }
  0x35   :  { %2307 = vmatprep.subr.bf16.mxu1 %v4489_v1  ;;  %v4523_v1 = vld [vmem:[%s6807_s2 + $0x1e0] ss:$8 sps:$4 sm:$0xff]  }
  0x37   :  { %1740 = vmatpush1.bf16.msra.mxu0 %v4448_v2  ;;  %v5555_v2 = vrot.slane %v319_v61, %v5285_v40 }
  0x38   :  { %1741 = vmatprep.subr.bf16.mxu0 %v4449_v3  ;;  %2308 = vmatpush1.bf16.msra.mxu1 %v4487_v4  ;;  %v4528_v3 = vld [vmem:[%s6807_s2 + $0x1f4] ss:$8 sps:$4 sm:$0xff]   ;;  %v4631_v4 = vld [vmem:[%s6811_s6 + $0x120] ss:$16 sps:$4 sm:$0xff]  }
  0x39   :  { %2309 = vmatprep.subr.bf16.mxu1 %v4495_v5  ;;  %v4639_v5 = vld [vmem:[%s6811_s6 + $0x144] ss:$16 sps:$4 sm:$0xff]  }
  0x3b   :  { %1742 = vmatpush1.bf16.msra.mxu0 %v4451_v6  ;;  %v4526_v6 = vld [vmem:[%s6807_s2 + $0x1f0] ss:$8 sps:$4 sm:$0xff]  }
  0x3c   :  { %1743 = vmatprep.subr.bf16.mxu0 %v4452_v7  ;;  %2310 = vmatpush1.bf16.msra.mxu1 %v4493_v8  ;;  %v335_v7 = vcombine.high %v5555_v2, %v5555_v2  ;;  %v4531_v8 = vld [vmem:[%s6807_s2 + $0x204] ss:$8 sps:$4 sm:$0xff]  }
  0x3d   :  { %2311 = vmatprep.subr.bf16.mxu1 %v4501_v9  ;;  %v4637_v9 = vld [vmem:[%s6811_s6 + $0x140] ss:$16 sps:$4 sm:$0xff]  }
  0x3f   :  { %1744 = vmatpush1.bf16.msra.mxu0 %v4454_v10  ;;  %v364_v10 = vcombine.high %v5402_v13, %v5402_v13 }
  0x40   :  { %1754 = vmatprep.subr.bf16.mxu0 %v4462_v11  ;;  %2312 = vmatpush1.bf16.msra.mxu1 %v4499_v12  ;;  %v4645_v11 = vld [vmem:[%s6811_s6 + $0x164] ss:$16 sps:$4 sm:$0xff]   ;;  %v4529_v12 = vld [vmem:[%s6807_s2 + $0x200] ss:$8 sps:$4 sm:$0xff]  }
  0x41   :  { %3140 = vmatprep.subr.bf16.mxu1 %v4579_v28  ;;  %v4661_v28 = vld [vmem:[%s6811_s6 + $0x1c0] ss:$16 sps:$4 sm:$0xff]  }
  0x42   :  { %1746 = vmatmul.mubr.bf16.vlgmr.msra.gmra.mrb[0].mxu0 %v5402_v13  ;;  %v4643_v13 = vld [vmem:[%s6811_s6 + $0x160] ss:$16 sps:$4 sm:$0xff]  }
  0x43   :  { %1755 = vmatpush1.bf16.msra.mxu0 %v4460_v14  ;;  %2330 = vmatmul.mubr.bf16.vlgmr.msra.gmra.mrb[4].mxu1 %v5282_v39  ;;  %v4505_v39 = vld [vmem:[%s6807_s2 + $0x180] ss:$8 sps:$4 sm:$0xff]   ;;  %v5586_v14 = vrot.slane %v335_v7, %v5285_v40 }
  0x44   :  { %1756 = vmatprep.subr.bf16.mxu0 %v4468_v16  ;;  %1786 = vmatprep.mubr.bf16.mxu0 %v366_v15  ;;  %v4534_v15 = vld [vmem:[%s6807_s2 + $0x214] ss:$8 sps:$4 sm:$0xff]   ;;  %v4616_v7 = vld [vmem:[%s6807_s2 + $0x360] ss:$8 sps:$4 sm:$0xff]  }
  0x45   :  { %3141 = vmatpush1.bf16.msra.mxu1 %v4577_v27  ;;  %v4651_v16 = vld [vmem:[%s6811_s6 + $0x184] ss:$16 sps:$4 sm:$0xff]   ;;  %v4541_v27 = vld [vmem:[%s6807_s2 + $0x240] ss:$8 sps:$4 sm:$0xff]   ;;  %v367_v61 = vcombine.high %v5586_v14, %v5586_v14 }
  0x46   :  { %3142 = vmatprep.subr.bf16.mxu1 %v4585_v32  ;;  %v4667_v32 = vld [vmem:[%s6811_s6 + $0x1e0] ss:$16 sps:$4 sm:$0xff]  }
  0x47   :  { %1757 = vmatpush1.bf16.msra.mxu0 %v4466_v17  ;;  %v4532_v17 = vld [vmem:[%s6807_s2 + $0x210] ss:$8 sps:$4 sm:$0xff]  }
  0x48   :  { %1758 = vmatprep.subr.bf16.mxu0 %v4474_v18  ;;  %v4537_v18 = vld [vmem:[%s6807_s2 + $0x224] ss:$8 sps:$4 sm:$0xff]  }
  0x49   :  { %3143 = vmatpush1.bf16.msra.mxu1 %v4583_v31  ;;  %v4544_v31 = vld [vmem:[%s6807_s2 + $0x250] ss:$8 sps:$4 sm:$0xff]  }
  0x4a   :  { %3144 = vmatprep.subr.bf16.mxu1 %v4591_v35  ;;  %v4549_v35 = vld [vmem:[%s6807_s2 + $0x264] ss:$8 sps:$4 sm:$0xff]  }
  0x4b   :  { %1759 = vmatpush1.bf16.msra.mxu0 %v4472_v19  ;;  %v4535_v19 = vld [vmem:[%s6807_s2 + $0x220] ss:$8 sps:$4 sm:$0xff]  }
  0x4c   :  { %1760 = vmatprep.subr.bf16.mxu0 %v4480_v20  ;;  %v4649_v20 = vld [vmem:[%s6811_s6 + $0x180] ss:$16 sps:$4 sm:$0xff]  }
  0x4d   :  { %3145 = vmatpush1.bf16.msra.mxu1 %v4589_v37  ;;  %v4552_v37 = vld [vmem:[%s6807_s2 + $0x274] ss:$8 sps:$4 sm:$0xff]  }
  0x4e   :  { %3146 = vmatprep.subr.bf16.mxu1 %v4597_v38  ;;  %v4550_v38 = vld [vmem:[%s6807_s2 + $0x270] ss:$8 sps:$4 sm:$0xff]  }
  0x4f   :  { %1761 = vmatpush1.bf16.msra.mxu0 %v4478_v21  ;;  %v4657_v21 = vld [vmem:[%s6811_s6 + $0x1a4] ss:$16 sps:$4 sm:$0xff]  }
  0x50   :  { %1762 = vmatprep.subr.bf16.mxu0 %v4486_v22  ;;  %v4540_v22 = vld [vmem:[%s6807_s2 + $0x234] ss:$8 sps:$4 sm:$0xff]  }
  0x51   :  { %3147 = vmatpush1.bf16.msra.mxu1 %v4595_v42  ;;  %v4558_v42 = vld [vmem:[%s6807_s2 + $0x294] ss:$8 sps:$4 sm:$0xff]  }
  0x52   :  { %3148 = vmatprep.subr.bf16.mxu1 %v4603_v43  ;;  %v4556_v43 = vld [vmem:[%s6807_s2 + $0x290] ss:$8 sps:$4 sm:$0xff]  }
  0x53   :  { %1763 = vmatpush1.bf16.msra.mxu0 %v4484_v23  ;;  %v4538_v23 = vld [vmem:[%s6807_s2 + $0x230] ss:$8 sps:$4 sm:$0xff]  }
  0x54   :  { %1764 = vmatprep.subr.bf16.mxu0 %v4492_v24  ;;  %v4655_v24 = vld [vmem:[%s6811_s6 + $0x1a0] ss:$16 sps:$4 sm:$0xff]  }
  0x55   :  { %3149 = vmatpush1.bf16.msra.mxu1 %v4601_v47  ;;  %v4564_v47 = vld [vmem:[%s6807_s2 + $0x2b4] ss:$8 sps:$4 sm:$0xff]  }
  0x56   :  { %3150 = vmatprep.subr.bf16.mxu1 %v4609_v48  ;;  %v4562_v48 = vld [vmem:[%s6807_s2 + $0x2b0] ss:$8 sps:$4 sm:$0xff]  }
  0x57   :  { %1765 = vmatpush1.bf16.msra.mxu0 %v4490_v25  ;;  %v4663_v25 = vld [vmem:[%s6811_s6 + $0x1c4] ss:$16 sps:$4 sm:$0xff]  }
  0x58   :  { %1766 = vmatprep.subr.bf16.mxu0 %v4498_v26  ;;  %v4543_v26 = vld [vmem:[%s6807_s2 + $0x244] ss:$8 sps:$4 sm:$0xff]  }
  0x59   :  { %3151 = vmatpush1.bf16.msra.mxu1 %v4607_v51  ;;  %v4570_v51 = vld [vmem:[%s6807_s2 + $0x2d4] ss:$8 sps:$4 sm:$0xff]  }
  0x5a   :  { %3152 = vmatprep.subr.bf16.mxu1 %v4615_v52  ;;  %v4568_v52 = vld [vmem:[%s6807_s2 + $0x2d0] ss:$8 sps:$4 sm:$0xff]  }
  0x5b   :  { %1767 = vmatpush1.bf16.msra.mxu0 %v4496_v29  ;;  %v4669_v29 = vld [vmem:[%s6811_s6 + $0x1e4] ss:$16 sps:$4 sm:$0xff]  }
  0x5c   :  { %1768 = vmatprep.subr.bf16.mxu0 %v4504_v30  ;;  %v4546_v30 = vld [vmem:[%s6807_s2 + $0x254] ss:$8 sps:$4 sm:$0xff]  }
  0x5d   :  { %3153 = vmatpush1.bf16.msra.mxu1 %v4613_v55  ;;  %v4576_v55 = vld [vmem:[%s6807_s2 + $0x2f4] ss:$8 sps:$4 sm:$0xff]  }
  0x5e   :  { %3154 = vmatprep.subr.bf16.mxu1 %v4621_v56  ;;  %v4574_v56 = vld [vmem:[%s6807_s2 + $0x2f0] ss:$8 sps:$4 sm:$0xff]  }
  0x5f   :  { %1769 = vmatpush1.bf16.msra.mxu0 %v4502_v33  ;;  %v4675_v33 = vld [vmem:[%s6811_s6 + $0x204] ss:$16 sps:$4 sm:$0xff]  }
  0x60   :  { %1770 = vmatprep.subr.bf16.mxu0 %v4507_v36  ;;  %v4547_v36 = vld [vmem:[%s6807_s2 + $0x260] ss:$8 sps:$4 sm:$0xff]  }
  0x61   :  { %3155 = vmatpush1.bf16.msra.mxu1 %v4619_v59  ;;  %v5717_v59 = vrot.slane %v5555_v2, %v5285_v40  ;;  %v4606_v2 = vld [vmem:[%s6807_s2 + $0x344] ss:$8 sps:$4 sm:$0xff]  }
  0x62   :  { %3156 = vmatprep.subr.bf16.mxu1 %v4627_v60  ;;  %v4588_v60 = vld [vmem:[%s6807_s2 + $0x314] ss:$8 sps:$4 sm:$0xff]  }
  0x63   :  { %1771 = vmatpush1.bf16.msra.mxu0 %v4505_v39  ;;  %v4555_v39 = vld [vmem:[%s6807_s2 + $0x284] ss:$8 sps:$4 sm:$0xff]  }
  0x64   :  { %1772 = vmatprep.subr.bf16.mxu0 %v4510_v41  ;;  %v4553_v41 = vld [vmem:[%s6807_s2 + $0x280] ss:$8 sps:$4 sm:$0xff]  }
  0x65   :  { %3157 = vmatpush1.bf16.msra.mxu1 %v4625_v0  ;;  %v4592_v0 = vld [vmem:[%s6807_s2 + $0x320] ss:$8 sps:$4 sm:$0xff]  }
  0x66   :  { %3158 = vmatprep.subr.bf16.mxu1 %v4633_v45  ;;  %v4600_v45 = vld [vmem:[%s6807_s2 + $0x334] ss:$8 sps:$4 sm:$0xff]  }
  0x67   :  { %1773 = vmatpush1.bf16.msra.mxu0 %v4508_v44  ;;  %v4561_v44 = vld [vmem:[%s6807_s2 + $0x2a4] ss:$8 sps:$4 sm:$0xff]  }
  0x68   :  { %1774 = vmatprep.subr.bf16.mxu0 %v4513_v46  ;;  %v4559_v46 = vld [vmem:[%s6807_s2 + $0x2a0] ss:$8 sps:$4 sm:$0xff]  }
  0x69   :  { %3159 = vmatpush1.bf16.msra.mxu1 %v4631_v4  ;;  %v4612_v4 = vld [vmem:[%s6807_s2 + $0x354] ss:$8 sps:$4 sm:$0xff]  }
  0x6a   :  { %3160 = vmatprep.subr.bf16.mxu1 %v4639_v5  ;;  %v4610_v5 = vld [vmem:[%s6807_s2 + $0x350] ss:$8 sps:$4 sm:$0xff]  }
  0x6b   :  { %1775 = vmatpush1.bf16.msra.mxu0 %v4511_v49  ;;  %v4567_v49 = vld [vmem:[%s6807_s2 + $0x2c4] ss:$8 sps:$4 sm:$0xff]  }
  0x6c   :  { %1776 = vmatprep.subr.bf16.mxu0 %v4516_v50  ;;  %v4565_v50 = vld [vmem:[%s6807_s2 + $0x2c0] ss:$8 sps:$4 sm:$0xff]  }
  0x6d   :  { %3161 = vmatpush1.bf16.msra.mxu1 %v4637_v9  ;;  %v4622_v9 = vld [vmem:[%s6807_s2 + $0x370] ss:$8 sps:$4 sm:$0xff]  }
  0x6e   :  { %3162 = vmatprep.subr.bf16.mxu1 %v4645_v11  ;;  %v4628_v11 = vld [vmem:[%s6807_s2 + $0x380] ss:$8 sps:$4 sm:$0xff]  }
  0x6f   :  { %1777 = vmatpush1.bf16.msra.mxu0 %v4514_v53  ;;  %v4573_v53 = vld [vmem:[%s6807_s2 + $0x2e4] ss:$8 sps:$4 sm:$0xff]  }
  0x70   :  { %1778 = vmatprep.subr.bf16.mxu0 %v4519_v54  ;;  %v4571_v54 = vld [vmem:[%s6807_s2 + $0x2e0] ss:$8 sps:$4 sm:$0xff]  }
  0x71   :  { %3163 = vmatpush1.bf16.msra.mxu1 %v4643_v13  ;;  %v4640_v13 = vld [vmem:[%s6807_s2 + $0x3a0] ss:$8 sps:$4 sm:$0xff]  }
  0x72   :  { %3164 = vmatprep.subr.bf16.mxu1 %v4651_v16  ;;  %v4648_v16 = vld [vmem:[%s6807_s2 + $0x3b4] ss:$8 sps:$4 sm:$0xff]  }
  0x73   :  { %1779 = vmatpush1.bf16.msra.mxu0 %v4517_v57  ;;  %v4582_v57 = vld [vmem:[%s6807_s2 + $0x304] ss:$8 sps:$4 sm:$0xff]  }
  0x74   :  { %1780 = vmatprep.subr.bf16.mxu0 %v4522_v58  ;;  %v4580_v58 = vld [vmem:[%s6807_s2 + $0x300] ss:$8 sps:$4 sm:$0xff]  }
  0x75   :  { %3165 = vmatpush1.bf16.msra.mxu1 %v4649_v20  ;;  %v5795_v20 = vsub.s32 0, %v5268_v34 }
  0x76   :  { %3166 = vmatprep.subr.bf16.mxu1 %v4657_v21  ;;  %v5800_v21 = vld [vmem:[%s6812_s5] sm:$0xf] }
  0x77   :  { %1781 = vmatpush1.bf16.msra.mxu0 %v4520_v62  ;;  %v4586_v62 = vld [vmem:[%s6807_s2 + $0x310] ss:$8 sps:$4 sm:$0xff]  }
  0x78   :  { %1782 = vmatprep.subr.bf16.mxu0 %v4525_v63  ;;  %v4594_v63 = vld [vmem:[%s6807_s2 + $0x324] ss:$8 sps:$4 sm:$0xff]  }
  0x79   :  { %3167 = vmatpush1.bf16.msra.mxu1 %v4655_v24  ;;  %v2079_v24 = vrot.slane %v5800_v21, %v5795_v20 }
  0x7a   :  { %3168 = vmatprep.subr.bf16.mxu1 %v4663_v25  ;;  %v4658_v25 = vld [vmem:[%s6807_s2 + $0x3d0] ss:$8 sps:$4 sm:$0xff]  }
  0x7b   :  { %1783 = vmatpush1.bf16.msra.mxu0 %v4523_v1  ;;  %v4598_v1 = vld [vmem:[%s6807_s2 + $0x330] ss:$8 sps:$4 sm:$0xff]  }
  0x7c   :  { %1784 = vmatprep.subr.bf16.mxu0 %v4528_v3  ;;  %v4604_v3 = vld [vmem:[%s6807_s2 + $0x340] ss:$8 sps:$4 sm:$0xff]  }
  0x7d   :  { %3169 = vmatpush1.bf16.msra.mxu1 %v4661_v28  ;;  %v4666_v28 = vld [vmem:[%s6807_s2 + $0x3e4] ss:$8 sps:$4 sm:$0xff]  }
  0x7e   :  { %3170 = vmatprep.subr.bf16.mxu1 %v4669_v29 }
  0x7f   :  { %1785 = vmatpush1.bf16.msra.mxu0 %v4526_v6  ;;  %v4618_v6 = vld [vmem:[%s6807_s2 + $0x364] ss:$8 sps:$4 sm:$0xff]  }
  0x80   :  { %1795 = vmatprep.subr.bf16.mxu0 %v4531_v8  ;;  %v4624_v8 = vld [vmem:[%s6807_s2 + $0x374] ss:$8 sps:$4 sm:$0xff]  }
  0x81   :  { %3171 = vmatpush1.bf16.msra.mxu1 %v4667_v32 }
  0x82   :  { %1787 = vmatmul.mubr.bf16.vlgmr.msra.gmra.mrb[0].mxu0 %v364_v10  ;;  %3181 = vmatprep.subr.bf16.mxu1 %v4675_v33  ;;  %v4630_v10 = vld [vmem:[%s6807_s2 + $0x384] ss:$8 sps:$4 sm:$0xff]  }
  0x83   :  { %1796 = vmatpush1.bf16.msra.mxu0 %v4529_v12  ;;  %1827 = vmatprep.mubr.bf16.mxu0 %v5586_v14  ;;  %v4636_v12 = vld [vmem:[%s6807_s2 + $0x394] ss:$8 sps:$4 sm:$0xff]   ;;  %v4634_v14 = vld [vmem:[%s6807_s2 + $0x390] ss:$8 sps:$4 sm:$0xff]  }
  0x84   :  { %1797 = vmatprep.subr.bf16.mxu0 %v4534_v15  ;;  %v4642_v15 = vld [vmem:[%s6807_s2 + $0x3a4] ss:$8 sps:$4 sm:$0xff]  }
  0x87   :  { %1798 = vmatpush1.bf16.msra.mxu0 %v4532_v17  ;;  %v4646_v17 = vld [vmem:[%s6807_s2 + $0x3b0] ss:$8 sps:$4 sm:$0xff]  }
  0x88   :  { %1799 = vmatprep.subr.bf16.mxu0 %v4537_v18  ;;  %v4654_v18 = vld [vmem:[%s6807_s2 + $0x3c4] ss:$8 sps:$4 sm:$0xff]  }
  0x8b   :  { %1800 = vmatpush1.bf16.msra.mxu0 %v4535_v19  ;;  %v4652_v19 = vld [vmem:[%s6807_s2 + $0x3c0] ss:$8 sps:$4 sm:$0xff]  }
  0x8c   :  { %1801 = vmatprep.subr.bf16.mxu0 %v4540_v22  ;;  %v4660_v22 = vld [vmem:[%s6807_s2 + $0x3d4] ss:$8 sps:$4 sm:$0xff]  }
  0x8f   :  { %1802 = vmatpush1.bf16.msra.mxu0 %v4538_v23  ;;  %v5806_v23 = vsub.s32 1, %v5268_v34 }
  0x90   :  { %1803 = vmatprep.subr.bf16.mxu0 %v4543_v26 }
  0x91   :  { %v2083_v26 = vrot.slane %v5800_v21, %v5806_v23 }
  0x93   :  { %1804 = vmatpush1.bf16.msra.mxu0 %v4541_v27  ;;  %v5818_v27 = vld [vmem:[%s6810_s0 + $0x8] sm:$0xff] }
  0x94   :  { %1805 = vmatprep.subr.bf16.mxu0 %v4546_v30 }
  0x97   :  { %1806 = vmatpush1.bf16.msra.mxu0 %v4544_v31 }
  0x98   :  { %1807 = vmatprep.subr.bf16.mxu0 %v4549_v35  ;;  %v4664_v35 = vld [vmem:[%s6807_s2 + $0x3e0] ss:$8 sps:$4 sm:$0xff]  }
  0x9b   :  { %1808 = vmatpush1.bf16.msra.mxu0 %v4547_v36  ;;  %v5828_v36 = vrot.slane %v5818_v27, %v5285_v40 }
  0x9c   :  { %1809 = vmatprep.subr.bf16.mxu0 %v4552_v37 }
  0x9f   :  { %1810 = vmatpush1.bf16.msra.mxu0 %v4550_v38 }
  0xa0   :  { %1811 = vmatprep.subr.bf16.mxu0 %v4555_v39  ;;  %v4672_v39 = vld [vmem:[%s6807_s2 + $0x3f4] ss:$8 sps:$4 sm:$0xff]  }
  0xa3   :  { %1812 = vmatpush1.bf16.msra.mxu0 %v4553_v41 }
  0xa4   :  { %1813 = vmatprep.subr.bf16.mxu0 %v4558_v42 }
  0xa7   :  { %1814 = vmatpush1.bf16.msra.mxu0 %v4556_v43 }
  0xa8   :  { %1815 = vmatprep.subr.bf16.mxu0 %v4561_v44  ;;  %v4670_v44 = vld [vmem:[%s6807_s2 + $0x3f0] ss:$8 sps:$4 sm:$0xff]  }
  0xab   :  { %1816 = vmatpush1.bf16.msra.mxu0 %v4559_v46  ;;  %v383_v46 = vcombine.high %v5828_v36, %v5828_v36 }
  0xac   :  { %1817 = vmatprep.subr.bf16.mxu0 %v4564_v47  ;;  %v4678_v47 = vld [vmem:[%s6807_s2 + $0x404] ss:$8 sps:$4 sm:$0xff]  }
  0xaf   :  { %1818 = vmatpush1.bf16.msra.mxu0 %v4562_v48 }
  0xb0   :  { %1819 = vmatprep.subr.bf16.mxu0 %v4567_v49  ;;  %v4673_v49 = vld [vmem:[%s6811_s6 + $0x200] ss:$16 sps:$4 sm:$0xff]  }
  0xb3   :  { %1820 = vmatpush1.bf16.msra.mxu0 %v4565_v50 }
  0xb4   :  { %1821 = vmatprep.subr.bf16.mxu0 %v4570_v51  ;;  %v365_v51 = vcombine.high %v5717_v59, %v5717_v59 }
  0xb7   :  { %1822 = vmatpush1.bf16.msra.mxu0 %v4568_v52  ;;  %v4681_v52 = vld [vmem:[%s6811_s6 + $0x224] ss:$16 sps:$4 sm:$0xff]  }
  0xb8   :  { %1823 = vmatprep.subr.bf16.mxu0 %v4573_v53  ;;  %v4676_v53 = vld [vmem:[%s6807_s2 + $0x400] ss:$8 sps:$4 sm:$0xff]  }
  0xbb   :  { %1824 = vmatpush1.bf16.msra.mxu0 %v4571_v54  ;;  %v5858_v54 = vrot.slane %v383_v46, %v5285_v40  ;;  %v4738_v46 = vld [vmem:[%s6807_s2 + $0x4a4] ss:$8 sps:$4 sm:$0xff]  }
  0xbc   :  { %1825 = vmatprep.subr.bf16.mxu0 %v4576_v55  ;;  %v4684_v55 = vld [vmem:[%s6807_s2 + $0x414] ss:$8 sps:$4 sm:$0xff]  }
  0xbf   :  { %1826 = vmatpush1.bf16.msra.mxu0 %v4574_v56  ;;  %v4679_v56 = vld [vmem:[%s6811_s6 + $0x220] ss:$16 sps:$4 sm:$0xff]  }
  0xc0   :  { %1836 = vmatprep.subr.bf16.mxu0 %v4582_v57  ;;  %v4687_v57 = vld [vmem:[%s6811_s6 + $0x244] ss:$16 sps:$4 sm:$0xff]  }
  0xc2   :  { %1828 = vmatmul.mubr.bf16.vlgmr.msra.gmra.mrb[0].mxu0 %v5717_v59  ;;  %v4690_v59 = vld [vmem:[%s6807_s2 + $0x424] ss:$8 sps:$4 sm:$0xff]  }
  0xc3   :  { %1837 = vmatpush1.bf16.msra.mxu0 %v4580_v58  ;;  %1868 = vmatprep.mubr.bf16.mxu0 %v367_v61  ;;  %v4682_v58 = vld [vmem:[%s6807_s2 + $0x410] ss:$8 sps:$4 sm:$0xff]   ;;  %v4693_v61 = vld [vmem:[%s6811_s6 + $0x264] ss:$16 sps:$4 sm:$0xff]  }
  0xc4   :  { %1838 = vmatprep.subr.bf16.mxu0 %v4588_v60  ;;  %v4685_v60 = vld [vmem:[%s6811_s6 + $0x240] ss:$16 sps:$4 sm:$0xff]  }
  0xc7   :  { %1839 = vmatpush1.bf16.msra.mxu0 %v4586_v62  ;;  %v4688_v62 = vld [vmem:[%s6807_s2 + $0x420] ss:$8 sps:$4 sm:$0xff]  }
  0xc8   :  { %1840 = vmatprep.subr.bf16.mxu0 %v4594_v63  ;;  %v4696_v63 = vld [vmem:[%s6807_s2 + $0x434] ss:$8 sps:$4 sm:$0xff]  }
  0xcb   :  { %1841 = vmatpush1.bf16.msra.mxu0 %v4592_v0  ;;  %v4691_v0 = vld [vmem:[%s6811_s6 + $0x260] ss:$16 sps:$4 sm:$0xff]  }
  0xcc   :  { %1842 = vmatprep.subr.bf16.mxu0 %v4600_v45  ;;  %v4699_v45 = vld [vmem:[%s6811_s6 + $0x284] ss:$16 sps:$4 sm:$0xff]  }
  0xcf   :  { %1843 = vmatpush1.bf16.msra.mxu0 %v4598_v1  ;;  %v4694_v1 = vld [vmem:[%s6807_s2 + $0x430] ss:$8 sps:$4 sm:$0xff]  }
  0xd0   :  { %1844 = vmatprep.subr.bf16.mxu0 %v4606_v2  ;;  %v4702_v2 = vld [vmem:[%s6807_s2 + $0x444] ss:$8 sps:$4 sm:$0xff]  }
  0xd3   :  { %1845 = vmatpush1.bf16.msra.mxu0 %v4604_v3  ;;  %v4697_v3 = vld [vmem:[%s6811_s6 + $0x280] ss:$16 sps:$4 sm:$0xff]  }
  0xd4   :  { %1846 = vmatprep.subr.bf16.mxu0 %v4612_v4  ;;  %v4705_v4 = vld [vmem:[%s6811_s6 + $0x2a4] ss:$16 sps:$4 sm:$0xff]  }
  0xd7   :  { %1847 = vmatpush1.bf16.msra.mxu0 %v4610_v5  ;;  %v4700_v5 = vld [vmem:[%s6807_s2 + $0x440] ss:$8 sps:$4 sm:$0xff]  }
  0xd8   :  { %1848 = vmatprep.subr.bf16.mxu0 %v4618_v6  ;;  %v2086_v6 = vsub.s32 2, %v5268_v34 }
  0xdb   :  { %1849 = vmatpush1.bf16.msra.mxu0 %v4616_v7  ;;  %v4708_v7 = vld [vmem:[%s6807_s2 + $0x454] ss:$8 sps:$4 sm:$0xff]  }
  0xdc   :  { %1850 = vmatprep.subr.bf16.mxu0 %v4624_v8  ;;  %v2090_v8 = vsub.s32 3, %v5268_v34  ;;  %v305_v34 = vld [vmem:[%s6815_s3] sm:$0x3] }
  0xdf   :  { %1851 = vmatpush1.bf16.msra.mxu0 %v4622_v9  ;;  %v4703_v9 = vld [vmem:[%s6811_s6 + $0x2a0] ss:$16 sps:$4 sm:$0xff]  }
  0xe0   :  { %1852 = vmatprep.subr.bf16.mxu0 %v4630_v10  ;;  %v4711_v10 = vld [vmem:[%s6811_s6 + $0x2c4] ss:$16 sps:$4 sm:$0xff]  }
  0xe3   :  { %1853 = vmatpush1.bf16.msra.mxu0 %v4628_v11  ;;  %v4706_v11 = vld [vmem:[%s6807_s2 + $0x450] ss:$8 sps:$4 sm:$0xff]  }
  0xe4   :  { %1854 = vmatprep.subr.bf16.mxu0 %v4636_v12  ;;  %v2087_v12 = vrot.slane %v5800_v21, %v2086_v6 }
  0xe7   :  { %1855 = vmatpush1.bf16.msra.mxu0 %v4634_v14  ;;  %v4714_v14 = vld [vmem:[%s6807_s2 + $0x464] ss:$8 sps:$4 sm:$0xff]  }
  0xe8   :  { %1856 = vmatprep.subr.bf16.mxu0 %v4642_v15  ;;  %v2091_v15 = vrot.slane %v5800_v21, %v2090_v8  ;;  %v4720_v21 = vld [vmem:[%s6807_s2 + $0x474] ss:$8 sps:$4 sm:$0xff]  }
  0xeb   :  { %1857 = vmatpush1.bf16.msra.mxu0 %v4640_v13  ;;  %v4709_v13 = vld [vmem:[%s6811_s6 + $0x2c0] ss:$16 sps:$4 sm:$0xff]  }
  0xec   :  { %1858 = vmatprep.subr.bf16.mxu0 %v4648_v16  ;;  %v4717_v16 = vld [vmem:[%s6811_s6 + $0x2e4] ss:$16 sps:$4 sm:$0xff]  }
  0xef   :  { %1859 = vmatpush1.bf16.msra.mxu0 %v4646_v17 }
  0xf0   :  { %1860 = vmatprep.subr.bf16.mxu0 %v4654_v18  ;;  %v4712_v18 = vld [vmem:[%s6807_s2 + $0x460] ss:$8 sps:$4 sm:$0xff]  }
  0xf3   :  { %1861 = vmatpush1.bf16.msra.mxu0 %v4652_v19 }
  0xf4   :  { %1862 = vmatprep.subr.bf16.mxu0 %v4660_v22 }
  0xf6   :  { %v2290_v29 = vpop.f32.mrb[0].mxu1 }
  0xf7   :  { %v2291_v30 = vadd.f32 %v2290_v29, %v2079_v24  ;;  %v2292_v31 = vpop.f32.mrb[1].mxu1  ;;  %1863 = vmatpush1.bf16.msra.mxu0 %v4658_v25  ;;  %v4723_v29 = vld [vmem:[%s6811_s6 + $0x304] ss:$16 sps:$4 sm:$0xff]  }
  0xf8   :  { %v2293_v32 = vadd.f32 %v2292_v31, %v2083_v26  ;;  %v2294_v33 = vpop.f32.mrb[2].mxu1  ;;  %1864 = vmatprep.subr.bf16.mxu0 %v4666_v28  ;;  %v4715_v26 = vld [vmem:[%s6811_s6 + $0x2e0] ss:$16 sps:$4 sm:$0xff]  }
  0xf9   :  { %v2338_v37 = vmul.f32 0.01, %v2291_v30  ;;  %v2295_v38 = vpop.f32.mrb[3].mxu1  ;;  %v4718_v31 = vld [vmem:[%s6807_s2 + $0x470] ss:$8 sps:$4 sm:$0xff]  }
  0xfa   :  { %v2339_v41 = vmul.f32 0.01, %v2293_v32 }
  0xfb   :  { %v2342_v42 = vmax.f32 %v2291_v30, %v2338_v37  ;;  %1865 = vmatpush1.bf16.msra.mxu0 %v4664_v35  ;;  %v4721_v35 = vld [vmem:[%s6811_s6 + $0x300] ss:$16 sps:$4 sm:$0xff]   ;;  %v4729_v37 = vld [vmem:[%s6811_s6 + $0x324] ss:$16 sps:$4 sm:$0xff]  }
  0xfc   :  { %v2343_v43 = vmax.f32 %v2293_v32, %v2339_v41  ;;  %1866 = vmatprep.subr.bf16.mxu0 %v4672_v39  ;;  %v4726_v32 = vld [vmem:[%s6807_s2 + $0x484] ss:$8 sps:$4 sm:$0xff]   ;;  %v4724_v39 = vld [vmem:[%s6807_s2 + $0x480] ss:$8 sps:$4 sm:$0xff]   ;;  %v4732_v41 = vld [vmem:[%s6807_s2 + $0x494] ss:$8 sps:$4 sm:$0xff]  }
  0xfd   :  { %v5846_v50 = vpack.c.bf16 %v2342_v42, %v2342_v42  ;;  %v4727_v42 = vld [vmem:[%s6811_s6 + $0x320] ss:$16 sps:$4 sm:$0xff]  }
  0xfe   :  { %v5841_v48 = vpack.c.bf16 %v2343_v43, %v2343_v43  ;;  %v4735_v43 = vld [vmem:[%s6811_s6 + $0x344] ss:$16 sps:$4 sm:$0xff]  }
  0xff   :  { %1867 = vmatpush1.bf16.msra.mxu0 %v4670_v44  ;;  %v4730_v44 = vld [vmem:[%s6807_s2 + $0x490] ss:$8 sps:$4 sm:$0xff]  }
 0x100   :  { %3172 = vmatprep.mubr.bf16.mxu1 %v5841_v48  ;;  %1877 = vmatprep.subr.bf16.mxu0 %v4678_v47  ;;  %v4733_v47 = vld [vmem:[%s6811_s6 + $0x340] ss:$16 sps:$4 sm:$0xff]  }
 0x101   :  { %3173 = vmatmul.mubr.bf16.vlgmr.msra.gmra.mrb[8].mxu1 %v5846_v50 }
 0x102   :  { %3182 = vmatpush1.bf16.msra.mxu1 %v4673_v49  ;;  %1869 = vmatmul.mubr.bf16.vlgmr.msra.gmra.mrb[0].mxu0 %v365_v51  ;;  %v4741_v49 = vld [vmem:[%s6811_s6 + $0x364] ss:$16 sps:$4 sm:$0xff]   ;;  %v4736_v51 = vld [vmem:[%s6807_s2 + $0x4a0] ss:$8 sps:$4 sm:$0xff]  }
 0x103   :  { %3183 = vmatprep.subr.bf16.mxu1 %v4681_v52  ;;  %1878 = vmatpush1.bf16.msra.mxu0 %v4676_v53  ;;  %v4744_v52 = vld [vmem:[%s6807_s2 + $0x4b4] ss:$8 sps:$4 sm:$0xff]   ;;  %v4739_v53 = vld [vmem:[%s6811_s6 + $0x360] ss:$16 sps:$4 sm:$0xff]  }
 0x104   :  { %1909 = vmatprep.mubr.bf16.mxu0 %v5858_v54  ;;  %1879 = vmatprep.subr.bf16.mxu0 %v4684_v55  ;;  %v4747_v55 = vld [vmem:[%s6811_s6 + $0x384] ss:$16 sps:$4 sm:$0xff]  }
 0x106   :  { %3184 = vmatpush1.bf16.msra.mxu1 %v4679_v56  ;;  %v4742_v56 = vld [vmem:[%s6807_s2 + $0x4b0] ss:$8 sps:$4 sm:$0xff]  }
 0x107   :  { %3185 = vmatprep.subr.bf16.mxu1 %v4687_v57  ;;  %1880 = vmatpush1.bf16.msra.mxu0 %v4682_v58  ;;  %v4750_v57 = vld [vmem:[%s6807_s2 + $0x4c4] ss:$8 sps:$4 sm:$0xff]   ;;  %v4745_v58 = vld [vmem:[%s6811_s6 + $0x380] ss:$16 sps:$4 sm:$0xff]  }
 0x108   :  { %1881 = vmatprep.subr.bf16.mxu0 %v4690_v59  ;;  %v4753_v59 = vld [vmem:[%s6811_s6 + $0x3a4] ss:$16 sps:$4 sm:$0xff]  }
 0x10a   :  { %3186 = vmatpush1.bf16.msra.mxu1 %v4685_v60  ;;  %v4748_v60 = vld [vmem:[%s6807_s2 + $0x4c0] ss:$8 sps:$4 sm:$0xff]  }
 0x10b   :  { %3187 = vmatprep.subr.bf16.mxu1 %v4693_v61  ;;  %1882 = vmatpush1.bf16.msra.mxu0 %v4688_v62  ;;  %v4756_v61 = vld [vmem:[%s6807_s2 + $0x4d4] ss:$8 sps:$4 sm:$0xff]   ;;  %v4751_v62 = vld [vmem:[%s6811_s6 + $0x3a0] ss:$16 sps:$4 sm:$0xff]  }
 0x10c   :  { %1883 = vmatprep.subr.bf16.mxu0 %v4696_v63  ;;  %v4759_v63 = vld [vmem:[%s6811_s6 + $0x3c4] ss:$16 sps:$4 sm:$0xff]  }
 0x10e   :  { %3188 = vmatpush1.bf16.msra.mxu1 %v4691_v0  ;;  %v4754_v0 = vld [vmem:[%s6807_s2 + $0x4d0] ss:$8 sps:$4 sm:$0xff]  }
 0x10f   :  { %3189 = vmatprep.subr.bf16.mxu1 %v4699_v45  ;;  %1884 = vmatpush1.bf16.msra.mxu0 %v4694_v1  ;;  %v4762_v45 = vld [vmem:[%s6807_s2 + $0x4e4] ss:$8 sps:$4 sm:$0xff]   ;;  %v4757_v1 = vld [vmem:[%s6811_s6 + $0x3c0] ss:$16 sps:$4 sm:$0xff]  }
 0x110   :  { %1885 = vmatprep.subr.bf16.mxu0 %v4702_v2 }
 0x112   :  { %3190 = vmatpush1.bf16.msra.mxu1 %v4697_v3  ;;  %v4765_v3 = vld [vmem:[%s6811_s6 + $0x3e4] ss:$16 sps:$4 sm:$0xff]  }
 0x113   :  { %3191 = vmatprep.subr.bf16.mxu1 %v4705_v4  ;;  %1886 = vmatpush1.bf16.msra.mxu0 %v4700_v5  ;;  %v4760_v4 = vld [vmem:[%s6807_s2 + $0x4e0] ss:$8 sps:$4 sm:$0xff]   ;;  %v4768_v5 = vld [vmem:[%s6807_s2 + $0x4f4] ss:$8 sps:$4 sm:$0xff]  }
 0x114   :  { %1887 = vmatprep.subr.bf16.mxu0 %v4708_v7  ;;  %v4763_v7 = vld [vmem:[%s6811_s6 + $0x3e0] ss:$16 sps:$4 sm:$0xff]  }
 0x116   :  { %3192 = vmatpush1.bf16.msra.mxu1 %v4703_v9  ;;  %v2331_v17 = vpop.f32.mrb[4].mxu1 }
 0x117   :  { %3193 = vmatprep.subr.bf16.mxu1 %v4711_v10  ;;  %1888 = vmatpush1.bf16.msra.mxu0 %v4706_v11  ;;  %v5942_v19 = vadd.f32 %v2331_v17, %v2087_v12  ;;  %v2333_v22 = vpop.f32.mrb[5].mxu1  ;;  %v4771_v10 = vld [vmem:[%s6811_s6 + $0xc] ss:$16 sps:$4 sm:$0xff]   ;;  %v4766_v11 = vld [vmem:[%s6807_s2 + $0x4f0] ss:$8 sps:$4 sm:$0xff]  }
 0x118   :  { %1889 = vmatprep.subr.bf16.mxu0 %v4714_v14  ;;  %v2334_v24 = vadd.f32 %v2333_v22, %v2091_v15  ;;  %v2335_v25 = vpop.f32.mrb[6].mxu1  ;;  %v4774_v12 = vld [vmem:[%s6807_s2 + $0x504] ss:$8 sps:$4 sm:$0xff]   ;;  %v4769_v14 = vld [vmem:[%s6811_s6 + $0x8] ss:$16 sps:$4 sm:$0xff]  }
 0x119   :  { %v2336_v28 = vpop.f32.mrb[7].mxu1  ;;  %v2340_v2 = vmul.f32 0.01, %v5942_v19  ;;  %v4772_v17 = vld [vmem:[%s6807_s2 + $0x500] ss:$8 sps:$4 sm:$0xff]  }
 0x11a   :  { %3194 = vmatpush1.bf16.msra.mxu1 %v4709_v13  ;;  %v2341_v30 = vmul.f32 0.01, %v2334_v24  ;;  %v6067_v13 = vrot.slane %v5828_v36, %v5285_v40  ;;  %v4780_v36 = vld [vmem:[%s6807_s2 + $0x514] ss:$8 sps:$4 sm:$0xff]   ;;  %v4778_v22 = vld [vmem:[%s6807_s2 + $0x510] ss:$8 sps:$4 sm:$0xff]  }
 0x11b   :  { %3195 = vmatprep.subr.bf16.mxu1 %v4717_v16  ;;  %1890 = vmatpush1.bf16.msra.mxu0 %v4712_v18  ;;  %v2344_v9 = vmax.f32 %v5942_v19, %v2340_v2  ;;  %v4777_v16 = vld [vmem:[%s6811_s6 + $0x2c] ss:$16 sps:$4 sm:$0xff]   ;;  %v415_v18 = vcombine.high %v5858_v54, %v5858_v54  ;;  %v4775_v19 = vld [vmem:[%s6811_s6 + $0x28] ss:$16 sps:$4 sm:$0xff]  }
 0x11c   :  { %1891 = vmatprep.subr.bf16.mxu0 %v4720_v21  ;;  %v2345_v33 = vmax.f32 %v2334_v24, %v2341_v30  ;;  %v4783_v54 = vld [vmem:[%s6811_s6 + $0x4c] ss:$16 sps:$4 sm:$0xff]   ;;  %v4781_v21 = vld [vmem:[%s6811_s6 + $0x48] ss:$16 sps:$4 sm:$0xff]  }
 0x11d   :  { %v6063_v15 = vpack.c.bf16 %v2344_v9, %v2344_v9  ;;  %v4789_v24 = vld [vmem:[%s6811_s6 + $0x6c] ss:$16 sps:$4 sm:$0xff]   ;;  %v4784_v25 = vld [vmem:[%s6807_s2 + $0x520] ss:$8 sps:$4 sm:$0xff]   ;;  %v4790_v30 = vld [vmem:[%s6807_s2 + $0x530] ss:$8 sps:$4 sm:$0xff]  }
 0x11e   :  { %3196 = vmatpush1.bf16.msra.mxu1 %v4715_v26  ;;  %v5965_v38 = vpack.c.bf16 %v2345_v33, %v2345_v33  ;;  %v4792_v26 = vld [vmem:[%s6807_s2 + $0x534] ss:$8 sps:$4 sm:$0xff]   ;;  %v4787_v28 = vld [vmem:[%s6811_s6 + $0x68] ss:$16 sps:$4 sm:$0xff]   ;;  %v4846_v9 = vld [vmem:[%s6807_s2 + $0x5c4] ss:$8 sps:$4 sm:$0xff]  }
 0x11f   :  { %3197 = vmatprep.subr.bf16.mxu1 %v4723_v29  ;;  %1892 = vmatpush1.bf16.msra.mxu0 %v4718_v31  ;;  %v4795_v29 = vld [vmem:[%s6811_s6 + $0x8c] ss:$16 sps:$4 sm:$0xff]   ;;  %v4835_v2 = vld [vmem:[%s6811_s6 + $0x168] ss:$16 sps:$4 sm:$0xff]  }
 0x120   :  { %1893 = vmatprep.subr.bf16.mxu0 %v4726_v32  ;;  %3213 = vmatprep.mubr.bf16.mxu1 %v5965_v38  ;;  %v4798_v31 = vld [vmem:[%s6807_s2 + $0x544] ss:$8 sps:$4 sm:$0xff]   ;;  %v4793_v32 = vld [vmem:[%s6811_s6 + $0x88] ss:$16 sps:$4 sm:$0xff]  }
 0x121   :  { %v4801_v33 = vld [vmem:[%s6811_s6 + $0xac] ss:$16 sps:$4 sm:$0xff]  }
 0x122   :  { %3198 = vmatpush1.bf16.msra.mxu1 %v4721_v35  ;;  %v4796_v35 = vld [vmem:[%s6807_s2 + $0x540] ss:$8 sps:$4 sm:$0xff]  }
 0x123   :  { %3199 = vmatprep.subr.bf16.mxu1 %v4729_v37  ;;  %1894 = vmatpush1.bf16.msra.mxu0 %v4724_v39  ;;  %v4804_v37 = vld [vmem:[%s6807_s2 + $0x554] ss:$8 sps:$4 sm:$0xff]   ;;  %v4799_v39 = vld [vmem:[%s6811_s6 + $0xa8] ss:$16 sps:$4 sm:$0xff]  }
 0x124   :  { %1895 = vmatprep.subr.bf16.mxu0 %v4732_v41  ;;  %v4807_v41 = vld [vmem:[%s6811_s6 + $0xcc] ss:$16 sps:$4 sm:$0xff]  }
 0x126   :  { %3200 = vmatpush1.bf16.msra.mxu1 %v4727_v42  ;;  %v4802_v42 = vld [vmem:[%s6807_s2 + $0x550] ss:$8 sps:$4 sm:$0xff]  }
 0x127   :  { %3201 = vmatprep.subr.bf16.mxu1 %v4735_v43  ;;  %1896 = vmatpush1.bf16.msra.mxu0 %v4730_v44  ;;  %v4810_v43 = vld [vmem:[%s6807_s2 + $0x564] ss:$8 sps:$4 sm:$0xff]   ;;  %v4805_v44 = vld [vmem:[%s6811_s6 + $0xc8] ss:$16 sps:$4 sm:$0xff]  }
 0x128   :  { %1897 = vmatprep.subr.bf16.mxu0 %v4738_v46  ;;  %v4813_v46 = vld [vmem:[%s6811_s6 + $0xec] ss:$16 sps:$4 sm:$0xff]  }
 0x12a   :  { %3202 = vmatpush1.bf16.msra.mxu1 %v4733_v47  ;;  %v4808_v47 = vld [vmem:[%s6807_s2 + $0x560] ss:$8 sps:$4 sm:$0xff]  }
 0x12b   :  { %3203 = vmatprep.subr.bf16.mxu1 %v4741_v49  ;;  %1898 = vmatpush1.bf16.msra.mxu0 %v4736_v51  ;;  %v4816_v49 = vld [vmem:[%s6807_s2 + $0x574] ss:$8 sps:$4 sm:$0xff]   ;;  %v4811_v51 = vld [vmem:[%s6811_s6 + $0xe8] ss:$16 sps:$4 sm:$0xff]  }
 0x12c   :  { %1899 = vmatprep.subr.bf16.mxu0 %v4744_v52  ;;  %v4819_v52 = vld [vmem:[%s6811_s6 + $0x10c] ss:$16 sps:$4 sm:$0xff]  }
 0x12e   :  { %3204 = vmatpush1.bf16.msra.mxu1 %v4739_v53  ;;  %v4814_v53 = vld [vmem:[%s6807_s2 + $0x570] ss:$8 sps:$4 sm:$0xff]  }
 0x12f   :  { %3205 = vmatprep.subr.bf16.mxu1 %v4747_v55  ;;  %1900 = vmatpush1.bf16.msra.mxu0 %v4742_v56  ;;  %v4817_v55 = vld [vmem:[%s6811_s6 + $0x108] ss:$16 sps:$4 sm:$0xff]   ;;  %v4822_v56 = vld [vmem:[%s6807_s2 + $0x584] ss:$8 sps:$4 sm:$0xff]  }
 0x130   :  { %1901 = vmatprep.subr.bf16.mxu0 %v4750_v57  ;;  %v4825_v57 = vld [vmem:[%s6811_s6 + $0x12c] ss:$16 sps:$4 sm:$0xff]  }
 0x132   :  { %3206 = vmatpush1.bf16.msra.mxu1 %v4745_v58  ;;  %v4820_v58 = vld [vmem:[%s6807_s2 + $0x580] ss:$8 sps:$4 sm:$0xff]  }
 0x133   :  { %3207 = vmatprep.subr.bf16.mxu1 %v4753_v59  ;;  %1902 = vmatpush1.bf16.msra.mxu0 %v4748_v60  ;;  %v4823_v59 = vld [vmem:[%s6811_s6 + $0x128] ss:$16 sps:$4 sm:$0xff]   ;;  %v4828_v60 = vld [vmem:[%s6807_s2 + $0x594] ss:$8 sps:$4 sm:$0xff]  }
 0x134   :  { %1903 = vmatprep.subr.bf16.mxu0 %v4756_v61  ;;  %v4831_v61 = vld [vmem:[%s6811_s6 + $0x14c] ss:$16 sps:$4 sm:$0xff]  }
 0x136   :  { %3208 = vmatpush1.bf16.msra.mxu1 %v4751_v62  ;;  %v4826_v62 = vld [vmem:[%s6807_s2 + $0x590] ss:$8 sps:$4 sm:$0xff]  }
 0x137   :  { %3209 = vmatprep.subr.bf16.mxu1 %v4759_v63  ;;  %1904 = vmatpush1.bf16.msra.mxu0 %v4754_v0  ;;  %v4829_v63 = vld [vmem:[%s6811_s6 + $0x148] ss:$16 sps:$4 sm:$0xff]   ;;  %v4834_v0 = vld [vmem:[%s6807_s2 + $0x5a4] ss:$8 sps:$4 sm:$0xff]  }
 0x138   :  { %1905 = vmatprep.subr.bf16.mxu0 %v4762_v45  ;;  %v4837_v45 = vld [vmem:[%s6811_s6 + $0x16c] ss:$16 sps:$4 sm:$0xff]  }
 0x13a   :  { %3210 = vmatpush1.bf16.msra.mxu1 %v4757_v1  ;;  %v4832_v1 = vld [vmem:[%s6807_s2 + $0x5a0] ss:$8 sps:$4 sm:$0xff]  }
 0x13b   :  { %3211 = vmatprep.subr.bf16.mxu1 %v4765_v3  ;;  %1906 = vmatpush1.bf16.msra.mxu0 %v4760_v4  ;;  %v4840_v3 = vld [vmem:[%s6807_s2 + $0x5b4] ss:$8 sps:$4 sm:$0xff]  }
 0x13c   :  { %1907 = vmatprep.subr.bf16.mxu0 %v4768_v5  ;;  %v4843_v4 = vld [vmem:[%s6811_s6 + $0x18c] ss:$16 sps:$4 sm:$0xff]   ;;  %v4838_v5 = vld [vmem:[%s6807_s2 + $0x5b0] ss:$8 sps:$4 sm:$0xff]  }
 0x13e   :  { %3212 = vmatpush1.bf16.msra.mxu1 %v4763_v7  ;;  %v4841_v7 = vld [vmem:[%s6811_s6 + $0x188] ss:$16 sps:$4 sm:$0xff]  }
 0x13f   :  { %3222 = vmatprep.subr.bf16.mxu1 %v4771_v10  ;;  %1908 = vmatpush1.bf16.msra.mxu0 %v4766_v11  ;;  %v4849_v10 = vld [vmem:[%s6811_s6 + $0x1ac] ss:$16 sps:$4 sm:$0xff]   ;;  %v4844_v11 = vld [vmem:[%s6807_s2 + $0x5c0] ss:$8 sps:$4 sm:$0xff]  }
 0x140   :  { %1918 = vmatprep.subr.bf16.mxu0 %v4774_v12  ;;  %v4847_v12 = vld [vmem:[%s6811_s6 + $0x1a8] ss:$16 sps:$4 sm:$0xff]  }
 0x141   :  { %3214 = vmatmul.mubr.bf16.vlgmr.msra.gmra.mrb[8].mxu1 %v6063_v15 }
 0x142   :  { %3223 = vmatpush1.bf16.msra.mxu1 %v4769_v14  ;;  %3254 = vmatprep.mubr.bf16.mxu1 %v5841_v48  ;;  %v4786_v48 = vld [vmem:[%s6807_s2 + $0x524] ss:$8 sps:$4 sm:$0xff]   ;;  %v4852_v14 = vld [vmem:[%s6807_s2 + $0x5d4] ss:$8 sps:$4 sm:$0xff]  }
 0x143   :  { %1910 = vmatmul.mubr.bf16.vlgmr.msra.gmra.mrb[0].mxu0 %v6067_v13  ;;  %3224 = vmatprep.subr.bf16.mxu1 %v4777_v16  ;;  %v4855_v16 = vld [vmem:[%s6811_s6 + $0x1cc] ss:$16 sps:$4 sm:$0xff]  }
 0x144   :  { %1919 = vmatpush1.bf16.msra.mxu0 %v4772_v17  ;;  %1950 = vmatprep.mubr.bf16.mxu0 %v415_v18  ;;  %v368_v17 = vcombine.high %v5818_v27, %v5818_v27  ;;  %v4850_v18 = vld [vmem:[%s6807_s2 + $0x5d0] ss:$8 sps:$4 sm:$0xff]   ;;  %v4856_v27 = vld [vmem:[%s6807_s2 + $0x5e0] ss:$8 sps:$4 sm:$0xff]  }
 0x145   :  { %1920 = vmatprep.subr.bf16.mxu0 %v4780_v36  ;;  %v4853_v36 = vld [vmem:[%s6811_s6 + $0x1c8] ss:$16 sps:$4 sm:$0xff]  }
 0x146   :  { %3225 = vmatpush1.bf16.msra.mxu1 %v4775_v19  ;;  %v4858_v19 = vld [vmem:[%s6807_s2 + $0x5e4] ss:$8 sps:$4 sm:$0xff]  }
 0x147   :  { %3226 = vmatprep.subr.bf16.mxu1 %v4783_v54  ;;  %v4861_v54 = vld [vmem:[%s6811_s6 + $0x1ec] ss:$16 sps:$4 sm:$0xff]  }
 0x148   :  { %1921 = vmatpush1.bf16.msra.mxu0 %v4778_v22  ;;  %v4859_v22 = vld [vmem:[%s6811_s6 + $0x1e8] ss:$16 sps:$4 sm:$0xff]  }
 0x149   :  { %1922 = vmatprep.subr.bf16.mxu0 %v4786_v48  ;;  %v4864_v48 = vld [vmem:[%s6807_s2 + $0x5f4] ss:$8 sps:$4 sm:$0xff]  }
 0x14a   :  { %3227 = vmatpush1.bf16.msra.mxu1 %v4781_v21  ;;  %v6257_v21 = vrot.slane %v368_v17, %v5285_v40  ;;  %v4928_v17 = vld [vmem:[%s6807_s2 + $0x6a0] ss:$8 sps:$4 sm:$0xff]  }
 0x14b   :  { %3228 = vmatprep.subr.bf16.mxu1 %v4789_v24  ;;  %v4867_v24 = vld [vmem:[%s6811_s6 + $0x20c] ss:$16 sps:$4 sm:$0xff]  }
 0x14c   :  { %1923 = vmatpush1.bf16.msra.mxu0 %v4784_v25  ;;  %v4862_v25 = vld [vmem:[%s6807_s2 + $0x5f0] ss:$8 sps:$4 sm:$0xff]  }
 0x14d   :  { %1924 = vmatprep.subr.bf16.mxu0 %v4792_v26  ;;  %v384_v26 = vcombine.high %v6257_v21, %v6257_v21 }
 0x14e   :  { %3229 = vmatpush1.bf16.msra.mxu1 %v4787_v28  ;;  %v4870_v28 = vld [vmem:[%s6807_s2 + $0x604] ss:$8 sps:$4 sm:$0xff]  }
 0x14f   :  { %3230 = vmatprep.subr.bf16.mxu1 %v4795_v29  ;;  %v4865_v29 = vld [vmem:[%s6811_s6 + $0x208] ss:$16 sps:$4 sm:$0xff]  }
 0x150   :  { %1925 = vmatpush1.bf16.msra.mxu0 %v4790_v30  ;;  %v413_v30 = vcombine.high %v6067_v13, %v6067_v13  ;;  %v4871_v13 = vld [vmem:[%s6811_s6 + $0x228] ss:$16 sps:$4 sm:$0xff]  }
 0x151   :  { %1926 = vmatprep.subr.bf16.mxu0 %v4798_v31  ;;  %v4873_v31 = vld [vmem:[%s6811_s6 + $0x22c] ss:$16 sps:$4 sm:$0xff]  }
 0x152   :  { %3231 = vmatpush1.bf16.msra.mxu1 %v4793_v32  ;;  %v4868_v32 = vld [vmem:[%s6807_s2 + $0x600] ss:$8 sps:$4 sm:$0xff]  }
 0x153   :  { %3232 = vmatprep.subr.bf16.mxu1 %v4801_v33  ;;  %v6282_v33 = vrot.slane %v384_v26, %v5285_v40  ;;  %v4943_v26 = vld [vmem:[%s6811_s6 + $0x3a8] ss:$16 sps:$4 sm:$0xff]  }
 0x154   :  { %1927 = vmatpush1.bf16.msra.mxu0 %v4796_v35  ;;  %v4876_v35 = vld [vmem:[%s6807_s2 + $0x614] ss:$8 sps:$4 sm:$0xff]  }
 0x155   :  { %1928 = vmatprep.subr.bf16.mxu0 %v4804_v37  ;;  %v4879_v37 = vld [vmem:[%s6811_s6 + $0x24c] ss:$16 sps:$4 sm:$0xff]  }
 0x156   :  { %3233 = vmatpush1.bf16.msra.mxu1 %v4799_v39  ;;  %v4877_v39 = vld [vmem:[%s6811_s6 + $0x248] ss:$16 sps:$4 sm:$0xff]  }
 0x157   :  { %3234 = vmatprep.subr.bf16.mxu1 %v4807_v41  ;;  %v4885_v41 = vld [vmem:[%s6811_s6 + $0x26c] ss:$16 sps:$4 sm:$0xff]  }
 0x158   :  { %1929 = vmatpush1.bf16.msra.mxu0 %v4802_v42  ;;  %v4880_v42 = vld [vmem:[%s6807_s2 + $0x620] ss:$8 sps:$4 sm:$0xff]  }
 0x159   :  { %1930 = vmatprep.subr.bf16.mxu0 %v4810_v43  ;;  %v4888_v43 = vld [vmem:[%s6807_s2 + $0x634] ss:$8 sps:$4 sm:$0xff]  }
 0x15a   :  { %3235 = vmatpush1.bf16.msra.mxu1 %v4805_v44  ;;  %v4883_v44 = vld [vmem:[%s6811_s6 + $0x268] ss:$16 sps:$4 sm:$0xff]  }
 0x15b   :  { %3236 = vmatprep.subr.bf16.mxu1 %v4813_v46  ;;  %v4891_v46 = vld [vmem:[%s6811_s6 + $0x28c] ss:$16 sps:$4 sm:$0xff]  }
 0x15c   :  { %1931 = vmatpush1.bf16.msra.mxu0 %v4808_v47  ;;  %v4886_v47 = vld [vmem:[%s6807_s2 + $0x630] ss:$8 sps:$4 sm:$0xff]  }
 0x15d   :  { %1932 = vmatprep.subr.bf16.mxu0 %v4816_v49  ;;  %v4894_v49 = vld [vmem:[%s6807_s2 + $0x644] ss:$8 sps:$4 sm:$0xff]  }
 0x15e   :  { %3237 = vmatpush1.bf16.msra.mxu1 %v4811_v51  ;;  %v4889_v51 = vld [vmem:[%s6811_s6 + $0x288] ss:$16 sps:$4 sm:$0xff]  }
 0x15f   :  { %3238 = vmatprep.subr.bf16.mxu1 %v4819_v52  ;;  %v4897_v52 = vld [vmem:[%s6811_s6 + $0x2ac] ss:$16 sps:$4 sm:$0xff]  }
 0x160   :  { %1933 = vmatpush1.bf16.msra.mxu0 %v4814_v53  ;;  %v4892_v53 = vld [vmem:[%s6807_s2 + $0x640] ss:$8 sps:$4 sm:$0xff]  }
 0x161   :  { %1934 = vmatprep.subr.bf16.mxu0 %v4822_v56  ;;  %v4895_v56 = vld [vmem:[%s6811_s6 + $0x2a8] ss:$16 sps:$4 sm:$0xff]  }
 0x162   :  { %3239 = vmatpush1.bf16.msra.mxu1 %v4817_v55  ;;  %v4900_v55 = vld [vmem:[%s6807_s2 + $0x654] ss:$8 sps:$4 sm:$0xff]  }
 0x163   :  { %3240 = vmatprep.subr.bf16.mxu1 %v4825_v57  ;;  %v4903_v57 = vld [vmem:[%s6811_s6 + $0x2cc] ss:$16 sps:$4 sm:$0xff]  }
 0x164   :  { %1935 = vmatpush1.bf16.msra.mxu0 %v4820_v58  ;;  %v4898_v58 = vld [vmem:[%s6807_s2 + $0x650] ss:$8 sps:$4 sm:$0xff]  }
 0x165   :  { %1936 = vmatprep.subr.bf16.mxu0 %v4828_v60  ;;  %v4901_v60 = vld [vmem:[%s6811_s6 + $0x2c8] ss:$16 sps:$4 sm:$0xff]  }
 0x166   :  { %3241 = vmatpush1.bf16.msra.mxu1 %v4823_v59  ;;  %v4906_v59 = vld [vmem:[%s6807_s2 + $0x664] ss:$8 sps:$4 sm:$0xff]  }
 0x167   :  { %3242 = vmatprep.subr.bf16.mxu1 %v4831_v61  ;;  %v4909_v61 = vld [vmem:[%s6811_s6 + $0x2ec] ss:$16 sps:$4 sm:$0xff]  }
 0x168   :  { %1937 = vmatpush1.bf16.msra.mxu0 %v4826_v62  ;;  %v4904_v62 = vld [vmem:[%s6807_s2 + $0x660] ss:$8 sps:$4 sm:$0xff]  }
 0x169   :  { %1938 = vmatprep.subr.bf16.mxu0 %v4834_v0  ;;  %v4907_v0 = vld [vmem:[%s6811_s6 + $0x2e8] ss:$16 sps:$4 sm:$0xff]  }
 0x16a   :  { %3243 = vmatpush1.bf16.msra.mxu1 %v4829_v63  ;;  %v4912_v63 = vld [vmem:[%s6807_s2 + $0x674] ss:$8 sps:$4 sm:$0xff]  }
 0x16b   :  { %3244 = vmatprep.subr.bf16.mxu1 %v4837_v45  ;;  %v4915_v45 = vld [vmem:[%s6811_s6 + $0x30c] ss:$16 sps:$4 sm:$0xff]  }
 0x16c   :  { %1939 = vmatpush1.bf16.msra.mxu0 %v4832_v1  ;;  %v4910_v1 = vld [vmem:[%s6807_s2 + $0x670] ss:$8 sps:$4 sm:$0xff]  }
 0x16d   :  { %1940 = vmatprep.subr.bf16.mxu0 %v4840_v3  ;;  %v4913_v3 = vld [vmem:[%s6811_s6 + $0x308] ss:$16 sps:$4 sm:$0xff]  }
 0x16e   :  { %3245 = vmatpush1.bf16.msra.mxu1 %v4835_v2  ;;  %v4918_v2 = vld [vmem:[%s6807_s2 + $0x684] ss:$8 sps:$4 sm:$0xff]  }
 0x16f   :  { %3246 = vmatprep.subr.bf16.mxu1 %v4843_v4  ;;  %v4921_v4 = vld [vmem:[%s6811_s6 + $0x32c] ss:$16 sps:$4 sm:$0xff]  }
 0x170   :  { %1941 = vmatpush1.bf16.msra.mxu0 %v4838_v5  ;;  %v4916_v5 = vld [vmem:[%s6807_s2 + $0x680] ss:$8 sps:$4 sm:$0xff]  }
 0x171   :  { %1942 = vmatprep.subr.bf16.mxu0 %v4846_v9  ;;  %v4919_v9 = vld [vmem:[%s6811_s6 + $0x328] ss:$16 sps:$4 sm:$0xff]  }
 0x172   :  { %3247 = vmatpush1.bf16.msra.mxu1 %v4841_v7  ;;  %v4924_v7 = vld [vmem:[%s6807_s2 + $0x694] ss:$8 sps:$4 sm:$0xff]  }
 0x173   :  { %3248 = vmatprep.subr.bf16.mxu1 %v4849_v10  ;;  %v4927_v10 = vld [vmem:[%s6811_s6 + $0x34c] ss:$16 sps:$4 sm:$0xff]  }
 0x174   :  { %1943 = vmatpush1.bf16.msra.mxu0 %v4844_v11  ;;  %v4922_v11 = vld [vmem:[%s6807_s2 + $0x690] ss:$8 sps:$4 sm:$0xff]  }
 0x175   :  { %1944 = vmatprep.subr.bf16.mxu0 %v4852_v14  ;;  %v4925_v14 = vld [vmem:[%s6811_s6 + $0x348] ss:$16 sps:$4 sm:$0xff]  }
 0x176   :  { %3249 = vmatpush1.bf16.msra.mxu1 %v4847_v12  ;;  %v4930_v12 = vld [vmem:[%s6807_s2 + $0x6a4] ss:$8 sps:$4 sm:$0xff]  }
 0x177   :  { %3250 = vmatprep.subr.bf16.mxu1 %v4855_v16  ;;  %v4933_v16 = vld [vmem:[%s6811_s6 + $0x36c] ss:$16 sps:$4 sm:$0xff]  }
 0x178   :  { %1945 = vmatpush1.bf16.msra.mxu0 %v4850_v18  ;;  %v4936_v18 = vld [vmem:[%s6807_s2 + $0x6b4] ss:$8 sps:$4 sm:$0xff]  }
 0x179   :  { %1946 = vmatprep.subr.bf16.mxu0 %v4858_v19  ;;  %v4939_v19 = vld [vmem:[%s6811_s6 + $0x38c] ss:$16 sps:$4 sm:$0xff]  }
 0x17a   :  { %3251 = vmatpush1.bf16.msra.mxu1 %v4853_v36  ;;  %v4931_v36 = vld [vmem:[%s6811_s6 + $0x368] ss:$16 sps:$4 sm:$0xff]  }
 0x17b   :  { %3252 = vmatprep.subr.bf16.mxu1 %v4861_v54  ;;  %v4934_v54 = vld [vmem:[%s6807_s2 + $0x6b0] ss:$8 sps:$4 sm:$0xff]  }
 0x17c   :  { %1947 = vmatpush1.bf16.msra.mxu0 %v4856_v27  ;;  %v4942_v27 = vld [vmem:[%s6807_s2 + $0x6c4] ss:$8 sps:$4 sm:$0xff]  }
 0x17d   :  { %1948 = vmatprep.subr.bf16.mxu0 %v4864_v48  ;;  %v4945_v48 = vld [vmem:[%s6811_s6 + $0x3ac] ss:$16 sps:$4 sm:$0xff]  }
 0x17e   :  { %3253 = vmatpush1.bf16.msra.mxu1 %v4859_v22  ;;  %v4937_v22 = vld [vmem:[%s6811_s6 + $0x388] ss:$16 sps:$4 sm:$0xff]  }
 0x17f   :  { %3263 = vmatprep.subr.bf16.mxu1 %v4867_v24  ;;  %v4940_v24 = vld [vmem:[%s6807_s2 + $0x6c0] ss:$8 sps:$4 sm:$0xff]  }
 0x180   :  { %1949 = vmatpush1.bf16.msra.mxu0 %v4862_v25  ;;  %v4948_v25 = vld [vmem:[%s6807_s2 + $0x6d4] ss:$8 sps:$4 sm:$0xff]  }
 0x181   :  { %3255 = vmatmul.mubr.bf16.vlgmr.msra.gmra.mrb[12].mxu1 %v5846_v50  ;;  %1959 = vmatprep.subr.bf16.mxu0 %v4870_v28  ;;  %v4874_v50 = vld [vmem:[%s6807_s2 + $0x610] ss:$8 sps:$4 sm:$0xff]   ;;  %v4951_v28 = vld [vmem:[%s6811_s6 + $0x3cc] ss:$16 sps:$4 sm:$0xff]  }
 0x182   :  { %3264 = vmatpush1.bf16.msra.mxu1 %v4865_v29  ;;  %3295 = vmatprep.mubr.bf16.mxu1 %v5965_v38  ;;  %v4882_v38 = vld [vmem:[%s6807_s2 + $0x624] ss:$8 sps:$4 sm:$0xff]   ;;  %v4946_v29 = vld [vmem:[%s6807_s2 + $0x6d0] ss:$8 sps:$4 sm:$0xff]  }
 0x183   :  { %1951 = vmatmul.mubr.bf16.vlgmr.msra.gmra.mrb[0].mxu0 %v413_v30  ;;  %3265 = vmatprep.subr.bf16.mxu1 %v4873_v31  ;;  %v4954_v30 = vld [vmem:[%s6807_s2 + $0x6e4] ss:$8 sps:$4 sm:$0xff]   ;;  %v4949_v31 = vld [vmem:[%s6811_s6 + $0x3c8] ss:$16 sps:$4 sm:$0xff]  }
 0x184   :  { %1960 = vmatpush1.bf16.msra.mxu0 %v4868_v32  ;;  %1991 = vmatprep.mubr.bf16.mxu0 %v6282_v33  ;;  %v4957_v32 = vld [vmem:[%s6811_s6 + $0x3ec] ss:$16 sps:$4 sm:$0xff]  }
 0x185   :  { %1961 = vmatprep.subr.bf16.mxu0 %v4876_v35  ;;  %v4952_v35 = vld [vmem:[%s6807_s2 + $0x6e0] ss:$8 sps:$4 sm:$0xff]  }
 0x186   :  { %3266 = vmatpush1.bf16.msra.mxu1 %v4871_v13  ;;  %v4960_v13 = vld [vmem:[%s6807_s2 + $0x6f4] ss:$8 sps:$4 sm:$0xff]  }
 0x187   :  { %3267 = vmatprep.subr.bf16.mxu1 %v4879_v37  ;;  %v4955_v37 = vld [vmem:[%s6811_s6 + $0x3e8] ss:$16 sps:$4 sm:$0xff]  }
 0x188   :  { %1962 = vmatpush1.bf16.msra.mxu0 %v4874_v50  ;;  %v4984_v50 = vld [vmem:[%s6813_s8 + $0x4] ss:$8 sps:$4 sm:$0xff]  }
 0x189   :  { %1963 = vmatprep.subr.bf16.mxu0 %v4882_v38  ;;  %v4958_v38 = vld [vmem:[%s6807_s2 + $0x6f0] ss:$8 sps:$4 sm:$0xff]  }
 0x18a   :  { %3268 = vmatpush1.bf16.msra.mxu1 %v4877_v39  ;;  %v4963_v39 = vld [vmem:[%s6807_s2 + $0x704] ss:$8 sps:$4 sm:$0xff]  }
 0x18b   :  { %3269 = vmatprep.subr.bf16.mxu1 %v4885_v41  ;;  %v4982_v41 = vld [vmem:[%s6813_s8] ss:$8 sps:$4 sm:$0xff]  }
 0x18c   :  { %1964 = vmatpush1.bf16.msra.mxu0 %v4880_v42  ;;  %v6475_v42 = vrot.slane %v6257_v21, %v5285_v40  ;;  %v4966_v40 = vld [vmem:[%s6807_s2 + $0x714] ss:$8 sps:$4 sm:$0xff]   ;;  %v4988_v21 = vld [vmem:[%s6813_s8 + $0x10] ss:$8 sps:$4 sm:$0xff]  }
 0x18d   :  { %1965 = vmatprep.subr.bf16.mxu0 %v4888_v43  ;;  %v4990_v43 = vld [vmem:[%s6813_s8 + $0x14] ss:$8 sps:$4 sm:$0xff]  }
 0x18e   :  { %3270 = vmatpush1.bf16.msra.mxu1 %v4883_v44  ;;  %v4961_v44 = vld [vmem:[%s6807_s2 + $0x700] ss:$8 sps:$4 sm:$0xff]  }
 0x18f   :  { %3271 = vmatprep.subr.bf16.mxu1 %v4891_v46  ;;  %v416_v46 = vcombine.high %v6282_v33, %v6282_v33  ;;  %v4969_v33 = vld [vmem:[%s6807_s2 + $0x724] ss:$8 sps:$4 sm:$0xff]  }
 0x190   :  { %1966 = vmatpush1.bf16.msra.mxu0 %v4886_v47  ;;  %v4996_v47 = vld [vmem:[%s6813_s8 + $0x24] ss:$8 sps:$4 sm:$0xff]  }
 0x191   :  { %1967 = vmatprep.subr.bf16.mxu0 %v4894_v49  ;;  %v4994_v49 = vld [vmem:[%s6813_s8 + $0x20] ss:$8 sps:$4 sm:$0xff]  }
 0x192   :  { %3272 = vmatpush1.bf16.msra.mxu1 %v4889_v51  ;;  %v5002_v51 = vld [vmem:[%s6813_s8 + $0x34] ss:$8 sps:$4 sm:$0xff]  }
 0x193   :  { %3273 = vmatprep.subr.bf16.mxu1 %v4897_v52  ;;  %v4967_v52 = vld [vmem:[%s6807_s2 + $0x720] ss:$8 sps:$4 sm:$0xff]  }
 0x194   :  { %1968 = vmatpush1.bf16.msra.mxu0 %v4892_v53  ;;  %v4972_v53 = vld [vmem:[%s6807_s2 + $0x734] ss:$8 sps:$4 sm:$0xff]  }
 0x195   :  { %1969 = vmatprep.subr.bf16.mxu0 %v4900_v55  ;;  %v5000_v55 = vld [vmem:[%s6813_s8 + $0x30] ss:$8 sps:$4 sm:$0xff]  }
 0x196   :  { %3274 = vmatpush1.bf16.msra.mxu1 %v4895_v56  ;;  %v5008_v56 = vld [vmem:[%s6813_s8 + $0x44] ss:$8 sps:$4 sm:$0xff]  }
 0x197   :  { %3275 = vmatprep.subr.bf16.mxu1 %v4903_v57  ;;  %v4970_v57 = vld [vmem:[%s6807_s2 + $0x730] ss:$8 sps:$4 sm:$0xff]  }
 0x198   :  { %1970 = vmatpush1.bf16.msra.mxu0 %v4898_v58  ;;  %v4975_v58 = vld [vmem:[%s6807_s2 + $0x744] ss:$8 sps:$4 sm:$0xff]  }
 0x199   :  { %1971 = vmatprep.subr.bf16.mxu0 %v4906_v59  ;;  %v5006_v59 = vld [vmem:[%s6813_s8 + $0x40] ss:$8 sps:$4 sm:$0xff]  }
 0x19a   :  { %3276 = vmatpush1.bf16.msra.mxu1 %v4901_v60  ;;  %v5014_v60 = vld [vmem:[%s6813_s8 + $0x54] ss:$8 sps:$4 sm:$0xff]  }
 0x19b   :  { %3277 = vmatprep.subr.bf16.mxu1 %v4909_v61  ;;  %v4973_v61 = vld [vmem:[%s6807_s2 + $0x740] ss:$8 sps:$4 sm:$0xff]  }
 0x19c   :  { %1972 = vmatpush1.bf16.msra.mxu0 %v4904_v62  ;;  %v4978_v62 = vld [vmem:[%s6807_s2 + $0x754] ss:$8 sps:$4 sm:$0xff]  }
 0x19d   :  { %1973 = vmatprep.subr.bf16.mxu0 %v4912_v63  ;;  %v5012_v63 = vld [vmem:[%s6813_s8 + $0x50] ss:$8 sps:$4 sm:$0xff]  }
 0x19e   :  { %3278 = vmatpush1.bf16.msra.mxu1 %v4907_v0  ;;  %v5020_v0 = vld [vmem:[%s6813_s8 + $0x64] ss:$8 sps:$4 sm:$0xff]  }
 0x19f   :  { %3279 = vmatprep.subr.bf16.mxu1 %v4915_v45  ;;  %v4976_v45 = vld [vmem:[%s6807_s2 + $0x750] ss:$8 sps:$4 sm:$0xff]  }
 0x1a0   :  { %1974 = vmatpush1.bf16.msra.mxu0 %v4910_v1  ;;  %v4981_v1 = vld [vmem:[%s6807_s2 + $0x764] ss:$8 sps:$4 sm:$0xff]  }
 0x1a1   :  { %1975 = vmatprep.subr.bf16.mxu0 %v4918_v2  ;;  %v5018_v2 = vld [vmem:[%s6813_s8 + $0x60] ss:$8 sps:$4 sm:$0xff]  }
 0x1a2   :  { %3280 = vmatpush1.bf16.msra.mxu1 %v4913_v3  ;;  %v5026_v3 = vld [vmem:[%s6813_s8 + $0x74] ss:$8 sps:$4 sm:$0xff]  }
 0x1a3   :  { %3281 = vmatprep.subr.bf16.mxu1 %v4921_v4  ;;  %v4979_v4 = vld [vmem:[%s6807_s2 + $0x760] ss:$8 sps:$4 sm:$0xff]  }
 0x1a4   :  { %1976 = vmatpush1.bf16.msra.mxu0 %v4916_v5  ;;  %v4987_v5 = vld [vmem:[%s6807_s2 + $0x774] ss:$8 sps:$4 sm:$0xff]  }
 0x1a5   :  { %1977 = vmatprep.subr.bf16.mxu0 %v4924_v7  ;;  %v5024_v7 = vld [vmem:[%s6813_s8 + $0x70] ss:$8 sps:$4 sm:$0xff]  }
 0x1a6   :  { %3282 = vmatpush1.bf16.msra.mxu1 %v4919_v9  ;;  %v5032_v9 = vld [vmem:[%s6813_s8 + $0x84] ss:$8 sps:$4 sm:$0xff]  }
 0x1a7   :  { %3283 = vmatprep.subr.bf16.mxu1 %v4927_v10  ;;  %v4985_v10 = vld [vmem:[%s6807_s2 + $0x770] ss:$8 sps:$4 sm:$0xff]  }
 0x1a8   :  { %1978 = vmatpush1.bf16.msra.mxu0 %v4922_v11  ;;  %v4993_v11 = vld [vmem:[%s6807_s2 + $0x784] ss:$8 sps:$4 sm:$0xff]  }
 0x1a9   :  { %1979 = vmatprep.subr.bf16.mxu0 %v4930_v12  ;;  %v5030_v12 = vld [vmem:[%s6813_s8 + $0x80] ss:$8 sps:$4 sm:$0xff]  }
 0x1aa   :  { %3284 = vmatpush1.bf16.msra.mxu1 %v4925_v14  ;;  %v5038_v14 = vld [vmem:[%s6813_s8 + $0x94] ss:$8 sps:$4 sm:$0xff]  }
 0x1ab   :  { %3285 = vmatprep.subr.bf16.mxu1 %v4933_v16  ;;  %v4991_v16 = vld [vmem:[%s6807_s2 + $0x780] ss:$8 sps:$4 sm:$0xff]  }
 0x1ac   :  { %1980 = vmatpush1.bf16.msra.mxu0 %v4928_v17  ;;  %v4999_v17 = vld [vmem:[%s6807_s2 + $0x794] ss:$8 sps:$4 sm:$0xff]  }
 0x1ad   :  { %1981 = vmatprep.subr.bf16.mxu0 %v4936_v18  ;;  %v5036_v18 = vld [vmem:[%s6813_s8 + $0x90] ss:$8 sps:$4 sm:$0xff]  }
 0x1ae   :  { %3286 = vmatpush1.bf16.msra.mxu1 %v4931_v36  ;;  %v5041_v36 = vld [vmem:[%s6813_s8 + $0xa4] ss:$8 sps:$4 sm:$0xff]  }
 0x1af   :  { %3287 = vmatprep.subr.bf16.mxu1 %v4939_v19  ;;  %v4997_v19 = vld [vmem:[%s6807_s2 + $0x790] ss:$8 sps:$4 sm:$0xff]  }
 0x1b0   :  { %1982 = vmatpush1.bf16.msra.mxu0 %v4934_v54  ;;  %v5005_v54 = vld [vmem:[%s6807_s2 + $0x7a4] ss:$8 sps:$4 sm:$0xff]  }
 0x1b1   :  { %1983 = vmatprep.subr.bf16.mxu0 %v4942_v27  ;;  %v5039_v27 = vld [vmem:[%s6813_s8 + $0xa0] ss:$8 sps:$4 sm:$0xff]  }
 0x1b2   :  { %3288 = vmatpush1.bf16.msra.mxu1 %v4937_v22  ;;  %v5044_v22 = vld [vmem:[%s6813_s8 + $0xb4] ss:$8 sps:$4 sm:$0xff]  }
 0x1b3   :  { %3289 = vmatprep.subr.bf16.mxu1 %v4945_v48  ;;  %v5003_v48 = vld [vmem:[%s6807_s2 + $0x7a0] ss:$8 sps:$4 sm:$0xff]  }
 0x1b4   :  { %1984 = vmatpush1.bf16.msra.mxu0 %v4940_v24  ;;  %v5011_v24 = vld [vmem:[%s6807_s2 + $0x7b4] ss:$8 sps:$4 sm:$0xff]  }
 0x1b5   :  { %1985 = vmatprep.subr.bf16.mxu0 %v4948_v25  ;;  %v5042_v25 = vld [vmem:[%s6813_s8 + $0xb0] ss:$8 sps:$4 sm:$0xff]  }
 0x1b6   :  { %3290 = vmatpush1.bf16.msra.mxu1 %v4943_v26  ;;  %v5047_v26 = vld [vmem:[%s6813_s8 + $0xc4] ss:$8 sps:$4 sm:$0xff]  }
 0x1b7   :  { %3291 = vmatprep.subr.bf16.mxu1 %v4951_v28  ;;  %v5009_v28 = vld [vmem:[%s6807_s2 + $0x7b0] ss:$8 sps:$4 sm:$0xff]  }
 0x1b8   :  { %1986 = vmatpush1.bf16.msra.mxu0 %v4946_v29  ;;  %v5017_v29 = vld [vmem:[%s6807_s2 + $0x7c4] ss:$8 sps:$4 sm:$0xff]  }
 0x1b9   :  { %1987 = vmatprep.subr.bf16.mxu0 %v4954_v30  ;;  %v5045_v30 = vld [vmem:[%s6813_s8 + $0xc0] ss:$8 sps:$4 sm:$0xff]  }
 0x1ba   :  { %3292 = vmatpush1.bf16.msra.mxu1 %v4949_v31  ;;  %v5050_v31 = vld [vmem:[%s6813_s8 + $0xd4] ss:$8 sps:$4 sm:$0xff]  }
 0x1bb   :  { %3293 = vmatprep.subr.bf16.mxu1 %v4957_v32  ;;  %v5015_v32 = vld [vmem:[%s6807_s2 + $0x7c0] ss:$8 sps:$4 sm:$0xff]  }
 0x1bc   :  { %1988 = vmatpush1.bf16.msra.mxu0 %v4952_v35  ;;  %v5023_v35 = vld [vmem:[%s6807_s2 + $0x7d4] ss:$8 sps:$4 sm:$0xff]  }
 0x1bd   :  { %1989 = vmatprep.subr.bf16.mxu0 %v4960_v13  ;;  %v5048_v13 = vld [vmem:[%s6813_s8 + $0xd0] ss:$8 sps:$4 sm:$0xff]  }
 0x1be   :  { %3294 = vmatpush1.bf16.msra.mxu1 %v4955_v37  ;;  %v5053_v37 = vld [vmem:[%s6813_s8 + $0xe4] ss:$8 sps:$4 sm:$0xff]  }
 0x1bf   :  { %3712 = vmatprep.subr.bf16.mxu1 %v4984_v50  ;;  %v5021_v50 = vld [vmem:[%s6807_s2 + $0x7d0] ss:$8 sps:$4 sm:$0xff]  }
 0x1c0   :  { %1990 = vmatpush1.bf16.msra.mxu0 %v4958_v38  ;;  %v5029_v38 = vld [vmem:[%s6807_s2 + $0x7e4] ss:$8 sps:$4 sm:$0xff]  }
 0x1c1   :  { %3296 = vmatmul.mubr.bf16.vlgmr.msra.gmra.mrb[12].mxu1 %v6063_v15  ;;  %2000 = vmatprep.subr.bf16.mxu0 %v4963_v39  ;;  %v4964_v15 = vld [vmem:[%s6807_s2 + $0x710] ss:$8 sps:$4 sm:$0xff]   ;;  %v5051_v39 = vld [vmem:[%s6813_s8 + $0xe0] ss:$8 sps:$4 sm:$0xff]  }
 0x1c2   :  { %3713 = vmatpush1.bf16.msra.mxu1 %v4982_v41  ;;  %v5056_v41 = vld [vmem:[%s6813_s8 + $0xf4] ss:$8 sps:$4 sm:$0xff]  }
 0x1c3   :  { %1992 = vmatmul.mubr.bf16.vlgmr.msra.gmra.mrb[0].mxu0 %v6475_v42  ;;  %3714 = vmatprep.subr.bf16.mxu1 %v4990_v43  ;;  %v5027_v43 = vld [vmem:[%s6807_s2 + $0x7e0] ss:$8 sps:$4 sm:$0xff]  }
 0x1c4   :  { %2001 = vmatpush1.bf16.msra.mxu0 %v4961_v44  ;;  %2032 = vmatprep.mubr.bf16.mxu0 %v416_v46  ;;  %v5035_v44 = vld [vmem:[%s6807_s2 + $0x7f4] ss:$8 sps:$4 sm:$0xff]   ;;  %v5054_v46 = vld [vmem:[%s6813_s8 + $0xf0] ss:$8 sps:$4 sm:$0xff]  }
 0x1c5   :  { %2002 = vmatprep.subr.bf16.mxu0 %v4966_v40  ;;  %v5059_v40 = vld [vmem:[%s6813_s8 + $0x104] ss:$8 sps:$4 sm:$0xff]  }
 0x1c6   :  { %3715 = vmatpush1.bf16.msra.mxu1 %v4988_v21  ;;  %v5033_v21 = vld [vmem:[%s6807_s2 + $0x7f0] ss:$8 sps:$4 sm:$0xff]  }
 0x1c7   :  { %3716 = vmatprep.subr.bf16.mxu1 %v4996_v47  ;;  %v414_v47 = vcombine.high %v6475_v42, %v6475_v42 }
 0x1c8   :  { %2003 = vmatpush1.bf16.msra.mxu0 %v4964_v15  ;;  %v6672_v15 = vld [vmem:[%s6814_s7] sm:$0xf] }
 0x1c9   :  { %2004 = vmatprep.subr.bf16.mxu0 %v4969_v33  ;;  %v2483_v33 = vrot.slane %v6672_v15, %v5795_v20 }
 0x1ca   :  { %3717 = vmatpush1.bf16.msra.mxu1 %v4994_v49  ;;  %v2487_v49 = vrot.slane %v6672_v15, %v5806_v23 }
 0x1cb   :  { %3718 = vmatprep.subr.bf16.mxu1 %v5002_v51 }
 0x1cc   :  { %2005 = vmatpush1.bf16.msra.mxu0 %v4967_v52 }
 0x1cd   :  { %2006 = vmatprep.subr.bf16.mxu0 %v4972_v53 }
 0x1ce   :  { %3719 = vmatpush1.bf16.msra.mxu1 %v5000_v55 }
 0x1cf   :  { %3720 = vmatprep.subr.bf16.mxu1 %v5008_v56 }
 0x1d0   :  { %2007 = vmatpush1.bf16.msra.mxu0 %v4970_v57 }
 0x1d1   :  { %2008 = vmatprep.subr.bf16.mxu0 %v4975_v58 }
 0x1d2   :  { %3721 = vmatpush1.bf16.msra.mxu1 %v5006_v59 }
 0x1d3   :  { %3722 = vmatprep.subr.bf16.mxu1 %v5014_v60 }
 0x1d4   :  { %2009 = vmatpush1.bf16.msra.mxu0 %v4973_v61 }
 0x1d5   :  { %2010 = vmatprep.subr.bf16.mxu0 %v4978_v62  ;;  %v5057_v62 = vld [vmem:[%s6813_s8 + $0x100] ss:$8 sps:$4 sm:$0xff]  }
 0x1d6   :  { %3723 = vmatpush1.bf16.msra.mxu1 %v5012_v63 }
 0x1d7   :  { %3724 = vmatprep.subr.bf16.mxu1 %v5020_v0  ;;  %v5062_v0 = vld [vmem:[%s6813_s8 + $0x114] ss:$8 sps:$4 sm:$0xff]  }
 0x1d8   :  { %2011 = vmatpush1.bf16.msra.mxu0 %v4976_v45  ;;  %v5060_v45 = vld [vmem:[%s6813_s8 + $0x110] ss:$8 sps:$4 sm:$0xff]  }
 0x1d9   :  { %2012 = vmatprep.subr.bf16.mxu0 %v4981_v1  ;;  %v5065_v1 = vld [vmem:[%s6813_s8 + $0x124] ss:$8 sps:$4 sm:$0xff]  }
 0x1da   :  { %3725 = vmatpush1.bf16.msra.mxu1 %v5018_v2  ;;  %v5063_v2 = vld [vmem:[%s6813_s8 + $0x120] ss:$8 sps:$4 sm:$0xff]  }
 0x1db   :  { %3726 = vmatprep.subr.bf16.mxu1 %v5026_v3  ;;  %v5068_v3 = vld [vmem:[%s6813_s8 + $0x134] ss:$8 sps:$4 sm:$0xff]  }
 0x1dc   :  { %2013 = vmatpush1.bf16.msra.mxu0 %v4979_v4  ;;  %v5066_v4 = vld [vmem:[%s6813_s8 + $0x130] ss:$8 sps:$4 sm:$0xff]  }
 0x1dd   :  { %2014 = vmatprep.subr.bf16.mxu0 %v4987_v5  ;;  %v5071_v5 = vld [vmem:[%s6813_s8 + $0x144] ss:$8 sps:$4 sm:$0xff]  }
 0x1de   :  { %3727 = vmatpush1.bf16.msra.mxu1 %v5024_v7  ;;  %v5069_v7 = vld [vmem:[%s6813_s8 + $0x140] ss:$8 sps:$4 sm:$0xff]  }
 0x1df   :  { %3728 = vmatprep.subr.bf16.mxu1 %v5032_v9  ;;  %v5074_v9 = vld [vmem:[%s6813_s8 + $0x154] ss:$8 sps:$4 sm:$0xff]  }
 0x1e0   :  { %2015 = vmatpush1.bf16.msra.mxu0 %v4985_v10  ;;  %v5072_v10 = vld [vmem:[%s6813_s8 + $0x150] ss:$8 sps:$4 sm:$0xff]  }
 0x1e1   :  { %2016 = vmatprep.subr.bf16.mxu0 %v4993_v11  ;;  %v5077_v11 = vld [vmem:[%s6813_s8 + $0x164] ss:$8 sps:$4 sm:$0xff]  }
 0x1e2   :  { %3729 = vmatpush1.bf16.msra.mxu1 %v5030_v12  ;;  %v5075_v12 = vld [vmem:[%s6813_s8 + $0x160] ss:$8 sps:$4 sm:$0xff]  }
 0x1e3   :  { %3730 = vmatprep.subr.bf16.mxu1 %v5038_v14  ;;  %v5080_v14 = vld [vmem:[%s6813_s8 + $0x174] ss:$8 sps:$4 sm:$0xff]  }
 0x1e4   :  { %2017 = vmatpush1.bf16.msra.mxu0 %v4991_v16  ;;  %v5078_v16 = vld [vmem:[%s6813_s8 + $0x170] ss:$8 sps:$4 sm:$0xff]  }
 0x1e5   :  { %2018 = vmatprep.subr.bf16.mxu0 %v4999_v17  ;;  %v5083_v17 = vld [vmem:[%s6813_s8 + $0x184] ss:$8 sps:$4 sm:$0xff]  }
 0x1e6   :  { %3731 = vmatpush1.bf16.msra.mxu1 %v5036_v18  ;;  %v5081_v18 = vld [vmem:[%s6813_s8 + $0x180] ss:$8 sps:$4 sm:$0xff]  }
 0x1e7   :  { %3732 = vmatprep.subr.bf16.mxu1 %v5041_v36  ;;  %v5086_v36 = vld [vmem:[%s6813_s8 + $0x194] ss:$8 sps:$4 sm:$0xff]  }
 0x1e8   :  { %2019 = vmatpush1.bf16.msra.mxu0 %v4997_v19  ;;  %v5084_v19 = vld [vmem:[%s6813_s8 + $0x190] ss:$8 sps:$4 sm:$0xff]  }
 0x1e9   :  { %2020 = vmatprep.subr.bf16.mxu0 %v5005_v54  ;;  %v5089_v54 = vld [vmem:[%s6813_s8 + $0x1a4] ss:$8 sps:$4 sm:$0xff]  }
 0x1ea   :  { %3733 = vmatpush1.bf16.msra.mxu1 %v5039_v27  ;;  %v5087_v27 = vld [vmem:[%s6813_s8 + $0x1a0] ss:$8 sps:$4 sm:$0xff]  }
 0x1eb   :  { %3734 = vmatprep.subr.bf16.mxu1 %v5044_v22  ;;  %v5092_v22 = vld [vmem:[%s6813_s8 + $0x1b4] ss:$8 sps:$4 sm:$0xff]  }
 0x1ec   :  { %2021 = vmatpush1.bf16.msra.mxu0 %v5003_v48  ;;  %v5090_v48 = vld [vmem:[%s6813_s8 + $0x1b0] ss:$8 sps:$4 sm:$0xff]  }
 0x1ed   :  { %2022 = vmatprep.subr.bf16.mxu0 %v5011_v24  ;;  %v5095_v24 = vld [vmem:[%s6813_s8 + $0x1c4] ss:$8 sps:$4 sm:$0xff]  }
 0x1ee   :  { %3735 = vmatpush1.bf16.msra.mxu1 %v5042_v25  ;;  %v5093_v25 = vld [vmem:[%s6813_s8 + $0x1c0] ss:$8 sps:$4 sm:$0xff]  }
 0x1ef   :  { %3736 = vmatprep.subr.bf16.mxu1 %v5047_v26  ;;  %v5098_v26 = vld [vmem:[%s6813_s8 + $0x1d4] ss:$8 sps:$4 sm:$0xff]  }
 0x1f0   :  { %2023 = vmatpush1.bf16.msra.mxu0 %v5009_v28  ;;  %v5096_v28 = vld [vmem:[%s6813_s8 + $0x1d0] ss:$8 sps:$4 sm:$0xff]  }
 0x1f1   :  { %2024 = vmatprep.subr.bf16.mxu0 %v5017_v29  ;;  %v5101_v29 = vld [vmem:[%s6813_s8 + $0x1e4] ss:$8 sps:$4 sm:$0xff]  }
 0x1f2   :  { %3737 = vmatpush1.bf16.msra.mxu1 %v5045_v30  ;;  %v5099_v30 = vld [vmem:[%s6813_s8 + $0x1e0] ss:$8 sps:$4 sm:$0xff]  }
 0x1f3   :  { %3738 = vmatprep.subr.bf16.mxu1 %v5050_v31  ;;  %v5104_v31 = vld [vmem:[%s6813_s8 + $0x1f4] ss:$8 sps:$4 sm:$0xff]  }
 0x1f4   :  { %2025 = vmatpush1.bf16.msra.mxu0 %v5015_v32  ;;  %v5102_v32 = vld [vmem:[%s6813_s8 + $0x1f0] ss:$8 sps:$4 sm:$0xff]  }
 0x1f5   :  { %2026 = vmatprep.subr.bf16.mxu0 %v5023_v35  ;;  %v2491_v35 = vrot.slane %v6672_v15, %v2086_v6  ;;  %v3798_v6 = vld [vmem:[%s6816_s10] sm:$0x3] }
 0x1f6   :  { %3739 = vmatpush1.bf16.msra.mxu1 %v5048_v13  ;;  %v2495_v13 = vrot.slane %v6672_v15, %v2090_v8  ;;  %v310_v8 = vrot.slane %v305_v34, %v5795_v20  ;;  %v314_v15 = vrot.slane %v305_v34, %v5806_v23 }
 0x1f7   :  { %3740 = vmatprep.subr.bf16.mxu1 %v5053_v37 }
 0x1f8   :  { %2027 = vmatpush1.bf16.msra.mxu0 %v5021_v50 }
 0x1f9   :  { %2028 = vmatprep.subr.bf16.mxu0 %v5029_v38 }
 0x1fa   :  { %3741 = vmatpush1.bf16.msra.mxu1 %v5051_v39 }
 0x1fb   :  { %3742 = vmatprep.subr.bf16.mxu1 %v5056_v41 }
 0x1fc   :  { %2029 = vmatpush1.bf16.msra.mxu0 %v5027_v43 }
 0x1fd   :  { %2030 = vmatprep.subr.bf16.mxu0 %v5035_v44 }
 0x1fe   :  { %3743 = vmatpush1.bf16.msra.mxu1 %v5054_v46 }
 0x1ff   :  { %3753 = vmatprep.subr.bf16.mxu1 %v5059_v40 }
 0x200   :  { %2031 = vmatpush1.bf16.msra.mxu0 %v5033_v21 }
 0x203   :  { %2033 = vmatmul.mubr.bf16.vlgmr.msra.gmra.mrb[0].mxu0 %v414_v47 }
 0x214   :  { %v3215_v51 = vpop.f32.mrb[8].mxu1 }
 0x215   :  { %v4335_v52 = vadd.f32 %v3215_v51, %v2483_v33  ;;  %v3217_v53 = vpop.f32.mrb[9].mxu1 }
 0x216   :  { %v4336_v55 = vadd.f32 %v3217_v53, %v2487_v49  ;;  %v3219_v56 = vpop.f32.mrb[10].mxu1  ;;  %v3803_v49 = vrot.slane %v3798_v6, %v5795_v20 }
 0x217   :  { %v3304_v42 = vmul.f32 0.01, %v4335_v52  ;;  %v3220_v57 = vpop.f32.mrb[11].mxu1 }
 0x218   :  { %v3305_v58 = vmul.f32 0.01, %v4336_v55 }
 0x219   :  { %v3308_v59 = vmax.f32 %v4335_v52, %v3304_v42  ;;  %v3807_v52 = vrot.slane %v3798_v6, %v5806_v23 }
 0x21a   :  { %v3309_v60 = vmax.f32 %v4336_v55, %v3305_v58 }
 0x21b   :  { %v3312_v63 = vpack.c.bf16 %v3308_v59, %v3308_v59 }
 0x21c   :  { %v3313_v61 = vpack.c.bf16 %v3309_v60, %v3309_v60 }
 0x21e   :  { %3744 = vmatprep.mubr.bf16.mxu1 %v3313_v61 }
 0x21f   :  { %3745 = vmatmul.mubr.bf16.vlgmr.msra.gmra.mrb[16].mxu1 %v3312_v63  ;;  %v18_v63 = vstv %s6817_s12 }
 0x220   :  { %3754 = vmatpush1.bf16.msra.mxu1 %v5057_v62  ;;  %19 = vst [vmem:[#allocation2] sm:$0x1] %v18_v63 }
 0x221   :  { %3755 = vmatprep.subr.bf16.mxu1 %v5062_v0  ;;  %v3380_v0 = vld [vmem:[%s6818_s9] sm:$0x3] }
 0x224   :  { %3756 = vmatpush1.bf16.msra.mxu1 %v5060_v45  ;;  %v3385_v45 = vrot.slane %v3380_v0, %v5795_v20 }
 0x225   :  { %3757 = vmatprep.subr.bf16.mxu1 %v5065_v1  ;;  %v3389_v1 = vrot.slane %v3380_v0, %v5806_v23 }
 0x228   :  { %3758 = vmatpush1.bf16.msra.mxu1 %v5063_v2 }
 0x229   :  { %3759 = vmatprep.subr.bf16.mxu1 %v5068_v3  ;;  %v3818_v3 = vld [vmem:[%s6819_s11] sm:$0x3] }
 0x22c   :  { %3760 = vmatpush1.bf16.msra.mxu1 %v5066_v4 }
 0x22d   :  { %3761 = vmatprep.subr.bf16.mxu1 %v5071_v5 }
 0x230   :  { %3762 = vmatpush1.bf16.msra.mxu1 %v5069_v7 }
 0x231   :  { %3763 = vmatprep.subr.bf16.mxu1 %v5074_v9 }
 0x234   :  { %3764 = vmatpush1.bf16.msra.mxu1 %v5072_v10 }
 0x235   :  { %3765 = vmatprep.subr.bf16.mxu1 %v5077_v11 }
 0x238   :  { %3766 = vmatpush1.bf16.msra.mxu1 %v5075_v12  ;;  %v3823_v12 = vrot.slane %v3818_v3, %v5795_v20 }
 0x239   :  { %3767 = vmatprep.subr.bf16.mxu1 %v5080_v14 }
 0x23c   :  { %3768 = vmatpush1.bf16.msra.mxu1 %v5078_v16  ;;  %v3827_v16 = vrot.slane %v3818_v3, %v5806_v23 }
 0x23d   :  { %3769 = vmatprep.subr.bf16.mxu1 %v5083_v17 }
 0x240   :  { %3770 = vmatpush1.bf16.msra.mxu1 %v5081_v18 }
 0x241   :  { %3771 = vmatprep.subr.bf16.mxu1 %v5086_v36 }
 0x244   :  { %3772 = vmatpush1.bf16.msra.mxu1 %v5084_v19 }
 0x245   :  { %3773 = vmatprep.subr.bf16.mxu1 %v5089_v54 }
 0x248   :  { %3774 = vmatpush1.bf16.msra.mxu1 %v5087_v27 }
 0x249   :  { %3775 = vmatprep.subr.bf16.mxu1 %v5092_v22 }
 0x24c   :  { %3776 = vmatpush1.bf16.msra.mxu1 %v5090_v48 }
 0x24d   :  { %3777 = vmatprep.subr.bf16.mxu1 %v5095_v24  ;;  %v4332_v24 = vld [vmem:[#allocation2] ss:$0 sm:$0xff] }
 0x250   :  { %3778 = vmatpush1.bf16.msra.mxu1 %v5093_v25 }
 0x251   :  { %3779 = vmatprep.subr.bf16.mxu1 %v5098_v26 }
 0x254   :  { %3780 = vmatpush1.bf16.msra.mxu1 %v5096_v28 }
 0x255   :  { %3781 = vmatprep.subr.bf16.mxu1 %v5101_v29 }
 0x258   :  { %3782 = vmatpush1.bf16.msra.mxu1 %v5099_v30 }
 0x259   :  { %3783 = vmatprep.subr.bf16.mxu1 %v5104_v31 }
 0x25c   :  { %3784 = vmatpush1.bf16.msra.mxu1 %v5102_v32 }
 0x294   :  { %v3297_v37 = vpop.f32.mrb[12].mxu1 }
 0x295   :  { %v4337_v50 = vadd.f32 %v3297_v37, %v2491_v35  ;;  %v3299_v38 = vpop.f32.mrb[13].mxu1 }
 0x296   :  { %v4338_v39 = vadd.f32 %v3299_v38, %v2495_v13  ;;  %v3301_v41 = vpop.f32.mrb[14].mxu1 }
 0x297   :  { %v3306_v43 = vmul.f32 0.01, %v4337_v50  ;;  %v3302_v44 = vpop.f32.mrb[15].mxu1 }
 0x298   :  { %v3307_v46 = vmul.f32 0.01, %v4338_v39 }
 0x299   :  { %v3310_v40 = vmax.f32 %v4337_v50, %v3306_v43 }
 0x29a   :  { %v3311_v21 = vmax.f32 %v4338_v39, %v3307_v46 }
 0x29b   :  { %v3314_v33 = vpack.c.bf16 %v3310_v40, %v3310_v40 }
 0x29c   :  { %v3315_v47 = vpack.c.bf16 %v3311_v21, %v3311_v21 }
 0x29e   :  { %3785 = vmatprep.mubr.bf16.mxu1 %v3315_v47 }
 0x29f   :  { %3786 = vmatmul.mubr.bf16.vlgmr.msra.gmra.mrb[16].mxu1 %v3314_v33 }
 0x2d6   :  { %v2034_v51 = vpop.f32.mrb[0].mxu0 }
 0x2d7   :  { %v4333_v53 = vadd.f32 %v2034_v51, %v310_v8  ;;  %v2036_v55 = vpop.f32.mrb[1].mxu0 }
 0x2d8   :  { %v4334_v56 = vadd.f32 %v2036_v55, %v314_v15  ;;  %v2038_v42 = vpop.f32.mrb[2].mxu0 }
 0x2d9   :  { %v3810_v57 = vmul.f32 %v4333_v53, %v3803_v49  ;;  %v2039_v58 = vpop.f32.mrb[3].mxu0 }
 0x2da   :  { %v3811_v59 = vmul.f32 %v4334_v56, %v3807_v52 }
 0x2db   :  { %v3813_v60 = vsel %vm3812_vm0, %v3810_v57, 0.0 }
 0x2dc   :  { %v3814_v61 = vsel %vm3812_vm0, %v3811_v59, 0.0 }
 0x2dd   :  { %v3815_v62 = vadd.f32 %v3814_v61, %v3813_v60 }
 0x2df   :  { %3816 = vadd.xlane.f32.xlu0 %v3815_v62 }
 0x36c   :  { %v3817_v48 = vpop.xlane.xlu0 %3816 }
 0x372   :  { %v3787_v2 = vpop.f32.mrb[16].mxu1 }
 0x373   :  { %v4339_v4 = vadd.f32 %v3787_v2, %v3385_v45  ;;  %v3789_v5 = vpop.f32.mrb[17].mxu1 }
 0x374   :  { %v4340_v7 = vadd.f32 %v3789_v5, %v3389_v1  ;;  %v3791_v9 = vpop.f32.mrb[18].mxu1 }
 0x375   :  { %v3794_v10 = vmul.f32 0.01, %v4339_v4  ;;  %v3792_v11 = vpop.f32.mrb[19].mxu1 }
 0x376   :  { %v3795_v14 = vmul.f32 0.01, %v4340_v7 }
 0x377   :  { %v3796_v17 = vmax.f32 %v4339_v4, %v3794_v10 }
 0x378   :  { %v3797_v18 = vmax.f32 %v4340_v7, %v3795_v14 }
 0x379   :  { %v3830_v36 = vmul.f32 %v3823_v12, %v3796_v17 }
 0x37a   :  { %v3831_v19 = vmul.f32 %v3827_v16, %v3797_v18 }
 0x37b   :  { %v3832_v54 = vsel %vm3812_vm0, %v3830_v36, 0.0 }
 0x37c   :  { %v3833_v27 = vsel %vm3812_vm0, %v3831_v19, 0.0 }
 0x37d   :  { %v3834_v22 = vadd.f32 %v3833_v27, %v3832_v54 }
 0x37f   :  { %3835 = vadd.xlane.f32.xlu0 %v3834_v22 }
 0x40c   :  { %v3836_v25 = vpop.xlane.xlu0 %3835 }
 0x40d   :  { %v3837_v26 = vadd.f32 %v3836_v25, %v3817_v48 }
 0x40f   :  { %v3845_v28 = vadd.f32 %v4332_v24, %v3837_v26 }
 0x411   :  { %3847 = vst.msk [vmem:[%s6820_s13] sm:$0x3] %vm3846_vm1, %v3845_v28 }

</bundles_post_ra>
